<compile_context>
chip_gen: v7x
topology: tpu7x:2x2x1
jax: 0.10.0
libtpu: 0.0.40
codegen_flags: <defaults>
</compile_context>

<pallas_src>
import jax
import jax.numpy as jnp
from jax.experimental import pallas as pl
from jax.experimental.pallas import tpu as pltpu

# ----------------------- config (scaled-down, structure preserved) -----------------
dim_model = 256          # reference: 4096
n_vocab = 2
n_layers = 4
d_state = 16             # mamba defaults
d_conv = 4
expand = 2
d_inner = expand * dim_model
dt_rank = dim_model // 16

BATCH = 2
SEQ = 8

DEC_PAD = 128            # lane-dense decoder output width (n_vocab padded up to 128)

# Channel tile for conv / scan kernels.  The scan keeps the (d_state, tc) hidden state in
# registers, so the tile is sized to keep h + one (d_state, tc) temporary well inside the
# 64-vreg file while still cutting grid-step overhead vs. small tiles.
_CH_TILE = 1024


def _hw_config():
    """Per-generation scoped-VMEM limit and streaming-matmul lane-tile cap.

    v5e / v6e have 128 MiB VMEM -> large (full-K, 2048-lane) weight tiles under a ~100 MiB limit;
    v7x has 64 MiB -> cap weight tiles at 1024 lanes under a 48 MiB limit.  Falls back to the
    conservative (v7x) setting if the query is unavailable.
    """
    try:
        vmem = int(pltpu.get_tpu_info().vmem_capacity_bytes)
    except Exception:
        vmem = 64 * 1024 * 1024
    if vmem > 96 * 1024 * 1024:
        return 100 * 1024 * 1024, 2048
    return 48 * 1024 * 1024, 1024


_VMEM_LIMIT, _MM_TN_CAP = _hw_config()


def _pick_tile(n, cap):
    """Largest tile <= cap that divides n (prefers lane-dense multiples of 128)."""
    if n <= cap:
        return n
    for t in (cap, 4096, 2048, 1024, 512, 256, 128):
        if t <= cap and n % t == 0:
            return t
    return n


# ----------------------------- matmul kernels ---------------------------------------
# M = B*L is tiny, so every projection is pure HBM weight streaming: a single full-K block
# (no K grid axis, no accumulator), large lane-dense N tiles, and reduced-precision weights.

def _mm_q_kernel(a_ref, w_ref, s_ref, b_ref, o_ref):
    # int8 weights; per-output-channel scale folded into the epilogue (dot(a, q)*s == dot(a, q*s)).
    a = a_ref[...].astype(jnp.bfloat16)
    w = w_ref[...].astype(jnp.float32).astype(jnp.bfloat16)
    o_ref[...] = (jnp.dot(a, w, preferred_element_type=jnp.float32) * s_ref[...]
                  + b_ref[...])


def _mm_bf16_kernel(a_ref, w_ref, b_ref, o_ref):
    o_ref[...] = (jnp.dot(a_ref[...].astype(jnp.bfloat16), w_ref[...],
                          preferred_element_type=jnp.float32)
                  + b_ref[...])


def pl_matmul_q(a, w_q, scale, bias=None):
    """a: (M, K) f32; w_q: (K, N) int8; scale: (1, N) f32 -> (M, N) f32."""
    M, K = a.shape
    _, N = w_q.shape
    bias2 = (jnp.zeros((1, N), jnp.float32) if bias is None
             else jnp.asarray(bias, jnp.float32).reshape(1, N))
    tn = _pick_tile(N, _MM_TN_CAP)
    return pl.pallas_call(
        _mm_q_kernel,
        out_shape=jax.ShapeDtypeStruct((M, N), jnp.float32),
        grid=(N // tn,),
        in_specs=[
            pl.BlockSpec((M, K), lambda j: (0, 0)),
            pl.BlockSpec((K, tn), lambda j: (0, j)),
            pl.BlockSpec((1, tn), lambda j: (0, j)),
            pl.BlockSpec((1, tn), lambda j: (0, j)),
        ],
        out_specs=pl.BlockSpec((M, tn), lambda j: (0, j)),
        compiler_params=pltpu.CompilerParams(
            dimension_semantics=("parallel",),
            vmem_limit_bytes=_VMEM_LIMIT),
    )(a, w_q, scale, bias2)


def pl_matmul_bf16(a, w, bias=None):
    """a: (M, K) f32; w: (K, N) bf16 -> (M, N) f32.  Used for the small projections."""
    M, K = a.shape
    _, N = w.shape
    bias2 = (jnp.zeros((1, N), jnp.float32) if bias is None
             else jnp.asarray(bias, jnp.float32).reshape(1, N))
    tn = _pick_tile(N, _MM_TN_CAP)
    return pl.pallas_call(
        _mm_bf16_kernel,
        out_shape=jax.ShapeDtypeStruct((M, N), jnp.float32),
        grid=(N // tn,),
        in_specs=[
            pl.BlockSpec((M, K), lambda j: (0, 0)),
            pl.BlockSpec((K, tn), lambda j: (0, j)),
            pl.BlockSpec((1, tn), lambda j: (0, j)),
        ],
        out_specs=pl.BlockSpec((M, tn), lambda j: (0, j)),
        compiler_params=pltpu.CompilerParams(
            dimension_semantics=("parallel",),
            vmem_limit_bytes=_VMEM_LIMIT),
    )(a, w, bias2)


def _in_proj_kernel(a_ref, wx_ref, sx_ref, wz_ref, sz_ref, ox_ref, oz_ref):
    # One kernel emits both halves of in_proj (x / z): the activation is read once and no
    # downstream slicing of a concatenated output is needed.
    a = a_ref[...].astype(jnp.bfloat16)
    wx = wx_ref[...].astype(jnp.float32).astype(jnp.bfloat16)
    wz = wz_ref[...].astype(jnp.float32).astype(jnp.bfloat16)
    ox_ref[...] = jnp.dot(a, wx, preferred_element_type=jnp.float32) * sx_ref[...]
    oz_ref[...] = jnp.dot(a, wz, preferred_element_type=jnp.float32) * sz_ref[...]


def pl_in_proj(a, wx_q, sx, wz_q, sz):
    M, K = a.shape
    N = wx_q.shape[1]
    tn = _pick_tile(N, _MM_TN_CAP)
    return pl.pallas_call(
        _in_proj_kernel,
        out_shape=(jax.ShapeDtypeStruct((M, N), jnp.float32),
                   jax.ShapeDtypeStruct((M, N), jnp.float32)),
        grid=(N // tn,),
        in_specs=[
            pl.BlockSpec((M, K), lambda j: (0, 0)),
            pl.BlockSpec((K, tn), lambda j: (0, j)),
            pl.BlockSpec((1, tn), lambda j: (0, j)),
            pl.BlockSpec((K, tn), lambda j: (0, j)),
            pl.BlockSpec((1, tn), lambda j: (0, j)),
        ],
        out_specs=(pl.BlockSpec((M, tn), lambda j: (0, j)),
                   pl.BlockSpec((M, tn), lambda j: (0, j))),
        compiler_params=pltpu.CompilerParams(
            dimension_semantics=("parallel",),
            vmem_limit_bytes=_VMEM_LIMIT),
    )(a, wx_q, sx, wz_q, sz)


def _x_proj_kernel(a_ref, wd_ref, wb_ref, wc_ref, od_ref, ob_ref, oc_ref):
    # dt / B / C emitted as three separate outputs (each block == its full array, no lane-offset
    # slicing of a non-128-aligned concatenated result in the wrapper).
    a = a_ref[...].astype(jnp.bfloat16)
    od_ref[...] = jnp.dot(a, wd_ref[...], preferred_element_type=jnp.float32)
    ob_ref[...] = jnp.dot(a, wb_ref[...], preferred_element_type=jnp.float32)
    oc_ref[...] = jnp.dot(a, wc_ref[...], preferred_element_type=jnp.float32)


def pl_x_proj(a, w_dtr, w_b, w_c):
    M, K = a.shape
    R = w_dtr.shape[1]
    S = w_b.shape[1]
    return pl.pallas_call(
        _x_proj_kernel,
        out_shape=(jax.ShapeDtypeStruct((M, R), jnp.float32),
                   jax.ShapeDtypeStruct((M, S), jnp.float32),
                   jax.ShapeDtypeStruct((M, S), jnp.float32)),
        grid=(1,),
        in_specs=[
            pl.BlockSpec((M, K), lambda i: (0, 0)),
            pl.BlockSpec((K, R), lambda i: (0, 0)),
            pl.BlockSpec((K, S), lambda i: (0, 0)),
            pl.BlockSpec((K, S), lambda i: (0, 0)),
        ],
        out_specs=(pl.BlockSpec((M, R), lambda i: (0, 0)),
                   pl.BlockSpec((M, S), lambda i: (0, 0)),
                   pl.BlockSpec((M, S), lambda i: (0, 0))),
        compiler_params=pltpu.CompilerParams(vmem_limit_bytes=_VMEM_LIMIT),
    )(a, w_dtr, w_b, w_c)


# ----------------------------- depthwise causal conv + SiLU -------------------------
def _conv_silu_kernel(x_ref, w_ref, b_ref, o_ref, pad_ref):
    # One (batch, channel-tile) block: causal depthwise conv (kernel d_conv) + SiLU.
    # Padded scratch filled once; taps are static slices.
    # TODO(synk): pltpu.roll-based taps (XLU) instead of padded-scratch slices -- small win at L=8.
    L, C = x_ref.shape
    K = w_ref.shape[0]
    pad_ref[pl.ds(0, K - 1), :] = jnp.zeros((K - 1, C), jnp.float32)
    pad_ref[pl.ds(K - 1, L), :] = x_ref[...]
    acc = b_ref[...]                                       # (1, C), broadcasts
    for k in range(K):                                     # static unroll over taps
        acc = acc + pad_ref[pl.ds(k, L), :] * w_ref[pl.ds(k, 1), :]
    o_ref[...] = acc * (1.0 / (1.0 + jnp.exp(-acc)))


def conv1d_silu(x, w, b):
    """x: (B, L, C) f32; w: (d_conv, C) depthwise taps f32; b: (1, C) f32."""
    B, L, C = x.shape
    K = w.shape[0]
    tc = _pick_tile(C, _CH_TILE)
    return pl.pallas_call(
        _conv_silu_kernel,
        out_shape=jax.ShapeDtypeStruct((B, L, C), jnp.float32),
        grid=(B, C // tc),
        in_specs=[
            pl.BlockSpec((None, L, tc), lambda i, j: (i, 0, j)),
            pl.BlockSpec((K, tc), lambda i, j: (0, j)),
            pl.BlockSpec((1, tc), lambda i, j: (0, j)),
        ],
        out_specs=pl.BlockSpec((None, L, tc), lambda i, j: (i, 0, j)),
        scratch_shapes=[pltpu.VMEM((L + K - 1, tc), jnp.float32)],
        compiler_params=pltpu.CompilerParams(
            dimension_semantics=("parallel", "parallel"),
            vmem_limit_bytes=_VMEM_LIMIT),
    )(x, w, b)


# ----------------------------- selective scan ----------------------------------------
def _scan_kernel(u_ref, dt_ref, z_ref, b_ref, c_ref, a_ref, d_ref, o_ref):
    """State-vectorized selective scan for one (batch, channel-tile) block.

    u/dt/z/o : (L, tc) VMEM blocks.     b/c : (L, d_state, 1) VMEM (column per timestep).
    a        : (d_state, tc) VMEM, A transposed (S4D-real init -> row n == -(n+1)).
    d        : (1, tc) skip weight.

    Per timestep: one (d_state, tc) exp (EUP), one (d_state, tc) multiply-add against the
    register-resident state h (VPU, full-vreg density), one weighted sublane reduce for y (XLU),
    one row store.  softplus(dt) and delta*u are hoisted; skip + SiLU(z) gate is a single
    lane-dense full-block epilogue.
    """
    L, C = u_ref.shape
    S = a_ref.shape[0]

    u = u_ref[...]
    dt = dt_ref[...]
    # numerically safe softplus: max(x,0) + log(1 + exp(-|x|))
    delta = jnp.maximum(dt, 0.0) + jnp.log(1.0 + jnp.exp(-jnp.abs(dt)))
    du = delta * u                                            # (L, C)
    A = a_ref[...]                                            # (S, C)

    h = jnp.zeros((S, C), jnp.float32)
    for t in range(L):                                        # static unroll over time
        dA_t = jnp.exp(A * delta[t:t + 1, :])                 # (S, C)   EUP
        h = dA_t * h + b_ref[t] * du[t:t + 1, :]              # (S, C)   VPU FMA, (S,1)x(1,C) bcast
        o_ref[pl.ds(t, 1), :] = jnp.sum(c_ref[t] * h, axis=0, keepdims=True)   # (1, C) XLU reduce

    # epilogue: skip connection + SiLU(z) gate (full block, lane dense)
    y = o_ref[...] + u * d_ref[...]
    z = z_ref[...]
    o_ref[...] = y * (z * (1.0 / (1.0 + jnp.exp(-z))))


def selective_scan(u, dt_raw, B4, C4, z, A_T, Dp):
    """u, dt_raw, z: (B, L, d_inner); B4, C4: (B, L, d_state, 1); A_T: (d_state, d_inner);
    Dp: (1, d_inner)."""
    B, L, C = u.shape
    S = A_T.shape[0]
    tc = _pick_tile(C, _CH_TILE)
    return pl.pallas_call(
        _scan_kernel,
        out_shape=jax.ShapeDtypeStruct((B, L, C), jnp.float32),
        grid=(B, C // tc),
        in_specs=[
            pl.BlockSpec((None, L, tc), lambda i, j: (i, 0, j)),        # u
            pl.BlockSpec((None, L, tc), lambda i, j: (i, 0, j)),        # dt_raw
            pl.BlockSpec((None, L, tc), lambda i, j: (i, 0, j)),        # z
            pl.BlockSpec((None, L, S, 1), lambda i, j: (i, 0, 0, 0)),   # B (per-t columns)
            pl.BlockSpec((None, L, S, 1), lambda i, j: (i, 0, 0, 0)),   # C (per-t columns)
            pl.BlockSpec((S, tc), lambda i, j: (0, j)),                 # A^T
            pl.BlockSpec((1, tc), lambda i, j: (0, j)),                 # D
        ],
        out_specs=pl.BlockSpec((None, L, tc), lambda i, j: (i, 0, j)),
        compiler_params=pltpu.CompilerParams(
            dimension_semantics=("parallel", "parallel"),
            vmem_limit_bytes=_VMEM_LIMIT),
    )(u, dt_raw, z, B4, C4, A_T, Dp)


# ----------------------------- fused LayerNorm + decoder ----------------------------
def _dec_kernel(x_ref, g_ref, b_ref, w_ref, o_ref):
    x = x_ref[...]
    mu = jnp.mean(x, axis=-1, keepdims=True)
    xc = x - mu
    var = jnp.mean(xc * xc, axis=-1, keepdims=True)
    xn = xc * jax.lax.rsqrt(var + 1e-5)
    xn = xn * g_ref[...] + b_ref[...]
    o_ref[...] = jnp.dot(xn.astype(jnp.bfloat16), w_ref[...],
                         preferred_element_type=jnp.float32)


def layernorm_decoder(x, gamma, beta, w_dec_padded):
    M, D = x.shape
    Np = w_dec_padded.shape[1]          # lane-dense padded width (DEC_PAD)
    return pl.pallas_call(
        _dec_kernel,
        out_shape=jax.ShapeDtypeStruct((M, Np), jnp.float32),
        grid=(1,),
        in_specs=[
            pl.BlockSpec((M, D), lambda i: (0, 0)),
            pl.BlockSpec((1, D), lambda i: (0, 0)),
            pl.BlockSpec((1, D), lambda i: (0, 0)),
            pl.BlockSpec((D, Np), lambda i: (0, 0)),
        ],
        out_specs=pl.BlockSpec((M, Np), lambda i: (0, 0)),
        compiler_params=pltpu.CompilerParams(vmem_limit_bytes=_VMEM_LIMIT),
    )(x, gamma, beta, w_dec_padded)


# ----------------------------- parameters ------------------------------------------
def _quant_int8(w):
    """Per-output-channel symmetric int8 quantization of a (K, N) weight."""
    amax = jnp.max(jnp.abs(w), axis=0, keepdims=True)
    scale = jnp.maximum(amax, 1e-12) / 127.0
    q = jnp.clip(jnp.round(w / scale), -127.0, 127.0).astype(jnp.int8)
    return q, scale.astype(jnp.float32)


def init_params(key):
    keys = jax.random.split(key, 2 + n_layers)
    params = {
        "emb": jax.random.normal(keys[0], (n_vocab, dim_model), jnp.float32) * 0.001,
        "gamma": jnp.ones((1, dim_model), jnp.float32),
        "beta": jnp.zeros((1, dim_model), jnp.float32),
    }
    dec_w = (jax.random.normal(keys[1], (dim_model, n_vocab), jnp.float32)
             * (dim_model ** -0.5) * 0.001)
    dec_w_pad = jnp.zeros((dim_model, DEC_PAD), jnp.float32).at[:, :n_vocab].set(dec_w)
    params["dec_w"] = dec_w_pad.astype(jnp.bfloat16)

    # S4D-real init: A[c, n] = -(n+1), stored transposed (d_state, d_inner) for the scan kernel.
    # (Only valid because A_log is never trained / loaded from a checkpoint in this script.)
    A_T = -jnp.broadcast_to(
        jnp.arange(1, d_state + 1, dtype=jnp.float32)[:, None], (d_state, d_inner))

    layers = []
    for li in range(n_layers):
        k = jax.random.split(keys[2 + li], 6)
        w_in = jax.random.normal(k[0], (dim_model, 2 * d_inner), jnp.float32) * dim_model ** -0.5
        wx_q, wx_s = _quant_int8(w_in[:, :d_inner])            # in_proj x half, int8 + scale
        wz_q, wz_s = _quant_int8(w_in[:, d_inner:])            # in_proj z half, int8 + scale
        w_xproj = (jax.random.normal(k[2], (d_inner, dt_rank + 2 * d_state), jnp.float32)
                   * d_inner ** -0.5)
        w_out = jax.random.normal(k[5], (d_inner, dim_model), jnp.float32) * d_inner ** -0.5
        wo_q, wo_s = _quant_int8(w_out)                        # out_proj, int8 + scale
        layers.append(dict(
            w_in_x_q=wx_q, w_in_x_s=wx_s,
            w_in_z_q=wz_q, w_in_z_s=wz_s,
            conv_w=jax.random.normal(k[1], (d_conv, d_inner), jnp.float32) * d_conv ** -0.5,
            conv_b=jnp.zeros((1, d_inner), jnp.float32),
            w_x_dt=w_xproj[:, :dt_rank].astype(jnp.bfloat16),
            w_x_b=w_xproj[:, dt_rank:dt_rank + d_state].astype(jnp.bfloat16),
            w_x_c=w_xproj[:, dt_rank + d_state:].astype(jnp.bfloat16),
            w_dt=(jax.random.normal(k[3], (dt_rank, d_inner), jnp.float32)
                  * dt_rank ** -0.5).astype(jnp.bfloat16),
            dt_bias=jax.random.uniform(
                k[4], (d_inner,), jnp.float32, minval=-4.0, maxval=-2.0),
            A_T=A_T,
            D=jnp.ones((1, d_inner), jnp.float32),
            w_out_q=wo_q, w_out_s=wo_s,
        ))
    params["layers"] = layers
    return params


# ----------------------------- forward ----------------------------------------------
def mamba_layer(h, p):
    B, L, _ = h.shape
    flat = h.reshape(B * L, dim_model)

    x, z = pl_in_proj(flat, p["w_in_x_q"], p["w_in_x_s"],
                      p["w_in_z_q"], p["w_in_z_s"])                 # (B*L, d_inner) x2

    xc = conv1d_silu(x.reshape(B, L, d_inner), p["conv_w"], p["conv_b"])   # (B, L, d_inner)
    xc_flat = xc.reshape(B * L, d_inner)

    dtr, Bm, Cm = pl_x_proj(xc_flat, p["w_x_dt"], p["w_x_b"], p["w_x_c"])

    dt_raw = pl_matmul_bf16(dtr, p["w_dt"], bias=p["dt_bias"])      # bias fused; softplus in scan

    # tiny XLA relayout: per-timestep state columns for the scan kernel
    B4 = Bm.reshape(B, L, d_state, 1)
    C4 = Cm.reshape(B, L, d_state, 1)

    y = selective_scan(xc, dt_raw.reshape(B, L, d_inner), B4, C4,
                       z.reshape(B, L, d_inner), p["A_T"], p["D"])  # (B, L, d_inner)

    return pl_matmul_q(y.reshape(B * L, d_inner),
                       p["w_out_q"], p["w_out_s"]).reshape(B, L, dim_model)


@jax.jit
def mamba_bit_forward(params, token_ids):
    B, L = token_ids.shape
    h = jnp.take(params["emb"], token_ids, axis=0)                  # embedding gather (XLA glue)
    for p in params["layers"]:
        h = mamba_layer(h, p)
    logits_pad = layernorm_decoder(
        h.reshape(B * L, dim_model), params["gamma"], params["beta"], params["dec_w"]
    )                                                               # (B*L, DEC_PAD)
    return logits_pad[:, :n_vocab].reshape(B, L, n_vocab)


# ----------------------------- main --------------------------------------------------
if __name__ == "__main__":
    key = jax.random.PRNGKey(0)
    pkey, dkey = jax.random.split(key)
    params = init_params(pkey)
    token_ids = jax.random.randint(dkey, (BATCH, SEQ), 0, n_vocab, dtype=jnp.int32)

    out = mamba_bit_forward(params, token_ids)
    out = jax.block_until_ready(out)

    assert out.shape == (BATCH, SEQ, n_vocab), out.shape
    assert bool(jnp.all(jnp.isfinite(out)))
    print("KERNEL_OK")
</pallas_src>

<mosaic_0001>
module attributes {stable_mosaic.version = 11 : i64} {
  func.func @_conv_silu_kernel(%arg0: i32, %arg1: i32, %arg2: memref<1x8x512xf32, #tpu.memory_space<vmem>>, %arg3: memref<4x512xf32, #tpu.memory_space<vmem>>, %arg4: memref<1x512xf32, #tpu.memory_space<vmem>>, %arg5: memref<1x8x512xf32, #tpu.memory_space<vmem>>, %arg6: memref<11x512xf32, #tpu.memory_space<vmem>>) attributes {dimension_semantics = [#tpu.dimension_semantics<parallel>, #tpu.dimension_semantics<parallel>], iteration_bounds = array<i64: 2, 1>, scalar_prefetch = 0 : i64, scratch_operands = 1 : i64, tpu.core_type = #tpu.core_type<tc>, window_params = [{transform_indices = @transform_0, window_bounds = array<i64: 1, 8, 512>}, {transform_indices = @transform_1, window_bounds = array<i64: 4, 512>}, {transform_indices = @transform_2, window_bounds = array<i64: 1, 512>}, {transform_indices = @transform_3, window_bounds = array<i64: 1, 8, 512>}]} {
    %cst = arith.constant 0.000000e+00 : f32
    %0 = vector.broadcast %cst : f32 to vector<3x512xf32>
    %c0 = arith.constant 0 : index
    %c0_0 = arith.constant 0 : index
    %1 = vector.load %arg6[%c0, %c0_0] : memref<11x512xf32, #tpu.memory_space<vmem>>, vector<3x512xf32>
    tpu.vector_store %arg6[%c0, %c0_0], %0 {strides = array<i32>} : memref<11x512xf32, #tpu.memory_space<vmem>>, vector<3x512xf32>,
    %c0_1 = arith.constant 0 : index
    %c0_2 = arith.constant 0 : index
    %c0_3 = arith.constant 0 : index
    %2 = vector.load %arg2[%c0_1, %c0_2, %c0_3] : memref<1x8x512xf32, #tpu.memory_space<vmem>>, vector<1x8x512xf32>
    %3 = vector.shape_cast %2 : vector<1x8x512xf32> to vector<8x512xf32>
    %c3 = arith.constant 3 : index
    %c0_4 = arith.constant 0 : index
    %4 = vector.load %arg6[%c3, %c0_4] : memref<11x512xf32, #tpu.memory_space<vmem>>, vector<8x512xf32>
    tpu.vector_store %arg6[%c3, %c0_4], %3 {strides = array<i32>} : memref<11x512xf32, #tpu.memory_space<vmem>>, vector<8x512xf32>,
    %c0_5 = arith.constant 0 : index
    %c0_6 = arith.constant 0 : index
    %5 = vector.load %arg4[%c0_5, %c0_6] : memref<1x512xf32, #tpu.memory_space<vmem>>, vector<1x512xf32>
    %c0_7 = arith.constant 0 : index
    %c0_8 = arith.constant 0 : index
    %6 = vector.load %arg6[%c0_7, %c0_8] : memref<11x512xf32, #tpu.memory_space<vmem>>, vector<8x512xf32>
    %c0_9 = arith.constant 0 : index
    %c0_10 = arith.constant 0 : index
    %7 = vector.load %arg3[%c0_9, %c0_10] : memref<4x512xf32, #tpu.memory_space<vmem>>, vector<1x512xf32>
    %8 = vector.broadcast %7 : vector<1x512xf32> to vector<8x512xf32>
    %9 = arith.mulf %6, %8 : vector<8x512xf32>
    %10 = vector.broadcast %5 : vector<1x512xf32> to vector<8x512xf32>
    %11 = arith.addf %10, %9 : vector<8x512xf32>
    %c1 = arith.constant 1 : index
    %c0_11 = arith.constant 0 : index
    %12 = vector.load %arg6[%c1, %c0_11] : memref<11x512xf32, #tpu.memory_space<vmem>>, vector<8x512xf32>
    %c1_12 = arith.constant 1 : index
    %c0_13 = arith.constant 0 : index
    %13 = vector.load %arg3[%c1_12, %c0_13] : memref<4x512xf32, #tpu.memory_space<vmem>>, vector<1x512xf32>
    %14 = vector.broadcast %13 : vector<1x512xf32> to vector<8x512xf32>
    %15 = arith.mulf %12, %14 : vector<8x512xf32>
    %16 = arith.addf %11, %15 : vector<8x512xf32>
    %c2 = arith.constant 2 : index
    %c0_14 = arith.constant 0 : index
    %17 = vector.load %arg6[%c2, %c0_14] : memref<11x512xf32, #tpu.memory_space<vmem>>, vector<8x512xf32>
    %c2_15 = arith.constant 2 : index
    %c0_16 = arith.constant 0 : index
    %18 = vector.load %arg3[%c2_15, %c0_16] : memref<4x512xf32, #tpu.memory_space<vmem>>, vector<1x512xf32>
    %19 = vector.broadcast %18 : vector<1x512xf32> to vector<8x512xf32>
    %20 = arith.mulf %17, %19 : vector<8x512xf32>
    %21 = arith.addf %16, %20 : vector<8x512xf32>
    %c3_17 = arith.constant 3 : index
    %c0_18 = arith.constant 0 : index
    %22 = vector.load %arg6[%c3_17, %c0_18] : memref<11x512xf32, #tpu.memory_space<vmem>>, vector<8x512xf32>
    %c3_19 = arith.constant 3 : index
    %c0_20 = arith.constant 0 : index
    %23 = vector.load %arg3[%c3_19, %c0_20] : memref<4x512xf32, #tpu.memory_space<vmem>>, vector<1x512xf32>
    %24 = vector.broadcast %23 : vector<1x512xf32> to vector<8x512xf32>
    %25 = arith.mulf %22, %24 : vector<8x512xf32>
    %26 = arith.addf %21, %25 : vector<8x512xf32>
    %cst_21 = arith.constant 0.000000e+00 : f32
    %27 = vector.broadcast %cst_21 : f32 to vector<8x512xf32>
    %28 = arith.subf %27, %26 : vector<8x512xf32>
    %29 = math.exp %28 : vector<8x512xf32>
    %cst_22 = arith.constant 1.000000e+00 : f32
    %30 = vector.broadcast %cst_22 : f32 to vector<8x512xf32>
    %31 = arith.addf %30, %29 : vector<8x512xf32>
    %cst_23 = arith.constant 1.000000e+00 : f32
    %32 = vector.broadcast %cst_23 : f32 to vector<8x512xf32>
    %33 = arith.divf %32, %31 : vector<8x512xf32>
    %34 = arith.mulf %26, %33 : vector<8x512xf32>
    %c0_24 = arith.constant 0 : index
    %c0_25 = arith.constant 0 : index
    %c0_26 = arith.constant 0 : index
    %35 = vector.load %arg5[%c0_24, %c0_25, %c0_26] : memref<1x8x512xf32, #tpu.memory_space<vmem>>, vector<1x8x512xf32>
    %36 = vector.shape_cast %35 : vector<1x8x512xf32> to vector<8x512xf32>
    %37 = vector.shape_cast %34 : vector<8x512xf32> to vector<1x8x512xf32>
    tpu.vector_store %arg5[%c0_24, %c0_25, %c0_26], %37 {strides = array<i32>} : memref<1x8x512xf32, #tpu.memory_space<vmem>>, vector<1x8x512xf32>,
    return
  }
  func.func @transform_0(%arg0: i32, %arg1: i32) -> (i32, i32, i32) {
    %c0_i32 = arith.constant 0 : i32
    %c0_i32_0 = arith.constant 0 : i32
    return %arg0, %c0_i32, %arg1 : i32, i32, i32
  }
  func.func @transform_1(%arg0: i32, %arg1: i32) -> (i32, i32) {
    %c0_i32 = arith.constant 0 : i32
    %c0_i32_0 = arith.constant 0 : i32
    return %c0_i32, %arg1 : i32, i32
  }
  func.func @transform_2(%arg0: i32, %arg1: i32) -> (i32, i32) {
    %c0_i32 = arith.constant 0 : i32
    %c0_i32_0 = arith.constant 0 : i32
    return %c0_i32, %arg1 : i32, i32
  }
  func.func @transform_3(%arg0: i32, %arg1: i32) -> (i32, i32, i32) {
    %c0_i32 = arith.constant 0 : i32
    %c0_i32_0 = arith.constant 0 : i32
    return %arg0, %c0_i32, %arg1 : i32, i32, i32
  }
}

module attributes {stable_mosaic.version = 11 : i64} {
  func.func @_in_proj_kernel(%arg0: i32, %arg1: memref<16x256xf32, #tpu.memory_space<vmem>>, %arg2: memref<256x512xi8, #tpu.memory_space<vmem>>, %arg3: memref<1x512xf32, #tpu.memory_space<vmem>>, %arg4: memref<256x512xi8, #tpu.memory_space<vmem>>, %arg5: memref<1x512xf32, #tpu.memory_space<vmem>>, %arg6: memref<16x512xf32, #tpu.memory_space<vmem>>, %arg7: memref<16x512xf32, #tpu.memory_space<vmem>>) attributes {dimension_semantics = [#tpu.dimension_semantics<parallel>], iteration_bounds = array<i64: 1>, scalar_prefetch = 0 : i64, scratch_operands = 0 : i64, tpu.core_type = #tpu.core_type<tc>, window_params = [{pipeline_mode = #tpu.pipeline_mode<synchronous>, transform_indices = @transform_0, window_bounds = array<i64: 16, 256>}, {transform_indices = @transform_1, window_bounds = array<i64: 256, 512>}, {transform_indices = @transform_2, window_bounds = array<i64: 1, 512>}, {transform_indices = @transform_3, window_bounds = array<i64: 256, 512>}, {transform_indices = @transform_4, window_bounds = array<i64: 1, 512>}, {transform_indices = @transform_5, window_bounds = array<i64: 16, 512>}, {transform_indices = @transform_6, window_bounds = array<i64: 16, 512>}]} {
    %c0 = arith.constant 0 : index
    %c0_0 = arith.constant 0 : index
    %0 = vector.load %arg1[%c0, %c0_0] : memref<16x256xf32, #tpu.memory_space<vmem>>, vector<16x256xf32>
    %1 = arith.truncf %0 : vector<16x256xf32> to vector<16x256xbf16>
    %c0_1 = arith.constant 0 : index
    %c0_2 = arith.constant 0 : index
    %2 = vector.load %arg2[%c0_1, %c0_2] : memref<256x512xi8, #tpu.memory_space<vmem>>, vector<256x512xi8>
    %3 = arith.sitofp %2 : vector<256x512xi8> to vector<256x512xf32>
    %4 = arith.truncf %3 : vector<256x512xf32> to vector<256x512xbf16>
    %c0_3 = arith.constant 0 : index
    %c0_4 = arith.constant 0 : index
    %5 = vector.load %arg4[%c0_3, %c0_4] : memref<256x512xi8, #tpu.memory_space<vmem>>, vector<256x512xi8>
    %6 = arith.sitofp %5 : vector<256x512xi8> to vector<256x512xf32>
    %7 = arith.truncf %6 : vector<256x512xf32> to vector<256x512xbf16>
    %cst = arith.constant dense<0.000000e+00> : vector<16x512xf32>
    %8 = tpu.matmul %1, %4, %cst {dimension_numbers = #tpu.dot_dimension_numbers<[1], [0], [0], [1], [0, 0, 1, 1], [], []>} : vector<16x256xbf16>, vector<256x512xbf16>, vector<16x512xf32> -> vector<16x512xf32>
    %c0_5 = arith.constant 0 : index
    %c0_6 = arith.constant 0 : index
    %9 = vector.load %arg3[%c0_5, %c0_6] : memref<1x512xf32, #tpu.memory_space<vmem>>, vector<1x512xf32>
    %10 = vector.broadcast %9 : vector<1x512xf32> to vector<16x512xf32>
    %11 = arith.mulf %8, %10 : vector<16x512xf32>
    %c0_7 = arith.constant 0 : index
    %c0_8 = arith.constant 0 : index
    %12 = vector.load %arg6[%c0_7, %c0_8] : memref<16x512xf32, #tpu.memory_space<vmem>>, vector<16x512xf32>
    tpu.vector_store %arg6[%c0_7, %c0_8], %11 {strides = array<i32>} : memref<16x512xf32, #tpu.memory_space<vmem>>, vector<16x512xf32>,
    %cst_9 = arith.constant dense<0.000000e+00> : vector<16x512xf32>
    %13 = tpu.matmul %1, %7, %cst_9 {dimension_numbers = #tpu.dot_dimension_numbers<[1], [0], [0], [1], [0, 0, 1, 1], [], []>} : vector<16x256xbf16>, vector<256x512xbf16>, vector<16x512xf32> -> vector<16x512xf32>
    %c0_10 = arith.constant 0 : index
    %c0_11 = arith.constant 0 : index
    %14 = vector.load %arg5[%c0_10, %c0_11] : memref<1x512xf32, #tpu.memory_space<vmem>>, vector<1x512xf32>
    %15 = vector.broadcast %14 : vector<1x512xf32> to vector<16x512xf32>
    %16 = arith.mulf %13, %15 : vector<16x512xf32>
    %c0_12 = arith.constant 0 : index
    %c0_13 = arith.constant 0 : index
    %17 = vector.load %arg7[%c0_12, %c0_13] : memref<16x512xf32, #tpu.memory_space<vmem>>, vector<16x512xf32>
    tpu.vector_store %arg7[%c0_12, %c0_13], %16 {strides = array<i32>} : memref<16x512xf32, #tpu.memory_space<vmem>>, vector<16x512xf32>,
    return
  }
  func.func @transform_0(%arg0: i32) -> (i32, i32) {
    %c0_i32 = arith.constant 0 : i32
    %c0_i32_0 = arith.constant 0 : i32
    %c0_i32_1 = arith.constant 0 : i32
    return %c0_i32, %c0_i32_0 : i32, i32
  }
  func.func @transform_1(%arg0: i32) -> (i32, i32) {
    %c0_i32 = arith.constant 0 : i32
    %c0_i32_0 = arith.constant 0 : i32
    return %c0_i32, %arg0 : i32, i32
  }
  func.func @transform_2(%arg0: i32) -> (i32, i32) {
    %c0_i32 = arith.constant 0 : i32
    %c0_i32_0 = arith.constant 0 : i32
    return %c0_i32, %arg0 : i32, i32
  }
  func.func @transform_3(%arg0: i32) -> (i32, i32) {
    %c0_i32 = arith.constant 0 : i32
    %c0_i32_0 = arith.constant 0 : i32
    return %c0_i32, %arg0 : i32, i32
  }
  func.func @transform_4(%arg0: i32) -> (i32, i32) {
    %c0_i32 = arith.constant 0 : i32
    %c0_i32_0 = arith.constant 0 : i32
    return %c0_i32, %arg0 : i32, i32
  }
  func.func @transform_5(%arg0: i32) -> (i32, i32) {
    %c0_i32 = arith.constant 0 : i32
    %c0_i32_0 = arith.constant 0 : i32
    return %c0_i32, %arg0 : i32, i32
  }
  func.func @transform_6(%arg0: i32) -> (i32, i32) {
    %c0_i32 = arith.constant 0 : i32
    %c0_i32_0 = arith.constant 0 : i32
    return %c0_i32, %arg0 : i32, i32
  }
}

module attributes {stable_mosaic.version = 11 : i64} {
  func.func @_x_proj_kernel(%arg0: i32, %arg1: memref<16x512xf32, #tpu.memory_space<vmem>>, %arg2: memref<512x16xbf16, #tpu.memory_space<vmem>>, %arg3: memref<512x16xbf16, #tpu.memory_space<vmem>>, %arg4: memref<512x16xbf16, #tpu.memory_space<vmem>>, %arg5: memref<16x16xf32, #tpu.memory_space<vmem>>, %arg6: memref<16x16xf32, #tpu.memory_space<vmem>>, %arg7: memref<16x16xf32, #tpu.memory_space<vmem>>) attributes {dimension_semantics = [#tpu.dimension_semantics<arbitrary>], iteration_bounds = array<i64: 1>, scalar_prefetch = 0 : i64, scratch_operands = 0 : i64, tpu.core_type = #tpu.core_type<tc>, window_params = [{pipeline_mode = #tpu.pipeline_mode<synchronous>, transform_indices = @transform_0, window_bounds = array<i64: 16, 512>}, {pipeline_mode = #tpu.pipeline_mode<synchronous>, transform_indices = @transform_1, window_bounds = array<i64: 512, 16>}, {pipeline_mode = #tpu.pipeline_mode<synchronous>, transform_indices = @transform_2, window_bounds = array<i64: 512, 16>}, {pipeline_mode = #tpu.pipeline_mode<synchronous>, transform_indices = @transform_3, window_bounds = array<i64: 512, 16>}, {pipeline_mode = #tpu.pipeline_mode<synchronous>, transform_indices = @transform_4, window_bounds = array<i64: 16, 16>}, {pipeline_mode = #tpu.pipeline_mode<synchronous>, transform_indices = @transform_5, window_bounds = array<i64: 16, 16>}, {pipeline_mode = #tpu.pipeline_mode<synchronous>, transform_indices = @transform_6, window_bounds = array<i64: 16, 16>}]} {
    %c0 = arith.constant 0 : index
    %c0_0 = arith.constant 0 : index
    %0 = vector.load %arg1[%c0, %c0_0] : memref<16x512xf32, #tpu.memory_space<vmem>>, vector<16x512xf32>
    %1 = arith.truncf %0 : vector<16x512xf32> to vector<16x512xbf16>
    %c0_1 = arith.constant 0 : index
    %c0_2 = arith.constant 0 : index
    %2 = vector.load %arg2[%c0_1, %c0_2] : memref<512x16xbf16, #tpu.memory_space<vmem>>, vector<512x16xbf16>
    %cst = arith.constant dense<0.000000e+00> : vector<16x16xf32>
    %3 = tpu.matmul %1, %2, %cst {dimension_numbers = #tpu.dot_dimension_numbers<[1], [0], [0], [1], [0, 0, 1, 1], [], []>} : vector<16x512xbf16>, vector<512x16xbf16>, vector<16x16xf32> -> vector<16x16xf32>
    %c0_3 = arith.constant 0 : index
    %c0_4 = arith.constant 0 : index
    %4 = vector.load %arg5[%c0_3, %c0_4] : memref<16x16xf32, #tpu.memory_space<vmem>>, vector<16x16xf32>
    tpu.vector_store %arg5[%c0_3, %c0_4], %3 {strides = array<i32>} : memref<16x16xf32, #tpu.memory_space<vmem>>, vector<16x16xf32>,
    %c0_5 = arith.constant 0 : index
    %c0_6 = arith.constant 0 : index
    %5 = vector.load %arg3[%c0_5, %c0_6] : memref<512x16xbf16, #tpu.memory_space<vmem>>, vector<512x16xbf16>
    %cst_7 = arith.constant dense<0.000000e+00> : vector<16x16xf32>
    %6 = tpu.matmul %1, %5, %cst_7 {dimension_numbers = #tpu.dot_dimension_numbers<[1], [0], [0], [1], [0, 0, 1, 1], [], []>} : vector<16x512xbf16>, vector<512x16xbf16>, vector<16x16xf32> -> vector<16x16xf32>
    %c0_8 = arith.constant 0 : index
    %c0_9 = arith.constant 0 : index
    %7 = vector.load %arg6[%c0_8, %c0_9] : memref<16x16xf32, #tpu.memory_space<vmem>>, vector<16x16xf32>
    tpu.vector_store %arg6[%c0_8, %c0_9], %6 {strides = array<i32>} : memref<16x16xf32, #tpu.memory_space<vmem>>, vector<16x16xf32>,
    %c0_10 = arith.constant 0 : index
    %c0_11 = arith.constant 0 : index
    %8 = vector.load %arg4[%c0_10, %c0_11] : memref<512x16xbf16, #tpu.memory_space<vmem>>, vector<512x16xbf16>
    %cst_12 = arith.constant dense<0.000000e+00> : vector<16x16xf32>
    %9 = tpu.matmul %1, %8, %cst_12 {dimension_numbers = #tpu.dot_dimension_numbers<[1], [0], [0], [1], [0, 0, 1, 1], [], []>} : vector<16x512xbf16>, vector<512x16xbf16>, vector<16x16xf32> -> vector<16x16xf32>
    %c0_13 = arith.constant 0 : index
    %c0_14 = arith.constant 0 : index
    %10 = vector.load %arg7[%c0_13, %c0_14] : memref<16x16xf32, #tpu.memory_space<vmem>>, vector<16x16xf32>
    tpu.vector_store %arg7[%c0_13, %c0_14], %9 {strides = array<i32>} : memref<16x16xf32, #tpu.memory_space<vmem>>, vector<16x16xf32>,
    return
  }
  func.func @transform_0(%arg0: i32) -> (i32, i32) {
    %c0_i32 = arith.constant 0 : i32
    %c0_i32_0 = arith.constant 0 : i32
    %c0_i32_1 = arith.constant 0 : i32
    return %c0_i32, %c0_i32_0 : i32, i32
  }
  func.func @transform_1(%arg0: i32) -> (i32, i32) {
    %c0_i32 = arith.constant 0 : i32
    %c0_i32_0 = arith.constant 0 : i32
    %c0_i32_1 = arith.constant 0 : i32
    return %c0_i32, %c0_i32_0 : i32, i32
  }
  func.func @transform_2(%arg0: i32) -> (i32, i32) {
    %c0_i32 = arith.constant 0 : i32
    %c0_i32_0 = arith.constant 0 : i32
    %c0_i32_1 = arith.constant 0 : i32
    return %c0_i32, %c0_i32_0 : i32, i32
  }
  func.func @transform_3(%arg0: i32) -> (i32, i32) {
    %c0_i32 = arith.constant 0 : i32
    %c0_i32_0 = arith.constant 0 : i32
    %c0_i32_1 = arith.constant 0 : i32
    return %c0_i32, %c0_i32_0 : i32, i32
  }
  func.func @transform_4(%arg0: i32) -> (i32, i32) {
    %c0_i32 = arith.constant 0 : i32
    %c0_i32_0 = arith.constant 0 : i32
    %c0_i32_1 = arith.constant 0 : i32
    return %c0_i32, %c0_i32_0 : i32, i32
  }
  func.func @transform_5(%arg0: i32) -> (i32, i32) {
    %c0_i32 = arith.constant 0 : i32
    %c0_i32_0 = arith.constant 0 : i32
    %c0_i32_1 = arith.constant 0 : i32
    return %c0_i32, %c0_i32_0 : i32, i32
  }
  func.func @transform_6(%arg0: i32) -> (i32, i32) {
    %c0_i32 = arith.constant 0 : i32
    %c0_i32_0 = arith.constant 0 : i32
    %c0_i32_1 = arith.constant 0 : i32
    return %c0_i32, %c0_i32_0 : i32, i32
  }
}

module attributes {stable_mosaic.version = 11 : i64} {
  func.func @_mm_bf16_kernel(%arg0: i32, %arg1: memref<16x16xf32, #tpu.memory_space<vmem>>, %arg2: memref<16x512xbf16, #tpu.memory_space<vmem>>, %arg3: memref<1x512xf32, #tpu.memory_space<vmem>>, %arg4: memref<16x512xf32, #tpu.memory_space<vmem>>) attributes {dimension_semantics = [#tpu.dimension_semantics<parallel>], iteration_bounds = array<i64: 1>, scalar_prefetch = 0 : i64, scratch_operands = 0 : i64, tpu.core_type = #tpu.core_type<tc>, window_params = [{pipeline_mode = #tpu.pipeline_mode<synchronous>, transform_indices = @transform_0, window_bounds = array<i64: 16, 16>}, {transform_indices = @transform_1, window_bounds = array<i64: 16, 512>}, {transform_indices = @transform_2, window_bounds = array<i64: 1, 512>}, {transform_indices = @transform_3, window_bounds = array<i64: 16, 512>}]} {
    %c0 = arith.constant 0 : index
    %c0_0 = arith.constant 0 : index
    %0 = vector.load %arg1[%c0, %c0_0] : memref<16x16xf32, #tpu.memory_space<vmem>>, vector<16x16xf32>
    %1 = arith.truncf %0 : vector<16x16xf32> to vector<16x16xbf16>
    %c0_1 = arith.constant 0 : index
    %c0_2 = arith.constant 0 : index
    %2 = vector.load %arg2[%c0_1, %c0_2] : memref<16x512xbf16, #tpu.memory_space<vmem>>, vector<16x512xbf16>
    %cst = arith.constant dense<0.000000e+00> : vector<16x512xf32>
    %3 = tpu.matmul %1, %2, %cst {dimension_numbers = #tpu.dot_dimension_numbers<[1], [0], [0], [1], [0, 0, 1, 1], [], []>} : vector<16x16xbf16>, vector<16x512xbf16>, vector<16x512xf32> -> vector<16x512xf32>
    %c0_3 = arith.constant 0 : index
    %c0_4 = arith.constant 0 : index
    %4 = vector.load %arg3[%c0_3, %c0_4] : memref<1x512xf32, #tpu.memory_space<vmem>>, vector<1x512xf32>
    %5 = vector.broadcast %4 : vector<1x512xf32> to vector<16x512xf32>
    %6 = arith.addf %3, %5 : vector<16x512xf32>
    %c0_5 = arith.constant 0 : index
    %c0_6 = arith.constant 0 : index
    %7 = vector.load %arg4[%c0_5, %c0_6] : memref<16x512xf32, #tpu.memory_space<vmem>>, vector<16x512xf32>
    tpu.vector_store %arg4[%c0_5, %c0_6], %6 {strides = array<i32>} : memref<16x512xf32, #tpu.memory_space<vmem>>, vector<16x512xf32>,
    return
  }
  func.func @transform_0(%arg0: i32) -> (i32, i32) {
    %c0_i32 = arith.constant 0 : i32
    %c0_i32_0 = arith.constant 0 : i32
    %c0_i32_1 = arith.constant 0 : i32
    return %c0_i32, %c0_i32_0 : i32, i32
  }
  func.func @transform_1(%arg0: i32) -> (i32, i32) {
    %c0_i32 = arith.constant 0 : i32
    %c0_i32_0 = arith.constant 0 : i32
    return %c0_i32, %arg0 : i32, i32
  }
  func.func @transform_2(%arg0: i32) -> (i32, i32) {
    %c0_i32 = arith.constant 0 : i32
    %c0_i32_0 = arith.constant 0 : i32
    return %c0_i32, %arg0 : i32, i32
  }
  func.func @transform_3(%arg0: i32) -> (i32, i32) {
    %c0_i32 = arith.constant 0 : i32
    %c0_i32_0 = arith.constant 0 : i32
    return %c0_i32, %arg0 : i32, i32
  }
}

module attributes {stable_mosaic.version = 11 : i64} {
  func.func @_mm_q_kernel(%arg0: i32, %arg1: memref<16x512xf32, #tpu.memory_space<vmem>>, %arg2: memref<512x256xi8, #tpu.memory_space<vmem>>, %arg3: memref<1x256xf32, #tpu.memory_space<vmem>>, %arg4: memref<1x256xf32, #tpu.memory_space<vmem>>, %arg5: memref<16x256xf32, #tpu.memory_space<vmem>>) attributes {dimension_semantics = [#tpu.dimension_semantics<parallel>], iteration_bounds = array<i64: 1>, scalar_prefetch = 0 : i64, scratch_operands = 0 : i64, tpu.core_type = #tpu.core_type<tc>, window_params = [{pipeline_mode = #tpu.pipeline_mode<synchronous>, transform_indices = @transform_0, window_bounds = array<i64: 16, 512>}, {transform_indices = @transform_1, window_bounds = array<i64: 512, 256>}, {transform_indices = @transform_2, window_bounds = array<i64: 1, 256>}, {transform_indices = @transform_3, window_bounds = array<i64: 1, 256>}, {transform_indices = @transform_4, window_bounds = array<i64: 16, 256>}]} {
    %c0 = arith.constant 0 : index
    %c0_0 = arith.constant 0 : index
    %0 = vector.load %arg1[%c0, %c0_0] : memref<16x512xf32, #tpu.memory_space<vmem>>, vector<16x512xf32>
    %1 = arith.truncf %0 : vector<16x512xf32> to vector<16x512xbf16>
    %c0_1 = arith.constant 0 : index
    %c0_2 = arith.constant 0 : index
    %2 = vector.load %arg2[%c0_1, %c0_2] : memref<512x256xi8, #tpu.memory_space<vmem>>, vector<512x256xi8>
    %3 = arith.sitofp %2 : vector<512x256xi8> to vector<512x256xf32>
    %4 = arith.truncf %3 : vector<512x256xf32> to vector<512x256xbf16>
    %cst = arith.constant dense<0.000000e+00> : vector<16x256xf32>
    %5 = tpu.matmul %1, %4, %cst {dimension_numbers = #tpu.dot_dimension_numbers<[1], [0], [0], [1], [0, 0, 1, 1], [], []>} : vector<16x512xbf16>, vector<512x256xbf16>, vector<16x256xf32> -> vector<16x256xf32>
    %c0_3 = arith.constant 0 : index
    %c0_4 = arith.constant 0 : index
    %6 = vector.load %arg3[%c0_3, %c0_4] : memref<1x256xf32, #tpu.memory_space<vmem>>, vector<1x256xf32>
    %7 = vector.broadcast %6 : vector<1x256xf32> to vector<16x256xf32>
    %8 = arith.mulf %5, %7 : vector<16x256xf32>
    %c0_5 = arith.constant 0 : index
    %c0_6 = arith.constant 0 : index
    %9 = vector.load %arg4[%c0_5, %c0_6] : memref<1x256xf32, #tpu.memory_space<vmem>>, vector<1x256xf32>
    %10 = vector.broadcast %9 : vector<1x256xf32> to vector<16x256xf32>
    %11 = arith.addf %8, %10 : vector<16x256xf32>
    %c0_7 = arith.constant 0 : index
    %c0_8 = arith.constant 0 : index
    %12 = vector.load %arg5[%c0_7, %c0_8] : memref<16x256xf32, #tpu.memory_space<vmem>>, vector<16x256xf32>
    tpu.vector_store %arg5[%c0_7, %c0_8], %11 {strides = array<i32>} : memref<16x256xf32, #tpu.memory_space<vmem>>, vector<16x256xf32>,
    return
  }
  func.func @transform_0(%arg0: i32) -> (i32, i32) {
    %c0_i32 = arith.constant 0 : i32
    %c0_i32_0 = arith.constant 0 : i32
    %c0_i32_1 = arith.constant 0 : i32
    return %c0_i32, %c0_i32_0 : i32, i32
  }
  func.func @transform_1(%arg0: i32) -> (i32, i32) {
    %c0_i32 = arith.constant 0 : i32
    %c0_i32_0 = arith.constant 0 : i32
    return %c0_i32, %arg0 : i32, i32
  }
  func.func @transform_2(%arg0: i32) -> (i32, i32) {
    %c0_i32 = arith.constant 0 : i32
    %c0_i32_0 = arith.constant 0 : i32
    return %c0_i32, %arg0 : i32, i32
  }
  func.func @transform_3(%arg0: i32) -> (i32, i32) {
    %c0_i32 = arith.constant 0 : i32
    %c0_i32_0 = arith.constant 0 : i32
    return %c0_i32, %arg0 : i32, i32
  }
  func.func @transform_4(%arg0: i32) -> (i32, i32) {
    %c0_i32 = arith.constant 0 : i32
    %c0_i32_0 = arith.constant 0 : i32
    return %c0_i32, %arg0 : i32, i32
  }
}

module attributes {stable_mosaic.version = 11 : i64} {
  func.func @_scan_kernel(%arg0: i32, %arg1: i32, %arg2: memref<1x8x512xf32, #tpu.memory_space<vmem>>, %arg3: memref<1x8x512xf32, #tpu.memory_space<vmem>>, %arg4: memref<1x8x512xf32, #tpu.memory_space<vmem>>, %arg5: memref<1x8x16x1xf32, #tpu.memory_space<vmem>>, %arg6: memref<1x8x16x1xf32, #tpu.memory_space<vmem>>, %arg7: memref<16x512xf32, #tpu.memory_space<vmem>>, %arg8: memref<1x512xf32, #tpu.memory_space<vmem>>, %arg9: memref<1x8x512xf32, #tpu.memory_space<vmem>>) attributes {dimension_semantics = [#tpu.dimension_semantics<parallel>, #tpu.dimension_semantics<parallel>], iteration_bounds = array<i64: 2, 1>, scalar_prefetch = 0 : i64, scratch_operands = 0 : i64, tpu.core_type = #tpu.core_type<tc>, window_params = [{transform_indices = @transform_0, window_bounds = array<i64: 1, 8, 512>}, {transform_indices = @transform_1, window_bounds = array<i64: 1, 8, 512>}, {transform_indices = @transform_2, window_bounds = array<i64: 1, 8, 512>}, {transform_indices = @transform_3, window_bounds = array<i64: 1, 8, 16, 1>}, {transform_indices = @transform_4, window_bounds = array<i64: 1, 8, 16, 1>}, {transform_indices = @transform_5, window_bounds = array<i64: 16, 512>}, {transform_indices = @transform_6, window_bounds = array<i64: 1, 512>}, {transform_indices = @transform_7, window_bounds = array<i64: 1, 8, 512>}]} {
    %c0 = arith.constant 0 : index
    %c0_0 = arith.constant 0 : index
    %c0_1 = arith.constant 0 : index
    %0 = vector.load %arg2[%c0, %c0_0, %c0_1] : memref<1x8x512xf32, #tpu.memory_space<vmem>>, vector<1x8x512xf32>
    %1 = vector.shape_cast %0 : vector<1x8x512xf32> to vector<8x512xf32>
    %c0_2 = arith.constant 0 : index
    %c0_3 = arith.constant 0 : index
    %c0_4 = arith.constant 0 : index
    %2 = vector.load %arg3[%c0_2, %c0_3, %c0_4] : memref<1x8x512xf32, #tpu.memory_space<vmem>>, vector<1x8x512xf32>
    %3 = vector.shape_cast %2 : vector<1x8x512xf32> to vector<8x512xf32>
    %cst = arith.constant 0.000000e+00 : f32
    %4 = vector.broadcast %cst : f32 to vector<8x512xf32>
    %5 = arith.maximumf %3, %4 : vector<8x512xf32>
    %6 = math.absf %3 : vector<8x512xf32>
    %cst_5 = arith.constant 0.000000e+00 : f32
    %7 = vector.broadcast %cst_5 : f32 to vector<8x512xf32>
    %8 = arith.subf %7, %6 : vector<8x512xf32>
    %9 = math.exp %8 : vector<8x512xf32>
    %cst_6 = arith.constant 1.000000e+00 : f32
    %10 = vector.broadcast %cst_6 : f32 to vector<8x512xf32>
    %11 = arith.addf %10, %9 : vector<8x512xf32>
    %12 = math.log %11 : vector<8x512xf32>
    %13 = arith.addf %5, %12 : vector<8x512xf32>
    %14 = arith.mulf %13, %1 : vector<8x512xf32>
    %c0_7 = arith.constant 0 : index
    %c0_8 = arith.constant 0 : index
    %15 = vector.load %arg7[%c0_7, %c0_8] : memref<16x512xf32, #tpu.memory_space<vmem>>, vector<16x512xf32>
    %cst_9 = arith.constant 0.000000e+00 : f32
    %16 = vector.broadcast %cst_9 : f32 to vector<16x512xf32>
    %17 = vector.extract_strided_slice %13 {offsets = [0, 0], sizes = [1, 512], strides = [1, 1]} : vector<8x512xf32> to vector<1x512xf32>
    %18 = vector.broadcast %17 : vector<1x512xf32> to vector<16x512xf32>
    %19 = arith.mulf %15, %18 : vector<16x512xf32>
    %20 = math.exp %19 : vector<16x512xf32>
    %21 = arith.mulf %20, %16 : vector<16x512xf32>
    %c0_10 = arith.constant 0 : index
    %c0_11 = arith.constant 0 : index
    %c0_12 = arith.constant 0 : index
    %c0_13 = arith.constant 0 : index
    %22 = vector.load %arg5[%c0_10, %c0_11, %c0_12, %c0_13] : memref<1x8x16x1xf32, #tpu.memory_space<vmem>>, vector<1x1x16x1xf32>
    %23 = vector.shape_cast %22 : vector<1x1x16x1xf32> to vector<16x1xf32>
    %24 = vector.extract_strided_slice %14 {offsets = [0, 0], sizes = [1, 512], strides = [1, 1]} : vector<8x512xf32> to vector<1x512xf32>
    %25 = vector.broadcast %23 : vector<16x1xf32> to vector<16x512xf32>
    %26 = vector.broadcast %24 : vector<1x512xf32> to vector<16x512xf32>
    %27 = arith.mulf %25, %26 : vector<16x512xf32>
    %28 = arith.addf %21, %27 : vector<16x512xf32>
    %c0_14 = arith.constant 0 : index
    %c0_15 = arith.constant 0 : index
    %c0_16 = arith.constant 0 : index
    %c0_17 = arith.constant 0 : index
    %29 = vector.load %arg6[%c0_14, %c0_15, %c0_16, %c0_17] : memref<1x8x16x1xf32, #tpu.memory_space<vmem>>, vector<1x1x16x1xf32>
    %30 = vector.shape_cast %29 : vector<1x1x16x1xf32> to vector<16x1xf32>
    %31 = vector.broadcast %30 : vector<16x1xf32> to vector<16x512xf32>
    %32 = arith.mulf %31, %28 : vector<16x512xf32>
    %cst_18 = arith.constant dense<0.000000e+00> : vector<512xf32>
    %33 = vector.multi_reduction <add>, %32, %cst_18 [0] : vector<16x512xf32> to vector<512xf32>
    %34 = vector.shape_cast %33 : vector<512xf32> to vector<1x512xf32>
    %c0_19 = arith.constant 0 : index
    %c0_20 = arith.constant 0 : index
    %c0_21 = arith.constant 0 : index
    %35 = vector.load %arg9[%c0_19, %c0_20, %c0_21] : memref<1x8x512xf32, #tpu.memory_space<vmem>>, vector<1x1x512xf32>
    %36 = vector.shape_cast %35 : vector<1x1x512xf32> to vector<1x512xf32>
    %37 = vector.shape_cast %34 : vector<1x512xf32> to vector<1x1x512xf32>
    tpu.vector_store %arg9[%c0_19, %c0_20, %c0_21], %37 {strides = array<i32>} : memref<1x8x512xf32, #tpu.memory_space<vmem>>, vector<1x1x512xf32>,
    %38 = vector.extract_strided_slice %13 {offsets = [1, 0], sizes = [1, 512], strides = [1, 1]} : vector<8x512xf32> to vector<1x512xf32>
    %39 = vector.broadcast %38 : vector<1x512xf32> to vector<16x512xf32>
    %40 = arith.mulf %15, %39 : vector<16x512xf32>
    %41 = math.exp %40 : vector<16x512xf32>
    %42 = arith.mulf %41, %28 : vector<16x512xf32>
    %c0_22 = arith.constant 0 : index
    %c1 = arith.constant 1 : index
    %c0_23 = arith.constant 0 : index
    %c0_24 = arith.constant 0 : index
    %43 = vector.load %arg5[%c0_22, %c1, %c0_23, %c0_24] : memref<1x8x16x1xf32, #tpu.memory_space<vmem>>, vector<1x1x16x1xf32>
    %44 = vector.shape_cast %43 : vector<1x1x16x1xf32> to vector<16x1xf32>
    %45 = vector.extract_strided_slice %14 {offsets = [1, 0], sizes = [1, 512], strides = [1, 1]} : vector<8x512xf32> to vector<1x512xf32>
    %46 = vector.broadcast %44 : vector<16x1xf32> to vector<16x512xf32>
    %47 = vector.broadcast %45 : vector<1x512xf32> to vector<16x512xf32>
    %48 = arith.mulf %46, %47 : vector<16x512xf32>
    %49 = arith.addf %42, %48 : vector<16x512xf32>
    %c0_25 = arith.constant 0 : index
    %c1_26 = arith.constant 1 : index
    %c0_27 = arith.constant 0 : index
    %c0_28 = arith.constant 0 : index
    %50 = vector.load %arg6[%c0_25, %c1_26, %c0_27, %c0_28] : memref<1x8x16x1xf32, #tpu.memory_space<vmem>>, vector<1x1x16x1xf32>
    %51 = vector.shape_cast %50 : vector<1x1x16x1xf32> to vector<16x1xf32>
    %52 = vector.broadcast %51 : vector<16x1xf32> to vector<16x512xf32>
    %53 = arith.mulf %52, %49 : vector<16x512xf32>
    %cst_29 = arith.constant dense<0.000000e+00> : vector<512xf32>
    %54 = vector.multi_reduction <add>, %53, %cst_29 [0] : vector<16x512xf32> to vector<512xf32>
    %55 = vector.shape_cast %54 : vector<512xf32> to vector<1x512xf32>
    %c0_30 = arith.constant 0 : index
    %c1_31 = arith.constant 1 : index
    %c0_32 = arith.constant 0 : index
    %56 = vector.load %arg9[%c0_30, %c1_31, %c0_32] : memref<1x8x512xf32, #tpu.memory_space<vmem>>, vector<1x1x512xf32>
    %57 = vector.shape_cast %56 : vector<1x1x512xf32> to vector<1x512xf32>
    %58 = vector.shape_cast %55 : vector<1x512xf32> to vector<1x1x512xf32>
    tpu.vector_store %arg9[%c0_30, %c1_31, %c0_32], %58 {strides = array<i32>} : memref<1x8x512xf32, #tpu.memory_space<vmem>>, vector<1x1x512xf32>,
    %59 = vector.extract_strided_slice %13 {offsets = [2, 0], sizes = [1, 512], strides = [1, 1]} : vector<8x512xf32> to vector<1x512xf32>
    %60 = vector.broadcast %59 : vector<1x512xf32> to vector<16x512xf32>
    %61 = arith.mulf %15, %60 : vector<16x512xf32>
    %62 = math.exp %61 : vector<16x512xf32>
    %63 = arith.mulf %62, %49 : vector<16x512xf32>
    %c0_33 = arith.constant 0 : index
    %c2 = arith.constant 2 : index
    %c0_34 = arith.constant 0 : index
    %c0_35 = arith.constant 0 : index
    %64 = vector.load %arg5[%c0_33, %c2, %c0_34, %c0_35] : memref<1x8x16x1xf32, #tpu.memory_space<vmem>>, vector<1x1x16x1xf32>
    %65 = vector.shape_cast %64 : vector<1x1x16x1xf32> to vector<16x1xf32>
    %66 = vector.extract_strided_slice %14 {offsets = [2, 0], sizes = [1, 512], strides = [1, 1]} : vector<8x512xf32> to vector<1x512xf32>
    %67 = vector.broadcast %65 : vector<16x1xf32> to vector<16x512xf32>
    %68 = vector.broadcast %66 : vector<1x512xf32> to vector<16x512xf32>
    %69 = arith.mulf %67, %68 : vector<16x512xf32>
    %70 = arith.addf %63, %69 : vector<16x512xf32>
    %c0_36 = arith.constant 0 : index
    %c2_37 = arith.constant 2 : index
    %c0_38 = arith.constant 0 : index
    %c0_39 = arith.constant 0 : index
    %71 = vector.load %arg6[%c0_36, %c2_37, %c0_38, %c0_39] : memref<1x8x16x1xf32, #tpu.memory_space<vmem>>, vector<1x1x16x1xf32>
    %72 = vector.shape_cast %71 : vector<1x1x16x1xf32> to vector<16x1xf32>
    %73 = vector.broadcast %72 : vector<16x1xf32> to vector<16x512xf32>
    %74 = arith.mulf %73, %70 : vector<16x512xf32>
    %cst_40 = arith.constant dense<0.000000e+00> : vector<512xf32>
    %75 = vector.multi_reduction <add>, %74, %cst_40 [0] : vector<16x512xf32> to vector<512xf32>
    %76 = vector.shape_cast %75 : vector<512xf32> to vector<1x512xf32>
    %c0_41 = arith.constant 0 : index
    %c2_42 = arith.constant 2 : index
    %c0_43 = arith.constant 0 : index
    %77 = vector.load %arg9[%c0_41, %c2_42, %c0_43] : memref<1x8x512xf32, #tpu.memory_space<vmem>>, vector<1x1x512xf32>
    %78 = vector.shape_cast %77 : vector<1x1x512xf32> to vector<1x512xf32>
    %79 = vector.shape_cast %76 : vector<1x512xf32> to vector<1x1x512xf32>
    tpu.vector_store %arg9[%c0_41, %c2_42, %c0_43], %79 {strides = array<i32>} : memref<1x8x512xf32, #tpu.memory_space<vmem>>, vector<1x1x512xf32>,
    %80 = vector.extract_strided_slice %13 {offsets = [3, 0], sizes = [1, 512], strides = [1, 1]} : vector<8x512xf32> to vector<1x512xf32>
    %81 = vector.broadcast %80 : vector<1x512xf32> to vector<16x512xf32>
    %82 = arith.mulf %15, %81 : vector<16x512xf32>
    %83 = math.exp %82 : vector<16x512xf32>
    %84 = arith.mulf %83, %70 : vector<16x512xf32>
    %c0_44 = arith.constant 0 : index
    %c3 = arith.constant 3 : index
    %c0_45 = arith.constant 0 : index
    %c0_46 = arith.constant 0 : index
    %85 = vector.load %arg5[%c0_44, %c3, %c0_45, %c0_46] : memref<1x8x16x1xf32, #tpu.memory_space<vmem>>, vector<1x1x16x1xf32>
    %86 = vector.shape_cast %85 : vector<1x1x16x1xf32> to vector<16x1xf32>
    %87 = vector.extract_strided_slice %14 {offsets = [3, 0], sizes = [1, 512], strides = [1, 1]} : vector<8x512xf32> to vector<1x512xf32>
    %88 = vector.broadcast %86 : vector<16x1xf32> to vector<16x512xf32>
    %89 = vector.broadcast %87 : vector<1x512xf32> to vector<16x512xf32>
    %90 = arith.mulf %88, %89 : vector<16x512xf32>
    %91 = arith.addf %84, %90 : vector<16x512xf32>
    %c0_47 = arith.constant 0 : index
    %c3_48 = arith.constant 3 : index
    %c0_49 = arith.constant 0 : index
    %c0_50 = arith.constant 0 : index
    %92 = vector.load %arg6[%c0_47, %c3_48, %c0_49, %c0_50] : memref<1x8x16x1xf32, #tpu.memory_space<vmem>>, vector<1x1x16x1xf32>
    %93 = vector.shape_cast %92 : vector<1x1x16x1xf32> to vector<16x1xf32>
    %94 = vector.broadcast %93 : vector<16x1xf32> to vector<16x512xf32>
    %95 = arith.mulf %94, %91 : vector<16x512xf32>
    %cst_51 = arith.constant dense<0.000000e+00> : vector<512xf32>
    %96 = vector.multi_reduction <add>, %95, %cst_51 [0] : vector<16x512xf32> to vector<512xf32>
    %97 = vector.shape_cast %96 : vector<512xf32> to vector<1x512xf32>
    %c0_52 = arith.constant 0 : index
    %c3_53 = arith.constant 3 : index
    %c0_54 = arith.constant 0 : index
    %98 = vector.load %arg9[%c0_52, %c3_53, %c0_54] : memref<1x8x512xf32, #tpu.memory_space<vmem>>, vector<1x1x512xf32>
    %99 = vector.shape_cast %98 : vector<1x1x512xf32> to vector<1x512xf32>
    %100 = vector.shape_cast %97 : vector<1x512xf32> to vector<1x1x512xf32>
    tpu.vector_store %arg9[%c0_52, %c3_53, %c0_54], %100 {strides = array<i32>} : memref<1x8x512xf32, #tpu.memory_space<vmem>>, vector<1x1x512xf32>,
    %101 = vector.extract_strided_slice %13 {offsets = [4, 0], sizes = [1, 512], strides = [1, 1]} : vector<8x512xf32> to vector<1x512xf32>
    %102 = vector.broadcast %101 : vector<1x512xf32> to vector<16x512xf32>
    %103 = arith.mulf %15, %102 : vector<16x512xf32>
    %104 = math.exp %103 : vector<16x512xf32>
    %105 = arith.mulf %104, %91 : vector<16x512xf32>
    %c0_55 = arith.constant 0 : index
    %c4 = arith.constant 4 : index
    %c0_56 = arith.constant 0 : index
    %c0_57 = arith.constant 0 : index
    %106 = vector.load %arg5[%c0_55, %c4, %c0_56, %c0_57] : memref<1x8x16x1xf32, #tpu.memory_space<vmem>>, vector<1x1x16x1xf32>
    %107 = vector.shape_cast %106 : vector<1x1x16x1xf32> to vector<16x1xf32>
    %108 = vector.extract_strided_slice %14 {offsets = [4, 0], sizes = [1, 512], strides = [1, 1]} : vector<8x512xf32> to vector<1x512xf32>
    %109 = vector.broadcast %107 : vector<16x1xf32> to vector<16x512xf32>
    %110 = vector.broadcast %108 : vector<1x512xf32> to vector<16x512xf32>
    %111 = arith.mulf %109, %110 : vector<16x512xf32>
    %112 = arith.addf %105, %111 : vector<16x512xf32>
    %c0_58 = arith.constant 0 : index
    %c4_59 = arith.constant 4 : index
    %c0_60 = arith.constant 0 : index
    %c0_61 = arith.constant 0 : index
    %113 = vector.load %arg6[%c0_58, %c4_59, %c0_60, %c0_61] : memref<1x8x16x1xf32, #tpu.memory_space<vmem>>, vector<1x1x16x1xf32>
    %114 = vector.shape_cast %113 : vector<1x1x16x1xf32> to vector<16x1xf32>
    %115 = vector.broadcast %114 : vector<16x1xf32> to vector<16x512xf32>
    %116 = arith.mulf %115, %112 : vector<16x512xf32>
    %cst_62 = arith.constant dense<0.000000e+00> : vector<512xf32>
    %117 = vector.multi_reduction <add>, %116, %cst_62 [0] : vector<16x512xf32> to vector<512xf32>
    %118 = vector.shape_cast %117 : vector<512xf32> to vector<1x512xf32>
    %c0_63 = arith.constant 0 : index
    %c4_64 = arith.constant 4 : index
    %c0_65 = arith.constant 0 : index
    %119 = vector.load %arg9[%c0_63, %c4_64, %c0_65] : memref<1x8x512xf32, #tpu.memory_space<vmem>>, vector<1x1x512xf32>
    %120 = vector.shape_cast %119 : vector<1x1x512xf32> to vector<1x512xf32>
    %121 = vector.shape_cast %118 : vector<1x512xf32> to vector<1x1x512xf32>
    tpu.vector_store %arg9[%c0_63, %c4_64, %c0_65], %121 {strides = array<i32>} : memref<1x8x512xf32, #tpu.memory_space<vmem>>, vector<1x1x512xf32>,
    %122 = vector.extract_strided_slice %13 {offsets = [5, 0], sizes = [1, 512], strides = [1, 1]} : vector<8x512xf32> to vector<1x512xf32>
    %123 = vector.broadcast %122 : vector<1x512xf32> to vector<16x512xf32>
    %124 = arith.mulf %15, %123 : vector<16x512xf32>
    %125 = math.exp %124 : vector<16x512xf32>
    %126 = arith.mulf %125, %112 : vector<16x512xf32>
    %c0_66 = arith.constant 0 : index
    %c5 = arith.constant 5 : index
    %c0_67 = arith.constant 0 : index
    %c0_68 = arith.constant 0 : index
    %127 = vector.load %arg5[%c0_66, %c5, %c0_67, %c0_68] : memref<1x8x16x1xf32, #tpu.memory_space<vmem>>, vector<1x1x16x1xf32>
    %128 = vector.shape_cast %127 : vector<1x1x16x1xf32> to vector<16x1xf32>
    %129 = vector.extract_strided_slice %14 {offsets = [5, 0], sizes = [1, 512], strides = [1, 1]} : vector<8x512xf32> to vector<1x512xf32>
    %130 = vector.broadcast %128 : vector<16x1xf32> to vector<16x512xf32>
    %131 = vector.broadcast %129 : vector<1x512xf32> to vector<16x512xf32>
    %132 = arith.mulf %130, %131 : vector<16x512xf32>
    %133 = arith.addf %126, %132 : vector<16x512xf32>
    %c0_69 = arith.constant 0 : index
    %c5_70 = arith.constant 5 : index
    %c0_71 = arith.constant 0 : index
    %c0_72 = arith.constant 0 : index
    %134 = vector.load %arg6[%c0_69, %c5_70, %c0_71, %c0_72] : memref<1x8x16x1xf32, #tpu.memory_space<vmem>>, vector<1x1x16x1xf32>
    %135 = vector.shape_cast %134 : vector<1x1x16x1xf32> to vector<16x1xf32>
    %136 = vector.broadcast %135 : vector<16x1xf32> to vector<16x512xf32>
    %137 = arith.mulf %136, %133 : vector<16x512xf32>
    %cst_73 = arith.constant dense<0.000000e+00> : vector<512xf32>
    %138 = vector.multi_reduction <add>, %137, %cst_73 [0] : vector<16x512xf32> to vector<512xf32>
    %139 = vector.shape_cast %138 : vector<512xf32> to vector<1x512xf32>
    %c0_74 = arith.constant 0 : index
    %c5_75 = arith.constant 5 : index
    %c0_76 = arith.constant 0 : index
    %140 = vector.load %arg9[%c0_74, %c5_75, %c0_76] : memref<1x8x512xf32, #tpu.memory_space<vmem>>, vector<1x1x512xf32>
    %141 = vector.shape_cast %140 : vector<1x1x512xf32> to vector<1x512xf32>
    %142 = vector.shape_cast %139 : vector<1x512xf32> to vector<1x1x512xf32>
    tpu.vector_store %arg9[%c0_74, %c5_75, %c0_76], %142 {strides = array<i32>} : memref<1x8x512xf32, #tpu.memory_space<vmem>>, vector<1x1x512xf32>,
    %143 = vector.extract_strided_slice %13 {offsets = [6, 0], sizes = [1, 512], strides = [1, 1]} : vector<8x512xf32> to vector<1x512xf32>
    %144 = vector.broadcast %143 : vector<1x512xf32> to vector<16x512xf32>
    %145 = arith.mulf %15, %144 : vector<16x512xf32>
    %146 = math.exp %145 : vector<16x512xf32>
    %147 = arith.mulf %146, %133 : vector<16x512xf32>
    %c0_77 = arith.constant 0 : index
    %c6 = arith.constant 6 : index
    %c0_78 = arith.constant 0 : index
    %c0_79 = arith.constant 0 : index
    %148 = vector.load %arg5[%c0_77, %c6, %c0_78, %c0_79] : memref<1x8x16x1xf32, #tpu.memory_space<vmem>>, vector<1x1x16x1xf32>
    %149 = vector.shape_cast %148 : vector<1x1x16x1xf32> to vector<16x1xf32>
    %150 = vector.extract_strided_slice %14 {offsets = [6, 0], sizes = [1, 512], strides = [1, 1]} : vector<8x512xf32> to vector<1x512xf32>
    %151 = vector.broadcast %149 : vector<16x1xf32> to vector<16x512xf32>
    %152 = vector.broadcast %150 : vector<1x512xf32> to vector<16x512xf32>
    %153 = arith.mulf %151, %152 : vector<16x512xf32>
    %154 = arith.addf %147, %153 : vector<16x512xf32>
    %c0_80 = arith.constant 0 : index
    %c6_81 = arith.constant 6 : index
    %c0_82 = arith.constant 0 : index
    %c0_83 = arith.constant 0 : index
    %155 = vector.load %arg6[%c0_80, %c6_81, %c0_82, %c0_83] : memref<1x8x16x1xf32, #tpu.memory_space<vmem>>, vector<1x1x16x1xf32>
    %156 = vector.shape_cast %155 : vector<1x1x16x1xf32> to vector<16x1xf32>
    %157 = vector.broadcast %156 : vector<16x1xf32> to vector<16x512xf32>
    %158 = arith.mulf %157, %154 : vector<16x512xf32>
    %cst_84 = arith.constant dense<0.000000e+00> : vector<512xf32>
    %159 = vector.multi_reduction <add>, %158, %cst_84 [0] : vector<16x512xf32> to vector<512xf32>
    %160 = vector.shape_cast %159 : vector<512xf32> to vector<1x512xf32>
    %c0_85 = arith.constant 0 : index
    %c6_86 = arith.constant 6 : index
    %c0_87 = arith.constant 0 : index
    %161 = vector.load %arg9[%c0_85, %c6_86, %c0_87] : memref<1x8x512xf32, #tpu.memory_space<vmem>>, vector<1x1x512xf32>
    %162 = vector.shape_cast %161 : vector<1x1x512xf32> to vector<1x512xf32>
    %163 = vector.shape_cast %160 : vector<1x512xf32> to vector<1x1x512xf32>
    tpu.vector_store %arg9[%c0_85, %c6_86, %c0_87], %163 {strides = array<i32>} : memref<1x8x512xf32, #tpu.memory_space<vmem>>, vector<1x1x512xf32>,
    %164 = vector.extract_strided_slice %13 {offsets = [7, 0], sizes = [1, 512], strides = [1, 1]} : vector<8x512xf32> to vector<1x512xf32>
    %165 = vector.broadcast %164 : vector<1x512xf32> to vector<16x512xf32>
    %166 = arith.mulf %15, %165 : vector<16x512xf32>
    %167 = math.exp %166 : vector<16x512xf32>
    %168 = arith.mulf %167, %154 : vector<16x512xf32>
    %c0_88 = arith.constant 0 : index
    %c7 = arith.constant 7 : index
    %c0_89 = arith.constant 0 : index
    %c0_90 = arith.constant 0 : index
    %169 = vector.load %arg5[%c0_88, %c7, %c0_89, %c0_90] : memref<1x8x16x1xf32, #tpu.memory_space<vmem>>, vector<1x1x16x1xf32>
    %170 = vector.shape_cast %169 : vector<1x1x16x1xf32> to vector<16x1xf32>
    %171 = vector.extract_strided_slice %14 {offsets = [7, 0], sizes = [1, 512], strides = [1, 1]} : vector<8x512xf32> to vector<1x512xf32>
    %172 = vector.broadcast %170 : vector<16x1xf32> to vector<16x512xf32>
    %173 = vector.broadcast %171 : vector<1x512xf32> to vector<16x512xf32>
    %174 = arith.mulf %172, %173 : vector<16x512xf32>
    %175 = arith.addf %168, %174 : vector<16x512xf32>
    %c0_91 = arith.constant 0 : index
    %c7_92 = arith.constant 7 : index
    %c0_93 = arith.constant 0 : index
    %c0_94 = arith.constant 0 : index
    %176 = vector.load %arg6[%c0_91, %c7_92, %c0_93, %c0_94] : memref<1x8x16x1xf32, #tpu.memory_space<vmem>>, vector<1x1x16x1xf32>
    %177 = vector.shape_cast %176 : vector<1x1x16x1xf32> to vector<16x1xf32>
    %178 = vector.broadcast %177 : vector<16x1xf32> to vector<16x512xf32>
    %179 = arith.mulf %178, %175 : vector<16x512xf32>
    %cst_95 = arith.constant dense<0.000000e+00> : vector<512xf32>
    %180 = vector.multi_reduction <add>, %179, %cst_95 [0] : vector<16x512xf32> to vector<512xf32>
    %181 = vector.shape_cast %180 : vector<512xf32> to vector<1x512xf32>
    %c0_96 = arith.constant 0 : index
    %c7_97 = arith.constant 7 : index
    %c0_98 = arith.constant 0 : index
    %182 = vector.load %arg9[%c0_96, %c7_97, %c0_98] : memref<1x8x512xf32, #tpu.memory_space<vmem>>, vector<1x1x512xf32>
    %183 = vector.shape_cast %182 : vector<1x1x512xf32> to vector<1x512xf32>
    %184 = vector.shape_cast %181 : vector<1x512xf32> to vector<1x1x512xf32>
    tpu.vector_store %arg9[%c0_96, %c7_97, %c0_98], %184 {strides = array<i32>} : memref<1x8x512xf32, #tpu.memory_space<vmem>>, vector<1x1x512xf32>,
    %c0_99 = arith.constant 0 : index
    %c0_100 = arith.constant 0 : index
    %c0_101 = arith.constant 0 : index
    %185 = vector.load %arg9[%c0_99, %c0_100, %c0_101] : memref<1x8x512xf32, #tpu.memory_space<vmem>>, vector<1x8x512xf32>
    %186 = vector.shape_cast %185 : vector<1x8x512xf32> to vector<8x512xf32>
    %c0_102 = arith.constant 0 : index
    %c0_103 = arith.constant 0 : index
    %187 = vector.load %arg8[%c0_102, %c0_103] : memref<1x512xf32, #tpu.memory_space<vmem>>, vector<1x512xf32>
    %188 = vector.broadcast %187 : vector<1x512xf32> to vector<8x512xf32>
    %189 = arith.mulf %1, %188 : vector<8x512xf32>
    %190 = arith.addf %186, %189 : vector<8x512xf32>
    %c0_104 = arith.constant 0 : index
    %c0_105 = arith.constant 0 : index
    %c0_106 = arith.constant 0 : index
    %191 = vector.load %arg4[%c0_104, %c0_105, %c0_106] : memref<1x8x512xf32, #tpu.memory_space<vmem>>, vector<1x8x512xf32>
    %192 = vector.shape_cast %191 : vector<1x8x512xf32> to vector<8x512xf32>
    %cst_107 = arith.constant 0.000000e+00 : f32
    %193 = vector.broadcast %cst_107 : f32 to vector<8x512xf32>
    %194 = arith.subf %193, %192 : vector<8x512xf32>
    %195 = math.exp %194 : vector<8x512xf32>
    %cst_108 = arith.constant 1.000000e+00 : f32
    %196 = vector.broadcast %cst_108 : f32 to vector<8x512xf32>
    %197 = arith.addf %196, %195 : vector<8x512xf32>
    %cst_109 = arith.constant 1.000000e+00 : f32
    %198 = vector.broadcast %cst_109 : f32 to vector<8x512xf32>
    %199 = arith.divf %198, %197 : vector<8x512xf32>
    %200 = arith.mulf %192, %199 : vector<8x512xf32>
    %201 = arith.mulf %190, %200 : vector<8x512xf32>
    %c0_110 = arith.constant 0 : index
    %c0_111 = arith.constant 0 : index
    %c0_112 = arith.constant 0 : index
    %202 = vector.load %arg9[%c0_110, %c0_111, %c0_112] : memref<1x8x512xf32, #tpu.memory_space<vmem>>, vector<1x8x512xf32>
    %203 = vector.shape_cast %202 : vector<1x8x512xf32> to vector<8x512xf32>
    %204 = vector.shape_cast %201 : vector<8x512xf32> to vector<1x8x512xf32>
    tpu.vector_store %arg9[%c0_110, %c0_111, %c0_112], %204 {strides = array<i32>} : memref<1x8x512xf32, #tpu.memory_space<vmem>>, vector<1x8x512xf32>,
    return
  }
  func.func @transform_0(%arg0: i32, %arg1: i32) -> (i32, i32, i32) {
    %c0_i32 = arith.constant 0 : i32
    %c0_i32_0 = arith.constant 0 : i32
    return %arg0, %c0_i32, %arg1 : i32, i32, i32
  }
  func.func @transform_1(%arg0: i32, %arg1: i32) -> (i32, i32, i32) {
    %c0_i32 = arith.constant 0 : i32
    %c0_i32_0 = arith.constant 0 : i32
    return %arg0, %c0_i32, %arg1 : i32, i32, i32
  }
  func.func @transform_2(%arg0: i32, %arg1: i32) -> (i32, i32, i32) {
    %c0_i32 = arith.constant 0 : i32
    %c0_i32_0 = arith.constant 0 : i32
    return %arg0, %c0_i32, %arg1 : i32, i32, i32
  }
  func.func @transform_3(%arg0: i32, %arg1: i32) -> (i32, i32, i32, i32) {
    %c0_i32 = arith.constant 0 : i32
    %c0_i32_0 = arith.constant 0 : i32
    %c0_i32_1 = arith.constant 0 : i32
    %c0_i32_2 = arith.constant 0 : i32
    return %arg0, %c0_i32, %c0_i32_0, %c0_i32_1 : i32, i32, i32, i32
  }
  func.func @transform_4(%arg0: i32, %arg1: i32) -> (i32, i32, i32, i32) {
    %c0_i32 = arith.constant 0 : i32
    %c0_i32_0 = arith.constant 0 : i32
    %c0_i32_1 = arith.constant 0 : i32
    %c0_i32_2 = arith.constant 0 : i32
    return %arg0, %c0_i32, %c0_i32_0, %c0_i32_1 : i32, i32, i32, i32
  }
  func.func @transform_5(%arg0: i32, %arg1: i32) -> (i32, i32) {
    %c0_i32 = arith.constant 0 : i32
    %c0_i32_0 = arith.constant 0 : i32
    return %c0_i32, %arg1 : i32, i32
  }
  func.func @transform_6(%arg0: i32, %arg1: i32) -> (i32, i32) {
    %c0_i32 = arith.constant 0 : i32
    %c0_i32_0 = arith.constant 0 : i32
    return %c0_i32, %arg1 : i32, i32
  }
  func.func @transform_7(%arg0: i32, %arg1: i32) -> (i32, i32, i32) {
    %c0_i32 = arith.constant 0 : i32
    %c0_i32_0 = arith.constant 0 : i32
    return %arg0, %c0_i32, %arg1 : i32, i32, i32
  }
}

module attributes {stable_mosaic.version = 11 : i64} {
  func.func @_in_proj_kernel(%arg0: i32, %arg1: memref<16x256xf32, #tpu.memory_space<vmem>>, %arg2: memref<256x512xi8, #tpu.memory_space<vmem>>, %arg3: memref<1x512xf32, #tpu.memory_space<vmem>>, %arg4: memref<256x512xi8, #tpu.memory_space<vmem>>, %arg5: memref<1x512xf32, #tpu.memory_space<vmem>>, %arg6: memref<16x512xf32, #tpu.memory_space<vmem>>, %arg7: memref<16x512xf32, #tpu.memory_space<vmem>>) attributes {dimension_semantics = [#tpu.dimension_semantics<parallel>], iteration_bounds = array<i64: 1>, scalar_prefetch = 0 : i64, scratch_operands = 0 : i64, tpu.core_type = #tpu.core_type<tc>, window_params = [{pipeline_mode = #tpu.pipeline_mode<synchronous>, transform_indices = @transform_0, window_bounds = array<i64: 16, 256>}, {transform_indices = @transform_1, window_bounds = array<i64: 256, 512>}, {transform_indices = @transform_2, window_bounds = array<i64: 1, 512>}, {transform_indices = @transform_3, window_bounds = array<i64: 256, 512>}, {transform_indices = @transform_4, window_bounds = array<i64: 1, 512>}, {transform_indices = @transform_5, window_bounds = array<i64: 16, 512>}, {transform_indices = @transform_6, window_bounds = array<i64: 16, 512>}]} {
    %c0 = arith.constant 0 : index
    %c0_0 = arith.constant 0 : index
    %0 = vector.load %arg1[%c0, %c0_0] : memref<16x256xf32, #tpu.memory_space<vmem>>, vector<16x256xf32>
    %1 = arith.truncf %0 : vector<16x256xf32> to vector<16x256xbf16>
    %c0_1 = arith.constant 0 : index
    %c0_2 = arith.constant 0 : index
    %2 = vector.load %arg2[%c0_1, %c0_2] : memref<256x512xi8, #tpu.memory_space<vmem>>, vector<256x512xi8>
    %3 = arith.sitofp %2 : vector<256x512xi8> to vector<256x512xf32>
    %4 = arith.truncf %3 : vector<256x512xf32> to vector<256x512xbf16>
    %c0_3 = arith.constant 0 : index
    %c0_4 = arith.constant 0 : index
    %5 = vector.load %arg4[%c0_3, %c0_4] : memref<256x512xi8, #tpu.memory_space<vmem>>, vector<256x512xi8>
    %6 = arith.sitofp %5 : vector<256x512xi8> to vector<256x512xf32>
    %7 = arith.truncf %6 : vector<256x512xf32> to vector<256x512xbf16>
    %cst = arith.constant dense<0.000000e+00> : vector<16x512xf32>
    %8 = tpu.matmul %1, %4, %cst {dimension_numbers = #tpu.dot_dimension_numbers<[1], [0], [0], [1], [0, 0, 1, 1], [], []>} : vector<16x256xbf16>, vector<256x512xbf16>, vector<16x512xf32> -> vector<16x512xf32>
    %c0_5 = arith.constant 0 : index
    %c0_6 = arith.constant 0 : index
    %9 = vector.load %arg3[%c0_5, %c0_6] : memref<1x512xf32, #tpu.memory_space<vmem>>, vector<1x512xf32>
    %10 = vector.broadcast %9 : vector<1x512xf32> to vector<16x512xf32>
    %11 = arith.mulf %8, %10 : vector<16x512xf32>
    %c0_7 = arith.constant 0 : index
    %c0_8 = arith.constant 0 : index
    %12 = vector.load %arg6[%c0_7, %c0_8] : memref<16x512xf32, #tpu.memory_space<vmem>>, vector<16x512xf32>
    tpu.vector_store %arg6[%c0_7, %c0_8], %11 {strides = array<i32>} : memref<16x512xf32, #tpu.memory_space<vmem>>, vector<16x512xf32>,
    %cst_9 = arith.constant dense<0.000000e+00> : vector<16x512xf32>
    %13 = tpu.matmul %1, %7, %cst_9 {dimension_numbers = #tpu.dot_dimension_numbers<[1], [0], [0], [1], [0, 0, 1, 1], [], []>} : vector<16x256xbf16>, vector<256x512xbf16>, vector<16x512xf32> -> vector<16x512xf32>
    %c0_10 = arith.constant 0 : index
    %c0_11 = arith.constant 0 : index
    %14 = vector.load %arg5[%c0_10, %c0_11] : memref<1x512xf32, #tpu.memory_space<vmem>>, vector<1x512xf32>
    %15 = vector.broadcast %14 : vector<1x512xf32> to vector<16x512xf32>
    %16 = arith.mulf %13, %15 : vector<16x512xf32>
    %c0_12 = arith.constant 0 : index
    %c0_13 = arith.constant 0 : index
    %17 = vector.load %arg7[%c0_12, %c0_13] : memref<16x512xf32, #tpu.memory_space<vmem>>, vector<16x512xf32>
    tpu.vector_store %arg7[%c0_12, %c0_13], %16 {strides = array<i32>} : memref<16x512xf32, #tpu.memory_space<vmem>>, vector<16x512xf32>,
    return
  }
  func.func @transform_0(%arg0: i32) -> (i32, i32) {
    %c0_i32 = arith.constant 0 : i32
    %c0_i32_0 = arith.constant 0 : i32
    %c0_i32_1 = arith.constant 0 : i32
    return %c0_i32, %c0_i32_0 : i32, i32
  }
  func.func @transform_1(%arg0: i32) -> (i32, i32) {
    %c0_i32 = arith.constant 0 : i32
    %c0_i32_0 = arith.constant 0 : i32
    return %c0_i32, %arg0 : i32, i32
  }
  func.func @transform_2(%arg0: i32) -> (i32, i32) {
    %c0_i32 = arith.constant 0 : i32
    %c0_i32_0 = arith.constant 0 : i32
    return %c0_i32, %arg0 : i32, i32
  }
  func.func @transform_3(%arg0: i32) -> (i32, i32) {
    %c0_i32 = arith.constant 0 : i32
    %c0_i32_0 = arith.constant 0 : i32
    return %c0_i32, %arg0 : i32, i32
  }
  func.func @transform_4(%arg0: i32) -> (i32, i32) {
    %c0_i32 = arith.constant 0 : i32
    %c0_i32_0 = arith.constant 0 : i32
    return %c0_i32, %arg0 : i32, i32
  }
  func.func @transform_5(%arg0: i32) -> (i32, i32) {
    %c0_i32 = arith.constant 0 : i32
    %c0_i32_0 = arith.constant 0 : i32
    return %c0_i32, %arg0 : i32, i32
  }
  func.func @transform_6(%arg0: i32) -> (i32, i32) {
    %c0_i32 = arith.constant 0 : i32
    %c0_i32_0 = arith.constant 0 : i32
    return %c0_i32, %arg0 : i32, i32
  }
}

module attributes {stable_mosaic.version = 11 : i64} {
  func.func @_dec_kernel(%arg0: i32, %arg1: memref<16x256xf32, #tpu.memory_space<vmem>>, %arg2: memref<1x256xf32, #tpu.memory_space<vmem>>, %arg3: memref<1x256xf32, #tpu.memory_space<vmem>>, %arg4: memref<256x128xbf16, #tpu.memory_space<vmem>>, %arg5: memref<16x128xf32, #tpu.memory_space<vmem>>) attributes {dimension_semantics = [#tpu.dimension_semantics<arbitrary>], iteration_bounds = array<i64: 1>, scalar_prefetch = 0 : i64, scratch_operands = 0 : i64, tpu.core_type = #tpu.core_type<tc>, window_params = [{pipeline_mode = #tpu.pipeline_mode<synchronous>, transform_indices = @transform_0, window_bounds = array<i64: 16, 256>}, {pipeline_mode = #tpu.pipeline_mode<synchronous>, transform_indices = @transform_1, window_bounds = array<i64: 1, 256>}, {pipeline_mode = #tpu.pipeline_mode<synchronous>, transform_indices = @transform_2, window_bounds = array<i64: 1, 256>}, {pipeline_mode = #tpu.pipeline_mode<synchronous>, transform_indices = @transform_3, window_bounds = array<i64: 256, 128>}, {pipeline_mode = #tpu.pipeline_mode<synchronous>, transform_indices = @transform_4, window_bounds = array<i64: 16, 128>}]} {
    %c0 = arith.constant 0 : index
    %c0_0 = arith.constant 0 : index
    %0 = vector.load %arg1[%c0, %c0_0] : memref<16x256xf32, #tpu.memory_space<vmem>>, vector<16x256xf32>
    %cst = arith.constant dense<0.000000e+00> : vector<16xf32>
    %1 = vector.multi_reduction <add>, %0, %cst [1] : vector<16x256xf32> to vector<16xf32>
    %2 = vector.shape_cast %1 : vector<16xf32> to vector<16x1xf32>
    %cst_1 = arith.constant 2.560000e+02 : f32
    %3 = vector.broadcast %cst_1 : f32 to vector<16x1xf32>
    %4 = arith.divf %2, %3 : vector<16x1xf32>
    %5 = vector.broadcast %4 : vector<16x1xf32> to vector<16x256xf32>
    %6 = arith.subf %0, %5 : vector<16x256xf32>
    %7 = arith.mulf %6, %6 : vector<16x256xf32>
    %cst_2 = arith.constant dense<0.000000e+00> : vector<16xf32>
    %8 = vector.multi_reduction <add>, %7, %cst_2 [1] : vector<16x256xf32> to vector<16xf32>
    %9 = vector.shape_cast %8 : vector<16xf32> to vector<16x1xf32>
    %cst_3 = arith.constant 2.560000e+02 : f32
    %10 = vector.broadcast %cst_3 : f32 to vector<16x1xf32>
    %11 = arith.divf %9, %10 : vector<16x1xf32>
    %cst_4 = arith.constant 9.99999974E-6 : f32
    %12 = vector.broadcast %cst_4 : f32 to vector<16x1xf32>
    %13 = arith.addf %11, %12 : vector<16x1xf32>
    %14 = math.rsqrt %13 : vector<16x1xf32>
    %15 = vector.broadcast %14 : vector<16x1xf32> to vector<16x256xf32>
    %16 = arith.mulf %6, %15 : vector<16x256xf32>
    %c0_5 = arith.constant 0 : index
    %c0_6 = arith.constant 0 : index
    %17 = vector.load %arg2[%c0_5, %c0_6] : memref<1x256xf32, #tpu.memory_space<vmem>>, vector<1x256xf32>
    %18 = vector.broadcast %17 : vector<1x256xf32> to vector<16x256xf32>
    %19 = arith.mulf %16, %18 : vector<16x256xf32>
    %c0_7 = arith.constant 0 : index
    %c0_8 = arith.constant 0 : index
    %20 = vector.load %arg3[%c0_7, %c0_8] : memref<1x256xf32, #tpu.memory_space<vmem>>, vector<1x256xf32>
    %21 = vector.broadcast %20 : vector<1x256xf32> to vector<16x256xf32>
    %22 = arith.addf %19, %21 : vector<16x256xf32>
    %23 = arith.truncf %22 : vector<16x256xf32> to vector<16x256xbf16>
    %c0_9 = arith.constant 0 : index
    %c0_10 = arith.constant 0 : index
    %24 = vector.load %arg4[%c0_9, %c0_10] : memref<256x128xbf16, #tpu.memory_space<vmem>>, vector<256x128xbf16>
    %cst_11 = arith.constant dense<0.000000e+00> : vector<16x128xf32>
    %25 = tpu.matmul %23, %24, %cst_11 {dimension_numbers = #tpu.dot_dimension_numbers<[1], [0], [0], [1], [0, 0, 1, 1], [], []>} : vector<16x256xbf16>, vector<256x128xbf16>, vector<16x128xf32> -> vector<16x128xf32>
    %c0_12 = arith.constant 0 : index
    %c0_13 = arith.constant 0 : index
    %26 = vector.load %arg5[%c0_12, %c0_13] : memref<16x128xf32, #tpu.memory_space<vmem>>, vector<16x128xf32>
    tpu.vector_store %arg5[%c0_12, %c0_13], %25 {strides = array<i32>} : memref<16x128xf32, #tpu.memory_space<vmem>>, vector<16x128xf32>,
    return
  }
  func.func @transform_0(%arg0: i32) -> (i32, i32) {
    %c0_i32 = arith.constant 0 : i32
    %c0_i32_0 = arith.constant 0 : i32
    %c0_i32_1 = arith.constant 0 : i32
    return %c0_i32, %c0_i32_0 : i32, i32
  }
  func.func @transform_1(%arg0: i32) -> (i32, i32) {
    %c0_i32 = arith.constant 0 : i32
    %c0_i32_0 = arith.constant 0 : i32
    %c0_i32_1 = arith.constant 0 : i32
    return %c0_i32, %c0_i32_0 : i32, i32
  }
  func.func @transform_2(%arg0: i32) -> (i32, i32) {
    %c0_i32 = arith.constant 0 : i32
    %c0_i32_0 = arith.constant 0 : i32
    %c0_i32_1 = arith.constant 0 : i32
    return %c0_i32, %c0_i32_0 : i32, i32
  }
  func.func @transform_3(%arg0: i32) -> (i32, i32) {
    %c0_i32 = arith.constant 0 : i32
    %c0_i32_0 = arith.constant 0 : i32
    %c0_i32_1 = arith.constant 0 : i32
    return %c0_i32, %c0_i32_0 : i32, i32
  }
  func.func @transform_4(%arg0: i32) -> (i32, i32) {
    %c0_i32 = arith.constant 0 : i32
    %c0_i32_0 = arith.constant 0 : i32
    %c0_i32_1 = arith.constant 0 : i32
    return %c0_i32, %c0_i32_0 : i32, i32
  }
}

</mosaic_0001>

<bundles_post_ra>
// kernel: mamba_bit_forward.26
= control target key start
LH: loop header
LB: loop body
LE: loop exit
PB: predicated region body
PF: predicated region fallthrough
CT: control target
= control target key end

     0   :  { %s789_s12 = smov 0   ;;  %s791_s13 = smov 0   ;;  %s926_s0 = inlined_call_operand.vmem [shape: f32[2,8,512], index: 0, kind: input, shape index: {}]   ;;  %s927_s1 = inlined_call_operand.vmem [shape: f32[4,512], index: 1, kind: input, shape index: {}]   ;;  %s928_s2 = inlined_call_operand.vmem [shape: f32[1,512], index: 2, kind: input, shape index: {}]   ;;  %s929_s3 = inlined_call_operand.vmem [shape: f32[2,8,512], index: 3, kind: output, shape index: {}]  }
   0x1   :  { %s793_s14 = smov 0  }
   0x2 LB: > { %s25_s15 = sadd.s32 1, %s762_s13  ;;  %p691_p0 = scmp.ge.s32.totalorder %s766_s14, 1  ;;  %s766_s14 = sphi %s793_s14, %s13_s14   ;;  %s762_s13 = sphi %s791_s13, %s931_s13   ;;  %s758_s12 = sphi %s789_s12, %s930_s12  }
   0x3   : > { %p27_p1 = scmp.ge.s32.totalorder %s25_s15, 2  ;;  %p179_p2 = scmp.lt.s32.totalorder %s766_s14, 3 }
   0x5   : > { %s933_s15 = smov (%p27_p1, %s25_s15), 0  ;;  %p180_p3 = pnand %p691_p0, %p179_p2 }
   0x6   : > { %p221_p4 = scmp.lt.s32.totalorder (!%p180_p3), %s758_s12, 1  ;;  %v286_v0 = vlaneseq (!%p180_p3)  ;;  %v768_v1 = vmov (!%p180_p3), 0.0   ;;  %v818_v11 = vld [vmem:[%s927_s1] ss:$4 sm:$0xf] (!%p180_p3)  ;;  %vm382_vm0 = vcmask (!%p180_p3), 1046528  }
   0x7   : > { %183 = sbr.rel (%p180_p3) target bundleno = 87 (0x57), region = 32  ;;  %251 = vst [vmem:[#allocation2] sm:$0x7] (!%p180_p3), %v768_v1  ;;  %252 = vst [vmem:[#allocation2 + $0x8] sm:$0x7] (!%p180_p3), %v768_v1  ;;  %vm450_vm1 = vcmask (!%p180_p3), 1045504  }
   0x8   : > { %253 = vst [vmem:[#allocation2 + $0x10] sm:$0x7] (!%p180_p3), %v768_v1  ;;  %254 = vst [vmem:[#allocation2 + $0x18] sm:$0x7] (!%p180_p3), %v768_v1  ;;  %v287_v2 = vshrl.u32 (!%p180_p3), %v286_v0, 7  ;;  %vm518_vm2 = vcmask (!%p180_p3), 1044480  }
   0x9   : > { %v823_v13 = vld [vmem:[%s928_s2] sm:$0xf] (!%p180_p3) }
   0xa   : > { %v288_v12 = vsub.s32 (!%p180_p3), 0, %v287_v2  ;;  %v696_v14 = vld [vmem:[%s927_s1 + $0x1] ss:$4 sm:$0xf] (!%p180_p3)  ;;  %v828_v15 = vsub.s32 (!%p180_p3), 1, %v287_v2  ;;  %v836_v18 = vsub.s32 (!%p180_p3), 2, %v287_v2 }
   0xb   : > { %v697_v16 = vld [vmem:[%s927_s1 + $0x2] ss:$4 sm:$0xf] (!%p180_p3)  ;;  %v698_v17 = vld [vmem:[%s927_s1 + $0x3] ss:$4 sm:$0xf] (!%p180_p3) }
   0xc   : > { %v289_v19 = vrot.slane (!%p180_p3), %v818_v11, %v288_v12  ;;  %v314_v20 = vrot.slane (!%p180_p3), %v823_v13, %v288_v12  ;;  %v840_v21 = vsub.s32 (!%p180_p3), 3, %v287_v2  ;;  %v349_v22 = vrot.slane (!%p180_p3), %v696_v14, %v288_v12 }
   0xd   : > { %v417_v23 = vrot.slane (!%p180_p3), %v697_v16, %v288_v12  ;;  %v485_v24 = vrot.slane (!%p180_p3), %v698_v17, %v288_v12  ;;  %v293_v25 = vrot.slane (!%p180_p3), %v818_v11, %v828_v15  ;;  %v318_v26 = vrot.slane (!%p180_p3), %v823_v13, %v828_v15 }
   0xe   : > { %s935_s12 = smov (!%p221_p4, %s758_s12), 1  ;;  %v353_v27 = vrot.slane %v696_v14, %v828_v15  ;;  %v421_v28 = vrot.slane %v697_v16, %v828_v15  ;;  %v489_v29 = vrot.slane %v698_v17, %v828_v15  ;;  %v297_v30 = vrot.slane %v818_v11, %v836_v18 }
   0xf   : > { %s701_s16 = sshll.u32 %s935_s12, 5  ;;  %v322_v31 = vrot.slane %v823_v13, %v836_v18  ;;  %v854_v32 = vrot.slane %v696_v14, %v836_v18  ;;  %v857_v33 = vrot.slane %v697_v16, %v836_v18  ;;  %v860_v37 = vrot.slane %v698_v17, %v836_v18 }
  0x10   : > { %s228_s19 = scalar_lea.vmem %s926_s0, %s701_s16  ;;  %v301_v38 = vrot.slane %v818_v11, %v840_v21  ;;  %v326_v39 = vrot.slane %v823_v13, %v840_v21  ;;  %v867_v40 = vrot.slane %v696_v14, %v840_v21  ;;  %v870_v47 = vrot.slane %v697_v16, %v840_v21  ;;  %s249_s5 = scalar_lea.vmem %s929_s3, %s701_s16 }
  0x11   : > { %v255_v3 = vld [vmem:[%s228_s19] sm:$0xff]  ;;  %v256_v4 = vld [vmem:[%s228_s19 + $0x8] sm:$0xff]  ;;  %v257_v5 = vld [vmem:[%s228_s19 + $0x10] sm:$0xff]  ;;  %v873_v54 = vrot.slane %v698_v17, %v840_v21 }
  0x12   : > { %v263_v6 = vrot.slane %v255_v3, 5  ;;  %v264_v7 = vrot.slane %v256_v4, 5  ;;  %v265_v8 = vrot.slane %v257_v5, 5  ;;  %v258_v9 = vld [vmem:[%s228_s19 + $0x18] sm:$0xff] }
  0x13   : > { %v266_v10 = vrot.slane %v258_v9, 5 }
  0x14   : > { %271 = vst [vmem:[#allocation2] sm:$0xf8] %v263_v6  ;;  %275 = vst [vmem:[#allocation2 + $0x20] sm:$0x7] %v263_v6 }
  0x15   : > { %272 = vst [vmem:[#allocation2 + $0x8] sm:$0xf8] %v264_v7  ;;  %276 = vst [vmem:[#allocation2 + $0x28] sm:$0x7] %v264_v7 }
  0x16   : > { %273 = vst [vmem:[#allocation2 + $0x10] sm:$0xf8] %v265_v8  ;;  %277 = vst [vmem:[#allocation2 + $0x30] sm:$0x7] %v265_v8 }
  0x17   : > { %274 = vst [vmem:[#allocation2 + $0x18] sm:$0xf8] %v266_v10  ;;  %278 = vst [vmem:[#allocation2 + $0x38] sm:$0x7] %v266_v10 }
  0x1b   : > { %v280_v34 = vld [vmem:[#allocation2] sm:$0xff] }
  0x1c   : > { %v335_v35 = vld [vmem:[#allocation2] sm:$0xfe]  ;;  %v339_v36 = vld [vmem:[#allocation2 + $0x20] sm:$0x1]  ;;  %v306_v41 = vmul.f32 %v289_v19, %v280_v34  ;;  %v281_v52 = vld [vmem:[#allocation2 + $0x8] sm:$0xff] }
  0x1d   : > { %v366_v42 = vmul.f32 %v349_v22, %v335_v35  ;;  %v370_v43 = vmul.f32 %v349_v22, %v339_v36  ;;  %v403_v44 = vld [vmem:[#allocation2] sm:$0xfc]  ;;  %v407_v45 = vld [vmem:[#allocation2 + $0x20] sm:$0x3]  ;;  %v336_v53 = vld [vmem:[#allocation2 + $0x8] sm:$0xfe]  ;;  %v307_v0 = vmul.f32 %v293_v25, %v281_v52 }
  0x1e   : > { %v471_v46 = vld [vmem:[#allocation2] sm:$0xf8]  ;;  %v434_v48 = vmul.f32 %v417_v23, %v403_v44  ;;  %v438_v49 = vmul.f32 %v417_v23, %v407_v45  ;;  %v475_v50 = vld [vmem:[#allocation2 + $0x20] sm:$0x7]  ;;  %v331_v55 = vadd.f32 %v314_v20, %v306_v41  ;;  %v340_v59 = vld [vmem:[#allocation2 + $0x28] sm:$0x1]  ;;  %v367_v4 = vmul.f32 %v353_v27, %v336_v53 }
  0x1f   : > { %v502_v51 = vmul.f32 %v485_v24, %v471_v46  ;;  %v383_v56 = vrot.slane %v366_v42, 1  ;;  %v384_v57 = vrot.slane %v370_v43, 1  ;;  %v506_v58 = vmul.f32 %v485_v24, %v475_v50  ;;  %v404_v60 = vld [vmem:[#allocation2 + $0x8] sm:$0xfc]  ;;  %v408_v1 = vld [vmem:[#allocation2 + $0x28] sm:$0x3] }
  0x20   : > { %v451_v61 = vrot.slane %v434_v48, 2  ;;  %v452_v62 = vrot.slane %v438_v49, 2  ;;  %v371_v5 = vmul.f32 %v353_v27, %v340_v59  ;;  %v472_v6 = vld [vmem:[#allocation2 + $0x8] sm:$0xf8]  ;;  %v476_v7 = vld [vmem:[#allocation2 + $0x28] sm:$0x7]  ;;  %v332_v10 = vadd.f32 %v318_v26, %v307_v0 }
  0x21   : > { %v519_v63 = vrot.slane %v502_v51, 3  ;;  %v385_v2 = vsel %vm382_vm0, %v383_v56, %v384_v57  ;;  %v520_v3 = vrot.slane %v506_v58, 3  ;;  %v435_v12 = vmul.f32 %v421_v28, %v404_v60  ;;  %v282_v14 = vld [vmem:[#allocation2 + $0x10] sm:$0xff]  ;;  %v283_v51 = vld [vmem:[#allocation2 + $0x18] sm:$0xff] }
  0x22   : > { %v399_v8 = vadd.f32 %v385_v2, %v331_v55  ;;  %v453_v9 = vsel %vm450_vm1, %v451_v61, %v452_v62  ;;  %v337_v15 = vld [vmem:[#allocation2 + $0x10] sm:$0xfe]  ;;  %v386_v17 = vrot.slane %v367_v4, 1  ;;  %v387_v19 = vrot.slane %v371_v5, 1  ;;  %v341_v34 = vld [vmem:[#allocation2 + $0x30] sm:$0x1] }
  0x23   : > { %v521_v16 = vsel %vm518_vm2, %v519_v63, %v520_v3  ;;  %v439_v20 = vmul.f32 %v421_v28, %v408_v1  ;;  %v454_v23 = vrot.slane %v435_v12, 2  ;;  %v503_v24 = vmul.f32 %v489_v29, %v472_v6  ;;  %v405_v26 = vld [vmem:[#allocation2 + $0x10] sm:$0xfc]  ;;  %v409_v42 = vld [vmem:[#allocation2 + $0x30] sm:$0x3] }
  0x24   : > { %v467_v22 = vadd.f32 %v453_v9, %v399_v8  ;;  %v507_v25 = vmul.f32 %v489_v29, %v476_v7  ;;  %v388_v27 = vsel %vm382_vm0, %v386_v17, %v387_v19  ;;  %v308_v36 = vmul.f32 %v297_v30, %v282_v14  ;;  %v473_v48 = vld [vmem:[#allocation2 + $0x10] sm:$0xf8]  ;;  %v477_v28 = vld [vmem:[#allocation2 + $0x30] sm:$0x7]  ;;  %v338_v18 = vld [vmem:[#allocation2 + $0x18] sm:$0xfe] }
  0x25   : > { %v455_v35 = vrot.slane %v439_v20, 2  ;;  %v368_v41 = vmul.f32 %v854_v32, %v337_v15  ;;  %v400_v44 = vadd.f32 %v388_v27, %v332_v10  ;;  %v522_v45 = vrot.slane %v503_v24, 3  ;;  %v406_v0 = vld [vmem:[#allocation2 + $0x18] sm:$0xfc] }
  0x26   : > { %v880_v43 = vadd.f32 %v521_v16, %v467_v22  ;;  %v523_v46 = vrot.slane %v507_v25, 3  ;;  %v333_v29 = vadd.f32 %v322_v31, %v308_v36  ;;  %v372_v50 = vmul.f32 %v854_v32, %v341_v34  ;;  %v342_v31 = vld [vmem:[#allocation2 + $0x38] sm:$0x1]  ;;  %v474_v7 = vld [vmem:[#allocation2 + $0x18] sm:$0xf8] }
  0x27   : > { %v456_v49 = vsel %vm450_vm1, %v454_v23, %v455_v35  ;;  %v389_v30 = vrot.slane %v368_v41, 1  ;;  %v436_v56 = vmul.f32 %v857_v33, %v405_v26  ;;  %v440_v58 = vmul.f32 %v857_v33, %v409_v42  ;;  %v410_v33 = vld [vmem:[#allocation2 + $0x38] sm:$0x3] }
  0x28   : > { %v539_v52 = vsub.f32 0.0, %v880_v43  ;;  %v468_v53 = vadd.f32 %v456_v49, %v400_v44  ;;  %v524_v55 = vsel %vm518_vm2, %v522_v45, %v523_v46  ;;  %v390_v57 = vrot.slane %v372_v50, 1  ;;  %v478_v8 = vld [vmem:[#allocation2 + $0x38] sm:$0x7] }
  0x29   : > { %v504_v59 = vmul.f32 %v860_v37, %v473_v48  ;;  %v508_v60 = vmul.f32 %v860_v37, %v477_v28  ;;  %v457_v62 = vrot.slane %v436_v56, 2  ;;  %v309_v63 = vmul.f32 %v301_v38, %v283_v51 }
  0x2a   : > { %v543_v61 = vmul.f32 1.442695, %v539_v52  ;;  %v536_v32 = vadd.f32 %v524_v55, %v468_v53  ;;  %v391_v1 = vsel %vm382_vm0, %v389_v30, %v390_v57  ;;  %v458_v2 = vrot.slane %v440_v58, 2 }
  0x2b   : > { %v525_v3 = vrot.slane %v504_v59, 3  ;;  %v526_v4 = vrot.slane %v508_v60, 3  ;;  %v401_v6 = vadd.f32 %v391_v1, %v333_v29  ;;  %v334_v37 = vadd.f32 %v326_v39, %v309_v63 }
  0x2c   : > { %728 = vpow2.f32 %v543_v61  ;;  %v540_v5 = vsub.f32 0.0, %v536_v32  ;;  %v459_v9 = vsel %vm450_vm1, %v457_v62, %v458_v2  ;;  %v369_v38 = vmul.f32 %v867_v40, %v338_v18 }
  0x2d   : > { %v527_v11 = vsel %vm518_vm2, %v525_v3, %v526_v4  ;;  %v373_v10 = vmul.f32 %v867_v40, %v342_v31  ;;  %v469_v14 = vadd.f32 %v459_v9, %v401_v6  ;;  %v437_v15 = vmul.f32 %v870_v47, %v406_v0 }
  0x2e   : > { %v545_v12 = vmul.f32 1.442695, %v540_v5  ;;  %v441_v16 = vmul.f32 %v870_v47, %v410_v33  ;;  %v392_v17 = vrot.slane %v369_v38, 1  ;;  %v505_v13 = vmul.f32 %v873_v54, %v474_v7 }
  0x2f   : > { %v393_v19 = vrot.slane %v373_v10, 1  ;;  %v509_v21 = vmul.f32 %v873_v54, %v478_v8  ;;  %v537_v39 = vadd.f32 %v527_v11, %v469_v14  ;;  %v460_v20 = vrot.slane %v437_v15, 2 }
  0x30   : > { %730 = vpow2.f32 %v545_v12  ;;  %v461_v22 = vrot.slane %v441_v16, 2  ;;  %v528_v24 = vrot.slane %v505_v13, 3 }
  0x31   : > { %v394_v23 = vsel %vm382_vm0, %v392_v17, %v393_v19  ;;  %v529_v40 = vrot.slane %v509_v21, 3  ;;  %v541_v25 = vsub.f32 0.0, %v537_v39 }
  0x32   : > { %v402_v34 = vadd.f32 %v394_v23, %v334_v37  ;;  %v462_v27 = vsel %vm450_vm1, %v460_v20, %v461_v22 }
  0x33   : > { %v547_v35 = vmul.f32 1.442695, %v541_v25  ;;  %v530_v36 = vsel %vm518_vm2, %v528_v24, %v529_v40 }
  0x34   : > { %v470_v47 = vadd.f32 %v462_v27, %v402_v34 }
  0x35   : > { %732 = vpow2.f32 %v547_v35 }
  0x36   : > { %v729_v41 = vpop.eup %728  ;;  %v538_v54 = vadd.f32 %v530_v36, %v470_v47 }
  0x37   : > { %v551_v26 = vadd.f32 1.0, %v729_v41 }
  0x38   : > { %v542_v42 = vsub.f32 0.0, %v538_v54 }
  0x39   : > { %734 = vrcp.f32 %v551_v26 }
  0x3a   : > { %v731_v44 = vpop.eup %730  ;;  %v549_v45 = vmul.f32 1.442695, %v542_v42 }
  0x3b   : > { %v552_v46 = vadd.f32 1.0, %v731_v44 }
  0x3c   : > { %736 = vpow2.f32 %v549_v45 }
  0x3d   : > { %738 = vrcp.f32 %v552_v46 }
  0x3f   : > { %v733_v48 = vpop.eup %732 }
  0x40   : > { %v553_v28 = vadd.f32 1.0, %v733_v48 }
  0x42   : > { %740 = vrcp.f32 %v553_v28 }
  0x43   : > { %v735_v49 = vpop.eup %734 }
  0x44   : > { %v563_v29 = vmul.f32 %v735_v49, %v880_v43 }
  0x46   : > { %v737_v50 = vpop.eup %736  ;;  %567 = vst [vmem:[%s249_s5] sm:$0xff] %v563_v29 }
  0x47   : > { %v739_v30 = vpop.eup %738  ;;  %v554_v51 = vadd.f32 1.0, %v737_v50 }
  0x48   : > { %v564_v52 = vmul.f32 %v739_v30, %v536_v32 }
  0x49   : > { %742 = vrcp.f32 %v554_v51 }
  0x4a   : > { %568 = vst [vmem:[%s249_s5 + $0x8] sm:$0xff] %v564_v52 }
  0x4c   : > { %v741_v53 = vpop.eup %740 }
  0x4d   : > { %v565_v55 = vmul.f32 %v741_v53, %v537_v39 }
  0x4f   : > { %569 = vst [vmem:[%s249_s5 + $0x10] sm:$0xff] %v565_v55 }
  0x53   : > { %v743_v56 = vpop.eup %742 }
  0x54   : > { %v566_v57 = vmul.f32 %v743_v56, %v538_v54 }
  0x56   : > { %570 = vst [vmem:[%s249_s5 + $0x18] sm:$0xff] %v566_v57 }
  0x57 PF: > { %s13_s14 = sadd.s32 1, %s766_s14   ;;  %s930_s12 = smov %s762_s13 }
  0x58   : > { %p10_p5 = scmp.ge.s32.totalorder %s13_s14, 4   ;;  %s931_s13 = smov %s933_s15 }
  0x5a   :  { %12 = sbr.rel (!%p10_p5) target bundleno = 2 (0x2), region = 71 }

// kernel: mamba_bit_forward.25
= control target key start
LH: loop header
LB: loop body
LE: loop exit
PB: predicated region body
PF: predicated region fallthrough
CT: control target
= control target key end

     0   :  { %12 = vsyncpa [#allocation3], 0  ;;  %s518_s21 = smov [#allocation2]   ;;  %s742_s0 = inlined_call_operand.vmem [shape: f32[16,256], index: 0, kind: input, shape index: {}]   ;;  %s743_s1 = inlined_call_operand.vmem [shape: s8[256,512], index: 1, kind: input, shape index: {}]   ;;  %s744_s2 = inlined_call_operand.vmem [shape: f32[1,512], index: 2, kind: input, shape index: {}]   ;;  %s745_s3 = inlined_call_operand.hbm [shape: s8[256,512], index: 3, kind: input, shape index: {}]   ;;  %s746_s4 = inlined_call_operand.vmem [shape: f32[1,512], index: 4, kind: input, shape index: {}]   ;;  %s747_s5 = inlined_call_operand.vmem [shape: f32[16,512], index: 5, kind: output, shape index: {0}]   ;;  %s748_s6 = inlined_call_operand.vmem [shape: f32[16,512], index: 6, kind: output, shape index: {1}]  }
   0x1   :  { %s24_s22 = sshll.u32 %s518_s21, 4  ;;  %s494_s25 = scalar_lea.hbm %s745_s3, 4096  ;;  %s25_s22 = int_to_ptr.vmem [resolvable:$true] %s24_s22 }
   0x2   :  { %p495_p0 = scmp.ne.s32.totalorder %s745_s3, %s494_s25  ;;  %p498_p1 = scmp.lt.u32.totalorder %s494_s25, %s745_s3 }
   0x4   :  { %p500_p2 = pnand %p498_p1, %p495_p0 }
   0x6   :  { %503 = shalt.err (!%p500_p2)
}
   0x7   :  { %s504_s30 = scalar_lea.vmem %s25_s22, 4096  ;;  %p509_p4 = scmp.lt.s32.totalorder %s25_s22, %s25_s22 }
   0x8   :  { %p505_p3 = scmp.ne.s32.totalorder %s25_s22, %s504_s30  ;;  %p510_p5 = scmp.lt.s32.totalorder %s504_s30, %s504_s30 }
   0xa   :  { %p511_p6 = por %p510_p5, %p509_p4 }
   0xc   :  { %p512_p7 = pnand %p511_p6, %p505_p3 }
   0xe   :  { %515 = shalt.err (!%p512_p7)
}
   0xf   :  { %s519_s7 = smov 512   ;;  %s520_s8 = smov 32  }
  0x10   :  { %30 = dma.hbm_to_vmem [thread:$0]  %s745_s3, 4096, %s25_s22, [#allocation3], %s519_s7, %s519_s7, %s520_s8  }
  0x11   :  { %516 = dma.done.wait [#allocation3], 4096  }
  0x12   :  { %517 = vsyncadd [#allocation3], 4294963200  ;;  %v43_v0 = vld [vmem:[%s743_s1 + $0x8] sm:$0xff]  ;;  %v45_v1 = vld [vmem:[%s743_s1 + $0x18] sm:$0xff] }
  0x13   :  { %v42_v2 = vld [vmem:[%s743_s1] sm:$0xff]  ;;  %v75_v3 = vunpack.c.l.s8.bf16 %v43_v0  ;;  %v79_v4 = vunpack.c.h.s8.bf16 %v43_v0  ;;  %v77_v5 = vunpack.c.l.s8.bf16 %v45_v1  ;;  %v81_v6 = vunpack.c.h.s8.bf16 %v45_v1  ;;  %v44_v7 = vld [vmem:[%s743_s1 + $0x10] sm:$0xff]  ;;  %v47_v10 = vld [vmem:[%s743_s1 + $0x28] sm:$0xff] }
  0x14   :  { %v74_v8 = vunpack.c.l.s8.bf16 %v42_v2  ;;  %v76_v9 = vunpack.c.l.s8.bf16 %v44_v7  ;;  %v49_v11 = vld [vmem:[%s743_s1 + $0x38] sm:$0xff]  ;;  %v78_v12 = vunpack.c.h.s8.bf16 %v42_v2  ;;  %v80_v13 = vunpack.c.h.s8.bf16 %v44_v7  ;;  %v46_v16 = vld [vmem:[%s743_s1 + $0x20] sm:$0xff]  ;;  %v48_v17 = vld [vmem:[%s743_s1 + $0x30] sm:$0xff] }
  0x15   :  { %234 = vmatprep.subr.bf16.mxu0 %v75_v3  ;;  %277 = vmatprep.subr.bf16.mxu1 %v77_v5  ;;  %v83_v14 = vunpack.c.l.s8.bf16 %v47_v10  ;;  %v85_v15 = vunpack.c.l.s8.bf16 %v49_v11  ;;  %v82_v18 = vunpack.c.l.s8.bf16 %v46_v16  ;;  %v84_v19 = vunpack.c.l.s8.bf16 %v48_v17  ;;  %v51_v22 = vld [vmem:[%s743_s1 + $0x48] sm:$0xff]  ;;  %v53_v23 = vld [vmem:[%s743_s1 + $0x58] sm:$0xff]  ;;  %v50_v28 = vld [vmem:[%s743_s1 + $0x40] sm:$0xff] }
  0x16   :  { %235 = vmatpush1.bf16.msra.mxu0 %v74_v8  ;;  %278 = vmatpush1.bf16.msra.mxu1 %v76_v9  ;;  %v87_v20 = vunpack.c.h.s8.bf16 %v47_v10  ;;  %v89_v21 = vunpack.c.h.s8.bf16 %v49_v11  ;;  %v86_v24 = vunpack.c.h.s8.bf16 %v46_v16  ;;  %v88_v25 = vunpack.c.h.s8.bf16 %v48_v17  ;;  %v52_v29 = vld [vmem:[%s743_s1 + $0x50] sm:$0xff]  ;;  %v37_v30 = vld [vmem:[%s742_s0 + $0x8] sm:$0xff]  ;;  %v39_v31 = vld [vmem:[%s742_s0 + $0x18] sm:$0xff] }
  0x17   :  { %236 = vmatprep.subr.bf16.mxu0 %v79_v4  ;;  %279 = vmatprep.subr.bf16.mxu1 %v81_v6  ;;  %v91_v26 = vunpack.c.l.s8.bf16 %v51_v22  ;;  %v93_v27 = vunpack.c.l.s8.bf16 %v53_v23  ;;  %v90_v32 = vunpack.c.l.s8.bf16 %v50_v28  ;;  %v92_v33 = vunpack.c.l.s8.bf16 %v52_v29  ;;  %v55_v37 = vld [vmem:[%s743_s1 + $0x68] sm:$0xff]  ;;  %v57_v38 = vld [vmem:[%s743_s1 + $0x78] sm:$0xff]  ;;  %v54_v43 = vld [vmem:[%s743_s1 + $0x60] sm:$0xff] }
  0x18   :  { %v95_v34 = vunpack.c.h.s8.bf16 %v51_v22  ;;  %v97_v35 = vunpack.c.h.s8.bf16 %v53_v23  ;;  %v610_v36 = vpack.c.bf16 %v39_v31, %v37_v30  ;;  %v94_v39 = vunpack.c.h.s8.bf16 %v50_v28  ;;  %v56_v44 = vld [vmem:[%s743_s1 + $0x70] sm:$0xff]  ;;  %v59_v49 = vld [vmem:[%s743_s1 + $0x88] sm:$0xff]  ;;  %v61_v50 = vld [vmem:[%s743_s1 + $0x98] sm:$0xff] }
  0x19   :  { %v96_v40 = vunpack.c.h.s8.bf16 %v52_v29  ;;  %v99_v41 = vunpack.c.l.s8.bf16 %v55_v37  ;;  %v101_v42 = vunpack.c.l.s8.bf16 %v57_v38  ;;  %v98_v45 = vunpack.c.l.s8.bf16 %v54_v43  ;;  %v58_v55 = vld [vmem:[%s743_s1 + $0x80] sm:$0xff]  ;;  %v60_v56 = vld [vmem:[%s743_s1 + $0x90] sm:$0xff]  ;;  %v63_v61 = vld [vmem:[%s743_s1 + $0xa8] sm:$0xff] }
  0x1a   :  { %237 = vmatpush1.bf16.msra.mxu0 %v78_v12  ;;  %280 = vmatpush1.bf16.msra.mxu1 %v80_v13  ;;  %v100_v46 = vunpack.c.l.s8.bf16 %v56_v44  ;;  %v103_v47 = vunpack.c.h.s8.bf16 %v55_v37  ;;  %v105_v48 = vunpack.c.h.s8.bf16 %v57_v38  ;;  %v102_v51 = vunpack.c.h.s8.bf16 %v54_v43  ;;  %v65_v62 = vld [vmem:[%s743_s1 + $0xb8] sm:$0xff]  ;;  %v62_v3 = vld [vmem:[%s743_s1 + $0xa0] sm:$0xff]  ;;  %v64_v4 = vld [vmem:[%s743_s1 + $0xb0] sm:$0xff] }
  0x1b   :  { %238 = vmatprep.subr.bf16.mxu0 %v83_v14  ;;  %281 = vmatprep.subr.bf16.mxu1 %v85_v15  ;;  %v104_v52 = vunpack.c.h.s8.bf16 %v56_v44  ;;  %v107_v53 = vunpack.c.l.s8.bf16 %v59_v49  ;;  %v109_v54 = vunpack.c.l.s8.bf16 %v61_v50  ;;  %v106_v57 = vunpack.c.l.s8.bf16 %v58_v55  ;;  %v67_v9 = vld [vmem:[%s743_s1 + $0xc8] sm:$0xff]  ;;  %v69_v10 = vld [vmem:[%s743_s1 + $0xd8] sm:$0xff]  ;;  %v66_v15 = vld [vmem:[%s743_s1 + $0xc0] sm:$0xff] }
  0x1c   :  { %266 = vmatprep.mubr.bf16.mxu0 %v610_v36  ;;  %309 = vmatprep.mubr.bf16.mxu1 %v610_v36  ;;  %v108_v58 = vunpack.c.l.s8.bf16 %v60_v56  ;;  %v111_v59 = vunpack.c.h.s8.bf16 %v59_v49  ;;  %v113_v60 = vunpack.c.h.s8.bf16 %v61_v50  ;;  %v110_v63 = vunpack.c.h.s8.bf16 %v58_v55  ;;  %v68_v16 = vld [vmem:[%s743_s1 + $0xd0] sm:$0xff]  ;;  %v73_v22 = vld [vmem:[%s743_s1 + $0xf8] sm:$0xff]  ;;  %v36_v38 = vld [vmem:[%s742_s0] sm:$0xff] }
  0x1d   :  { %v112_v0 = vunpack.c.h.s8.bf16 %v60_v56  ;;  %v115_v1 = vunpack.c.l.s8.bf16 %v63_v61  ;;  %v117_v2 = vunpack.c.l.s8.bf16 %v65_v62  ;;  %v114_v5 = vunpack.c.l.s8.bf16 %v62_v3  ;;  %v72_v28 = vld [vmem:[%s743_s1 + $0xf0] sm:$0xff]  ;;  %v143_v49 = vld [vmem:[#allocation2 + $0x28] sm:$0xff]  ;;  %v145_v50 = vld [vmem:[#allocation2 + $0x38] sm:$0xff] }
  0x1e   :  { %239 = vmatpush1.bf16.msra.mxu0 %v82_v18  ;;  %282 = vmatpush1.bf16.msra.mxu1 %v84_v19  ;;  %v116_v6 = vunpack.c.l.s8.bf16 %v64_v4  ;;  %v119_v7 = vunpack.c.h.s8.bf16 %v63_v61  ;;  %v121_v8 = vunpack.c.h.s8.bf16 %v65_v62  ;;  %v118_v11 = vunpack.c.h.s8.bf16 %v62_v3  ;;  %v140_v43 = vld [vmem:[#allocation2 + $0x10] sm:$0xff]  ;;  %v142_v55 = vld [vmem:[#allocation2 + $0x20] sm:$0xff]  ;;  %v147_v61 = vld [vmem:[#allocation2 + $0x48] sm:$0xff] }
  0x1f   :  { %240 = vmatprep.subr.bf16.mxu0 %v87_v20  ;;  %283 = vmatprep.subr.bf16.mxu1 %v89_v21  ;;  %v120_v12 = vunpack.c.h.s8.bf16 %v64_v4  ;;  %v123_v13 = vunpack.c.l.s8.bf16 %v67_v9  ;;  %v125_v14 = vunpack.c.l.s8.bf16 %v69_v10  ;;  %v122_v17 = vunpack.c.l.s8.bf16 %v66_v15  ;;  %v71_v21 = vld [vmem:[%s743_s1 + $0xe8] sm:$0xff]  ;;  %v144_v56 = vld [vmem:[#allocation2 + $0x30] sm:$0xff]  ;;  %v149_v62 = vld [vmem:[#allocation2 + $0x58] sm:$0xff] }
  0x20   :  { %v124_v18 = vunpack.c.l.s8.bf16 %v68_v16  ;;  %v127_v19 = vunpack.c.h.s8.bf16 %v67_v9  ;;  %v129_v20 = vunpack.c.h.s8.bf16 %v69_v10  ;;  %v126_v23 = vunpack.c.h.s8.bf16 %v66_v15  ;;  %v146_v3 = vld [vmem:[#allocation2 + $0x40] sm:$0xff]  ;;  %v153_v9 = vld [vmem:[#allocation2 + $0x78] sm:$0xff]  ;;  %v152_v15 = vld [vmem:[#allocation2 + $0x70] sm:$0xff] }
  0x21   :  { %v132_v30 = vunpack.c.l.s8.bf16 %v72_v28  ;;  %v135_v31 = vunpack.c.h.s8.bf16 %v71_v21  ;;  %v136_v37 = vunpack.c.h.s8.bf16 %v72_v28  ;;  %v186_v4 = vunpack.c.l.s8.bf16 %v146_v3 }
  0x22   :  { %241 = vmatpush1.bf16.msra.mxu0 %v86_v24  ;;  %284 = vmatpush1.bf16.msra.mxu1 %v88_v25  ;;  %v128_v24 = vunpack.c.h.s8.bf16 %v68_v16  ;;  %v131_v25 = vunpack.c.l.s8.bf16 %v71_v21  ;;  %v190_v10 = vunpack.c.h.s8.bf16 %v146_v3  ;;  %v157_v21 = vld [vmem:[#allocation2 + $0x98] sm:$0xff] }
  0x23   :  { %242 = vmatprep.subr.bf16.mxu0 %v91_v26  ;;  %285 = vmatprep.subr.bf16.mxu1 %v93_v27  ;;  %v133_v26 = vunpack.c.l.s8.bf16 %v73_v22  ;;  %v70_v27 = vld [vmem:[%s743_s1 + $0xe0] sm:$0xff] }
  0x24   :  { %v130_v29 = vunpack.c.l.s8.bf16 %v70_v27 }
  0x26   :  { %243 = vmatpush1.bf16.msra.mxu0 %v90_v32  ;;  %286 = vmatpush1.bf16.msra.mxu1 %v92_v33  ;;  %v137_v32 = vunpack.c.h.s8.bf16 %v73_v22  ;;  %v139_v33 = vld [vmem:[#allocation2 + $0x8] sm:$0xff] }
  0x27   :  { %244 = vmatprep.subr.bf16.mxu0 %v95_v34  ;;  %287 = vmatprep.subr.bf16.mxu1 %v97_v35  ;;  %v141_v34 = vld [vmem:[#allocation2 + $0x18] sm:$0xff]  ;;  %v134_v35 = vunpack.c.h.s8.bf16 %v70_v27  ;;  %v156_v27 = vld [vmem:[#allocation2 + $0x90] sm:$0xff] }
  0x2a   :  { %245 = vmatpush1.bf16.msra.mxu0 %v94_v39  ;;  %288 = vmatpush1.bf16.msra.mxu1 %v96_v40  ;;  %v38_v39 = vld [vmem:[%s742_s0 + $0x10] sm:$0xff]  ;;  %v171_v40 = vunpack.c.l.s8.bf16 %v139_v33 }
  0x2b   :  { %246 = vmatprep.subr.bf16.mxu0 %v99_v41  ;;  %289 = vmatprep.subr.bf16.mxu1 %v101_v42  ;;  %v173_v41 = vunpack.c.l.s8.bf16 %v141_v34  ;;  %v138_v42 = vld [vmem:[#allocation2] sm:$0xff]  ;;  %v680_v44 = vpack.c.bf16 %v38_v39, %v36_v38 }
  0x2c   :  { %v158_v39 = vld [vmem:[#allocation2 + $0xa0] sm:$0xff] }
  0x2e   :  { %247 = vmatpush1.bf16.msra.mxu0 %v98_v45  ;;  %290 = vmatpush1.bf16.msra.mxu1 %v100_v46  ;;  %v170_v45 = vunpack.c.l.s8.bf16 %v138_v42  ;;  %v172_v46 = vunpack.c.l.s8.bf16 %v140_v43 }
  0x2f   :  { %248 = vmatprep.subr.bf16.mxu0 %v103_v47  ;;  %291 = vmatprep.subr.bf16.mxu1 %v105_v48  ;;  %v175_v47 = vunpack.c.h.s8.bf16 %v139_v33  ;;  %v177_v48 = vunpack.c.h.s8.bf16 %v141_v34  ;;  %v161_v33 = vld [vmem:[#allocation2 + $0xb8] sm:$0xff] }
  0x30   :  { %v213_v38 = vunpack.c.l.s8.bf16 %v161_v33 }
  0x32   :  { %249 = vmatpush1.bf16.msra.mxu0 %v102_v51  ;;  %292 = vmatpush1.bf16.msra.mxu1 %v104_v52  ;;  %v174_v51 = vunpack.c.h.s8.bf16 %v138_v42  ;;  %v176_v52 = vunpack.c.h.s8.bf16 %v140_v43 }
  0x33   :  { %250 = vmatprep.subr.bf16.mxu0 %v107_v53  ;;  %293 = vmatprep.subr.bf16.mxu1 %v109_v54  ;;  %v179_v53 = vunpack.c.l.s8.bf16 %v143_v49  ;;  %v181_v54 = vunpack.c.l.s8.bf16 %v145_v50 }
  0x36   :  { %251 = vmatpush1.bf16.msra.mxu0 %v106_v57  ;;  %294 = vmatpush1.bf16.msra.mxu1 %v108_v58  ;;  %v178_v57 = vunpack.c.l.s8.bf16 %v142_v55  ;;  %v180_v58 = vunpack.c.l.s8.bf16 %v144_v56 }
  0x37   :  { %252 = vmatprep.subr.bf16.mxu0 %v111_v59  ;;  %295 = vmatprep.subr.bf16.mxu1 %v113_v60  ;;  %v183_v59 = vunpack.c.h.s8.bf16 %v143_v49  ;;  %v185_v60 = vunpack.c.h.s8.bf16 %v145_v50 }
  0x3a   :  { %253 = vmatpush1.bf16.msra.mxu0 %v110_v63  ;;  %296 = vmatpush1.bf16.msra.mxu1 %v112_v0  ;;  %v182_v63 = vunpack.c.h.s8.bf16 %v142_v55  ;;  %v184_v0 = vunpack.c.h.s8.bf16 %v144_v56 }
  0x3b   :  { %254 = vmatprep.subr.bf16.mxu0 %v115_v1  ;;  %297 = vmatprep.subr.bf16.mxu1 %v117_v2  ;;  %v187_v1 = vunpack.c.l.s8.bf16 %v147_v61  ;;  %v189_v2 = vunpack.c.l.s8.bf16 %v149_v62 }
  0x3e   :  { %255 = vmatpush1.bf16.msra.mxu0 %v114_v5  ;;  %298 = vmatpush1.bf16.msra.mxu1 %v116_v6  ;;  %v191_v6 = vunpack.c.h.s8.bf16 %v147_v61 }
  0x3f   :  { %256 = vmatprep.subr.bf16.mxu0 %v119_v7  ;;  %299 = vmatprep.subr.bf16.mxu1 %v121_v8  ;;  %v193_v7 = vunpack.c.h.s8.bf16 %v149_v62  ;;  %v151_v8 = vld [vmem:[#allocation2 + $0x68] sm:$0xff] }
  0x42   :  { %257 = vmatpush1.bf16.msra.mxu0 %v118_v11  ;;  %300 = vmatpush1.bf16.msra.mxu1 %v120_v12  ;;  %v195_v12 = vunpack.c.l.s8.bf16 %v151_v8 }
  0x43   :  { %258 = vmatprep.subr.bf16.mxu0 %v123_v13  ;;  %301 = vmatprep.subr.bf16.mxu1 %v125_v14  ;;  %v197_v13 = vunpack.c.l.s8.bf16 %v153_v9  ;;  %v150_v14 = vld [vmem:[#allocation2 + $0x60] sm:$0xff] }
  0x44   :  { %v194_v16 = vunpack.c.l.s8.bf16 %v150_v14  ;;  %v198_v22 = vunpack.c.h.s8.bf16 %v150_v14 }
  0x46   :  { %259 = vmatpush1.bf16.msra.mxu0 %v122_v17  ;;  %302 = vmatpush1.bf16.msra.mxu1 %v124_v18  ;;  %v196_v17 = vunpack.c.l.s8.bf16 %v152_v15  ;;  %v199_v18 = vunpack.c.h.s8.bf16 %v151_v8 }
  0x47   :  { %260 = vmatprep.subr.bf16.mxu0 %v127_v19  ;;  %303 = vmatprep.subr.bf16.mxu1 %v129_v20  ;;  %v201_v19 = vunpack.c.h.s8.bf16 %v153_v9  ;;  %v155_v20 = vld [vmem:[#allocation2 + $0x88] sm:$0xff] }
  0x4a   :  { %261 = vmatpush1.bf16.msra.mxu0 %v126_v23  ;;  %304 = vmatpush1.bf16.msra.mxu1 %v128_v24  ;;  %v200_v23 = vunpack.c.h.s8.bf16 %v152_v15  ;;  %v203_v24 = vunpack.c.l.s8.bf16 %v155_v20 }
  0x4b   :  { %262 = vmatprep.subr.bf16.mxu0 %v131_v25  ;;  %305 = vmatprep.subr.bf16.mxu1 %v133_v26  ;;  %v205_v25 = vunpack.c.l.s8.bf16 %v157_v21  ;;  %v154_v26 = vld [vmem:[#allocation2 + $0x80] sm:$0xff] }
  0x4c   :  { %v202_v28 = vunpack.c.l.s8.bf16 %v154_v26  ;;  %v206_v34 = vunpack.c.h.s8.bf16 %v154_v26 }
  0x4e   :  { %263 = vmatpush1.bf16.msra.mxu0 %v130_v29  ;;  %306 = vmatpush1.bf16.msra.mxu1 %v132_v30  ;;  %v204_v29 = vunpack.c.l.s8.bf16 %v156_v27  ;;  %v207_v30 = vunpack.c.h.s8.bf16 %v155_v20 }
  0x4f   :  { %264 = vmatprep.subr.bf16.mxu0 %v135_v31  ;;  %307 = vmatprep.subr.bf16.mxu1 %v137_v32  ;;  %v209_v31 = vunpack.c.h.s8.bf16 %v157_v21  ;;  %v159_v32 = vld [vmem:[#allocation2 + $0xa8] sm:$0xff] }
  0x50   :  { %v215_v43 = vunpack.c.h.s8.bf16 %v159_v32 }
  0x52   :  { %265 = vmatpush1.bf16.msra.mxu0 %v134_v35  ;;  %308 = vmatpush1.bf16.msra.mxu1 %v136_v37  ;;  %v208_v35 = vunpack.c.h.s8.bf16 %v156_v27  ;;  %v211_v37 = vunpack.c.l.s8.bf16 %v159_v32 }
  0x53   :  { %358 = vmatprep.subr.bf16.mxu0 %v171_v40  ;;  %401 = vmatprep.subr.bf16.mxu1 %v173_v41  ;;  %v160_v40 = vld [vmem:[#allocation2 + $0xb0] sm:$0xff]  ;;  %v210_v41 = vunpack.c.l.s8.bf16 %v158_v39 }
  0x54   :  { %v212_v42 = vunpack.c.l.s8.bf16 %v160_v40  ;;  %v216_v49 = vunpack.c.h.s8.bf16 %v160_v40 }
  0x55   :  { %267 = vmatmul.mubr.bf16.vlgmr.msra.gmra.mrb[0].mxu0 %v680_v44  ;;  %310 = vmatmul.mubr.bf16.vlgmr.msra.gmra.mrb[0].mxu1 %v680_v44 }
  0x56   :  { %359 = vmatpush1.bf16.msra.mxu0 %v170_v45  ;;  %402 = vmatpush1.bf16.msra.mxu1 %v172_v46  ;;  %v217_v45 = vunpack.c.h.s8.bf16 %v161_v33  ;;  %v163_v46 = vld [vmem:[#allocation2 + $0xc8] sm:$0xff]  ;;  %v444_v33 = vld [vmem:[%s746_s4] sm:$0xf] }
  0x57   :  { %360 = vmatprep.subr.bf16.mxu0 %v175_v47  ;;  %403 = vmatprep.subr.bf16.mxu1 %v177_v48  ;;  %v165_v47 = vld [vmem:[#allocation2 + $0xd8] sm:$0xff]  ;;  %v214_v48 = vunpack.c.h.s8.bf16 %v158_v39  ;;  %v219_v50 = vunpack.c.l.s8.bf16 %v163_v46  ;;  %v223_v56 = vunpack.c.h.s8.bf16 %v163_v46 }
  0x58   :  { %390 = vmatprep.mubr.bf16.mxu0 %v610_v36  ;;  %433 = vmatprep.mubr.bf16.mxu1 %v610_v36  ;;  %v148_v36 = vld [vmem:[#allocation2 + $0x50] sm:$0xff] }
  0x59   :  { %v188_v5 = vunpack.c.l.s8.bf16 %v148_v36  ;;  %v192_v11 = vunpack.c.h.s8.bf16 %v148_v36 }
  0x5a   :  { %361 = vmatpush1.bf16.msra.mxu0 %v174_v51  ;;  %404 = vmatpush1.bf16.msra.mxu1 %v176_v52  ;;  %v221_v51 = vunpack.c.l.s8.bf16 %v165_v47  ;;  %v162_v52 = vld [vmem:[#allocation2 + $0xc0] sm:$0xff] }
  0x5b   :  { %362 = vmatprep.subr.bf16.mxu0 %v179_v53  ;;  %405 = vmatprep.subr.bf16.mxu1 %v181_v54  ;;  %v164_v53 = vld [vmem:[#allocation2 + $0xd0] sm:$0xff]  ;;  %v218_v54 = vunpack.c.l.s8.bf16 %v162_v52 }
  0x5c   :  { %v220_v55 = vunpack.c.l.s8.bf16 %v164_v53  ;;  %v224_v61 = vunpack.c.h.s8.bf16 %v164_v53 }
  0x5e   :  { %363 = vmatpush1.bf16.msra.mxu0 %v178_v57  ;;  %406 = vmatpush1.bf16.msra.mxu1 %v180_v58  ;;  %v225_v57 = vunpack.c.h.s8.bf16 %v165_v47  ;;  %v167_v58 = vld [vmem:[#allocation2 + $0xe8] sm:$0xff] }
  0x5f   :  { %364 = vmatprep.subr.bf16.mxu0 %v183_v59  ;;  %407 = vmatprep.subr.bf16.mxu1 %v185_v60  ;;  %v169_v59 = vld [vmem:[#allocation2 + $0xf8] sm:$0xff]  ;;  %v222_v60 = vunpack.c.h.s8.bf16 %v162_v52  ;;  %v227_v62 = vunpack.c.l.s8.bf16 %v167_v58  ;;  %v231_v36 = vunpack.c.h.s8.bf16 %v167_v58 }
  0x62   :  { %365 = vmatpush1.bf16.msra.mxu0 %v182_v63  ;;  %408 = vmatpush1.bf16.msra.mxu1 %v184_v0  ;;  %v229_v63 = vunpack.c.l.s8.bf16 %v169_v59  ;;  %v166_v0 = vld [vmem:[#allocation2 + $0xe0] sm:$0xff] }
  0x63   :  { %366 = vmatprep.subr.bf16.mxu0 %v187_v1  ;;  %409 = vmatprep.subr.bf16.mxu1 %v189_v2  ;;  %v168_v1 = vld [vmem:[#allocation2 + $0xf0] sm:$0xff]  ;;  %v226_v2 = vunpack.c.l.s8.bf16 %v166_v0 }
  0x64   :  { %v228_v3 = vunpack.c.l.s8.bf16 %v168_v1 }
  0x66   :  { %367 = vmatpush1.bf16.msra.mxu0 %v186_v4  ;;  %410 = vmatpush1.bf16.msra.mxu1 %v188_v5  ;;  %v233_v4 = vunpack.c.h.s8.bf16 %v169_v59  ;;  %v230_v5 = vunpack.c.h.s8.bf16 %v166_v0 }
  0x67   :  { %368 = vmatprep.subr.bf16.mxu0 %v191_v6  ;;  %411 = vmatprep.subr.bf16.mxu1 %v193_v7  ;;  %v232_v6 = vunpack.c.h.s8.bf16 %v168_v1  ;;  %v322_v7 = vlaneseq }
  0x69   :  { %v323_v8 = vshrl.u32 %v322_v7, 7 }
  0x6a   :  { %369 = vmatpush1.bf16.msra.mxu0 %v190_v10  ;;  %412 = vmatpush1.bf16.msra.mxu1 %v192_v11  ;;  %v320_v11 = vld [vmem:[%s744_s2] sm:$0xf] }
  0x6b   :  { %370 = vmatprep.subr.bf16.mxu0 %v195_v12  ;;  %413 = vmatprep.subr.bf16.mxu1 %v197_v13  ;;  %v324_v9 = vsub.s32 0, %v323_v8  ;;  %v332_v10 = vsub.s32 2, %v323_v8  ;;  %v328_v12 = vsub.s32 1, %v323_v8  ;;  %v336_v13 = vsub.s32 3, %v323_v8 }
  0x6d   :  { %v325_v14 = vrot.slane %v320_v11, %v324_v9  ;;  %v333_v15 = vrot.slane %v320_v11, %v332_v10 }
  0x6e   :  { %371 = vmatpush1.bf16.msra.mxu0 %v194_v16  ;;  %414 = vmatpush1.bf16.msra.mxu1 %v196_v17  ;;  %v329_v16 = vrot.slane %v320_v11, %v328_v12  ;;  %v337_v17 = vrot.slane %v320_v11, %v336_v13 }
  0x6f   :  { %372 = vmatprep.subr.bf16.mxu0 %v199_v18  ;;  %415 = vmatprep.subr.bf16.mxu1 %v201_v19 }
  0x72   :  { %373 = vmatpush1.bf16.msra.mxu0 %v198_v22  ;;  %416 = vmatpush1.bf16.msra.mxu1 %v200_v23 }
  0x73   :  { %374 = vmatprep.subr.bf16.mxu0 %v203_v24  ;;  %417 = vmatprep.subr.bf16.mxu1 %v205_v25 }
  0x76   :  { %375 = vmatpush1.bf16.msra.mxu0 %v202_v28  ;;  %418 = vmatpush1.bf16.msra.mxu1 %v204_v29 }
  0x77   :  { %376 = vmatprep.subr.bf16.mxu0 %v207_v30  ;;  %419 = vmatprep.subr.bf16.mxu1 %v209_v31 }
  0x7a   :  { %377 = vmatpush1.bf16.msra.mxu0 %v206_v34  ;;  %420 = vmatpush1.bf16.msra.mxu1 %v208_v35  ;;  %v449_v34 = vrot.slane %v444_v33, %v324_v9  ;;  %v457_v35 = vrot.slane %v444_v33, %v332_v10 }
  0x7b   :  { %378 = vmatprep.subr.bf16.mxu0 %v211_v37  ;;  %421 = vmatprep.subr.bf16.mxu1 %v213_v38  ;;  %v453_v37 = vrot.slane %v444_v33, %v328_v12  ;;  %v461_v38 = vrot.slane %v444_v33, %v336_v13 }
  0x7e   :  { %379 = vmatpush1.bf16.msra.mxu0 %v210_v41  ;;  %422 = vmatpush1.bf16.msra.mxu1 %v212_v42 }
  0x7f   :  { %380 = vmatprep.subr.bf16.mxu0 %v215_v43  ;;  %423 = vmatprep.subr.bf16.mxu1 %v217_v45 }
  0x82   :  { %381 = vmatpush1.bf16.msra.mxu0 %v214_v48  ;;  %424 = vmatpush1.bf16.msra.mxu1 %v216_v49 }
  0x83   :  { %382 = vmatprep.subr.bf16.mxu0 %v219_v50  ;;  %425 = vmatprep.subr.bf16.mxu1 %v221_v51 }
  0x86   :  { %383 = vmatpush1.bf16.msra.mxu0 %v218_v54  ;;  %426 = vmatpush1.bf16.msra.mxu1 %v220_v55 }
  0x87   :  { %384 = vmatprep.subr.bf16.mxu0 %v223_v56  ;;  %427 = vmatprep.subr.bf16.mxu1 %v225_v57 }
  0x8a   :  { %385 = vmatpush1.bf16.msra.mxu0 %v222_v60  ;;  %428 = vmatpush1.bf16.msra.mxu1 %v224_v61 }
  0x8b   :  { %386 = vmatprep.subr.bf16.mxu0 %v227_v62  ;;  %429 = vmatprep.subr.bf16.mxu1 %v229_v63 }
  0x8e   :  { %387 = vmatpush1.bf16.msra.mxu0 %v226_v2  ;;  %430 = vmatpush1.bf16.msra.mxu1 %v228_v3 }
  0x8f   :  { %388 = vmatprep.subr.bf16.mxu0 %v231_v36  ;;  %431 = vmatprep.subr.bf16.mxu1 %v233_v4 }
  0x92   :  { %389 = vmatpush1.bf16.msra.mxu0 %v230_v5  ;;  %432 = vmatpush1.bf16.msra.mxu1 %v232_v6 }
  0x95   :  { %391 = vmatmul.mubr.bf16.vlgmr.msra.gmra.mrb[4].mxu0 %v680_v44  ;;  %434 = vmatmul.mubr.bf16.vlgmr.msra.gmra.mrb[4].mxu1 %v680_v44 }
 0x128   :  { %v268_v18 = vpop.f32.mrb[0].mxu0  ;;  %v311_v19 = vpop.f32.mrb[0].mxu1 }
 0x129   :  { %v342_v20 = vmul.f32 %v325_v14, %v268_v18  ;;  %v344_v21 = vmul.f32 %v333_v15, %v311_v19  ;;  %v270_v22 = vpop.f32.mrb[1].mxu0  ;;  %v313_v44 = vpop.f32.mrb[1].mxu1 }
 0x12a   :  { %v343_v23 = vmul.f32 %v329_v16, %v270_v22  ;;  %v345_v24 = vmul.f32 %v337_v17, %v313_v44  ;;  %v272_v25 = vpop.f32.mrb[2].mxu0  ;;  %v315_v26 = vpop.f32.mrb[2].mxu1 }
 0x12b   :  { %350 = vst [vmem:[%s747_s5] sm:$0xff] %v342_v20  ;;  %352 = vst [vmem:[%s747_s5 + $0x10] sm:$0xff] %v344_v21  ;;  %v346_v27 = vmul.f32 %v325_v14, %v272_v25  ;;  %v348_v28 = vmul.f32 %v333_v15, %v315_v26  ;;  %v274_v29 = vpop.f32.mrb[3].mxu0  ;;  %v317_v30 = vpop.f32.mrb[3].mxu1 }
 0x12c   :  { %351 = vst [vmem:[%s747_s5 + $0x8] sm:$0xff] %v343_v23  ;;  %353 = vst [vmem:[%s747_s5 + $0x18] sm:$0xff] %v345_v24  ;;  %v347_v31 = vmul.f32 %v329_v16, %v274_v29  ;;  %v349_v32 = vmul.f32 %v337_v17, %v317_v30 }
 0x12d   :  { %354 = vst [vmem:[%s747_s5 + $0x20] sm:$0xff] %v346_v27  ;;  %356 = vst [vmem:[%s747_s5 + $0x30] sm:$0xff] %v348_v28 }
 0x12e   :  { %355 = vst [vmem:[%s747_s5 + $0x28] sm:$0xff] %v347_v31  ;;  %357 = vst [vmem:[%s747_s5 + $0x38] sm:$0xff] %v349_v32 }
 0x168   :  { %v392_v39 = vpop.f32.mrb[4].mxu0  ;;  %v435_v40 = vpop.f32.mrb[4].mxu1 }
 0x169   :  { %v466_v41 = vmul.f32 %v449_v34, %v392_v39  ;;  %v468_v42 = vmul.f32 %v457_v35, %v435_v40  ;;  %v394_v43 = vpop.f32.mrb[5].mxu0  ;;  %v437_v45 = vpop.f32.mrb[5].mxu1 }
 0x16a   :  { %v467_v46 = vmul.f32 %v453_v37, %v394_v43  ;;  %v469_v47 = vmul.f32 %v461_v38, %v437_v45  ;;  %v396_v48 = vpop.f32.mrb[6].mxu0  ;;  %v439_v49 = vpop.f32.mrb[6].mxu1 }
 0x16b   :  { %474 = vst [vmem:[%s748_s6] sm:$0xff] %v466_v41  ;;  %476 = vst [vmem:[%s748_s6 + $0x10] sm:$0xff] %v468_v42  ;;  %v470_v50 = vmul.f32 %v449_v34, %v396_v48  ;;  %v472_v51 = vmul.f32 %v457_v35, %v439_v49  ;;  %v398_v52 = vpop.f32.mrb[7].mxu0  ;;  %v441_v53 = vpop.f32.mrb[7].mxu1 }
 0x16c   :  { %475 = vst [vmem:[%s748_s6 + $0x8] sm:$0xff] %v467_v46  ;;  %477 = vst [vmem:[%s748_s6 + $0x18] sm:$0xff] %v469_v47  ;;  %v471_v54 = vmul.f32 %v453_v37, %v398_v52  ;;  %v473_v55 = vmul.f32 %v461_v38, %v441_v53 }
 0x16d   :  { %478 = vst [vmem:[%s748_s6 + $0x20] sm:$0xff] %v470_v50  ;;  %480 = vst [vmem:[%s748_s6 + $0x30] sm:$0xff] %v472_v51 }
 0x16e   :  { %479 = vst [vmem:[%s748_s6 + $0x28] sm:$0xff] %v471_v54  ;;  %481 = vst [vmem:[%s748_s6 + $0x38] sm:$0xff] %v473_v55 }
 0x16f   :  { %490 = vsyncpa [#allocation3], 1 }

// kernel: mamba_bit_forward.28
= control target key start
LH: loop header
LB: loop body
LE: loop exit
PB: predicated region body
PF: predicated region fallthrough
CT: control target
= control target key end

     0   :  { %v179_v1 = vmov 0   ;;  %vm64_vm0 = vcmask 130048   ;;  %v24_v8 = vlaneseq  ;;  %s245_s1 = inlined_call_operand.vmem [shape: bf16[16,512], index: 1, kind: input, shape index: {}]   ;;  %s246_s0 = inlined_call_operand.vmem [shape: f32[16,16], index: 0, kind: input, shape index: {}]   ;;  %s247_s2 = inlined_call_operand.vmem [shape: f32[1,512], index: 2, kind: input, shape index: {}]   ;;  %s248_s3 = inlined_call_operand.vmem [shape: f32[16,512], index: 3, kind: output, shape index: {}]  }
   0x1   :  { %v173_v0 = vld [vmem:[%s245_s1 + $0x4] ss:$16 sps:$4 sm:$0xff]   ;;  %100 = vmatprep.mubr.bf16.mxu0 %v179_v1  ;;  %143 = vmatprep.mubr.bf16.mxu1 %v179_v1  ;;  %v175_v2 = vld [vmem:[%s245_s1 + $0xc] ss:$16 sps:$4 sm:$0xff]   ;;  %v177_v3 = vld [vmem:[%s245_s1] ss:$16 sps:$4 sm:$0xff]  }
   0x2   :  { %68 = vmatprep.subr.bf16.mxu0 %v173_v0  ;;  %v178_v4 = vld [vmem:[%s245_s1 + $0x8] ss:$16 sps:$4 sm:$0xff]   ;;  %v15_v5 = vld [vmem:[%s246_s0] sm:$0xff]  ;;  %111 = vmatprep.subr.bf16.mxu1 %v175_v2  ;;  %v25_v9 = vshrl.u32 %v24_v8, 7 }
   0x3   :  { %v16_v6 = vld [vmem:[%s246_s0 + $0x8] sm:$0xff]  ;;  %69 = vmatpush1.bf16.msra.mxu0 %v177_v3  ;;  %112 = vmatpush1.bf16.msra.mxu1 %v178_v4  ;;  %v22_v12 = vld [vmem:[%s247_s2] sm:$0xf] }
   0x4   :  { %v17_v7 = vpack.c.bf16 %v16_v6, %v15_v5  ;;  %v26_v10 = vsub.s32 0, %v25_v9  ;;  %v34_v11 = vsub.s32 2, %v25_v9  ;;  %v30_v13 = vsub.s32 1, %v25_v9 }
   0x5   :  { %v38_v14 = vsub.s32 3, %v25_v9 }
   0x6   :  { %170 = vmatmul.mubr.msk.bf16.vlgmr.msra.gmra.mrb[0].mxu0 %vm64_vm0, %v17_v7  ;;  %171 = vmatmul.mubr.msk.bf16.vlgmr.msra.gmra.mrb[0].mxu1 %vm64_vm0, %v17_v7  ;;  %v27_v15 = vrot.slane %v22_v12, %v26_v10  ;;  %v35_v16 = vrot.slane %v22_v12, %v34_v11  ;;  %v31_v17 = vrot.slane %v22_v12, %v30_v13 }
   0x7   :  { %v39_v18 = vrot.slane %v22_v12, %v38_v14 }
  0xd9   :  { %v102_v19 = vpop.f32.mrb[0].mxu0  ;;  %v145_v20 = vpop.f32.mrb[0].mxu1 }
  0xda   :  { %v103_v21 = vadd.f32 %v102_v19, %v27_v15  ;;  %v146_v22 = vadd.f32 %v145_v20, %v35_v16  ;;  %v104_v23 = vpop.f32.mrb[1].mxu0  ;;  %v147_v24 = vpop.f32.mrb[1].mxu1 }
  0xdb   :  { %v105_v25 = vadd.f32 %v104_v23, %v31_v17  ;;  %v148_v26 = vadd.f32 %v147_v24, %v39_v18  ;;  %v106_v27 = vpop.f32.mrb[2].mxu0  ;;  %v149_v28 = vpop.f32.mrb[2].mxu1 }
  0xdc   :  { %154 = vst [vmem:[%s248_s3] sm:$0xff] %v103_v21  ;;  %156 = vst [vmem:[%s248_s3 + $0x10] sm:$0xff] %v146_v22  ;;  %v107_v29 = vadd.f32 %v106_v27, %v27_v15  ;;  %v150_v30 = vadd.f32 %v149_v28, %v35_v16  ;;  %v108_v31 = vpop.f32.mrb[3].mxu0  ;;  %v151_v32 = vpop.f32.mrb[3].mxu1 }
  0xdd   :  { %155 = vst [vmem:[%s248_s3 + $0x8] sm:$0xff] %v105_v25  ;;  %157 = vst [vmem:[%s248_s3 + $0x18] sm:$0xff] %v148_v26  ;;  %v109_v33 = vadd.f32 %v108_v31, %v31_v17  ;;  %v152_v34 = vadd.f32 %v151_v32, %v39_v18 }
  0xde   :  { %158 = vst [vmem:[%s248_s3 + $0x20] sm:$0xff] %v107_v29  ;;  %160 = vst [vmem:[%s248_s3 + $0x30] sm:$0xff] %v150_v30 }
  0xdf   :  { %159 = vst [vmem:[%s248_s3 + $0x28] sm:$0xff] %v109_v33  ;;  %161 = vst [vmem:[%s248_s3 + $0x38] sm:$0xff] %v152_v34 }

// kernel: mamba_bit_forward.27
= control target key start
LH: loop header
LB: loop body
LE: loop exit
PB: predicated region body
PF: predicated region fallthrough
CT: control target
= control target key end

     0   :  { %vm371_vm0 = vcmask 130048   ;;  %s1781_s1 = inlined_call_operand.vmem [shape: bf16[512,16], index: 1, kind: input, shape index: {}]   ;;  %s1782_s0 = inlined_call_operand.vmem [shape: f32[16,512], index: 0, kind: input, shape index: {}]   ;;  %s1783_s2 = inlined_call_operand.vmem [shape: bf16[512,16], index: 2, kind: input, shape index: {}]   ;;  %s1784_s3 = inlined_call_operand.vmem [shape: bf16[512,16], index: 3, kind: input, shape index: {}]   ;;  %s1785_s4 = inlined_call_operand.vmem [shape: f32[16,16], index: 4, kind: output, shape index: {0}]   ;;  %s1786_s5 = inlined_call_operand.vmem [shape: f32[16,16], index: 5, kind: output, shape index: {1}]   ;;  %s1787_s6 = inlined_call_operand.vmem [shape: f32[16,16], index: 6, kind: output, shape index: {2}]  }
   0x1   :  { %v1294_v0 = vld [vmem:[%s1781_s1 + $0x40] sm:$0xff]   ;;  %v1298_v4 = vld [vmem:[%s1781_s1 + $0x48] sm:$0xff]   ;;  %v1302_v8 = vld [vmem:[%s1781_s1 + $0x50] sm:$0xff]  }
   0x2   :  { %v1295_v1 = vld [vmem:[%s1781_s1 + $0xc0] sm:$0xff]   ;;  %1162 = vmatprep.subr.bf16.mxu0 %v1294_v0  ;;  %v1299_v5 = vld [vmem:[%s1781_s1 + $0xc8] sm:$0xff]   ;;  %v1303_v9 = vld [vmem:[%s1781_s1 + $0xd0] sm:$0xff]  }
   0x3   :  { %v1296_v2 = vld [vmem:[%s1781_s1] sm:$0xff]   ;;  %1184 = vmatprep.subr.bf16.mxu1 %v1295_v1  ;;  %v1300_v6 = vld [vmem:[%s1781_s1 + $0x8] sm:$0xff]   ;;  %v1304_v10 = vld [vmem:[%s1781_s1 + $0x10] sm:$0xff]  }
   0x4   :  { %v1297_v3 = vld [vmem:[%s1781_s1 + $0x80] sm:$0xff]   ;;  %1163 = vmatpush3.bf16.msra.mxu0 %v1296_v2  ;;  %v1301_v7 = vld [vmem:[%s1781_s1 + $0x88] sm:$0xff]   ;;  %v1305_v11 = vld [vmem:[%s1781_s1 + $0x90] sm:$0xff]  }
   0x5   :  { %1185 = vmatpush3.bf16.msra.mxu1 %v1297_v3  ;;  %1164 = vmatprep.subr.bf16.mxu0 %v1298_v4  ;;  %v1306_v12 = vld [vmem:[%s1781_s1 + $0x58] sm:$0xff]   ;;  %v1310_v16 = vld [vmem:[%s1781_s1 + $0x60] sm:$0xff]   ;;  %v1314_v20 = vld [vmem:[%s1781_s1 + $0x68] sm:$0xff]  }
   0x6   :  { %1186 = vmatprep.subr.bf16.mxu1 %v1299_v5  ;;  %v1307_v13 = vld [vmem:[%s1781_s1 + $0xd8] sm:$0xff]   ;;  %v1311_v17 = vld [vmem:[%s1781_s1 + $0xe0] sm:$0xff]   ;;  %v1315_v21 = vld [vmem:[%s1781_s1 + $0xe8] sm:$0xff]  }
   0x7   :  { %v1308_v14 = vld [vmem:[%s1781_s1 + $0x18] sm:$0xff]   ;;  %v1312_v18 = vld [vmem:[%s1781_s1 + $0x20] sm:$0xff]   ;;  %v1316_v22 = vld [vmem:[%s1781_s1 + $0x28] sm:$0xff]  }
   0x8   :  { %1165 = vmatpush3.bf16.msra.mxu0 %v1300_v6  ;;  %v1309_v15 = vld [vmem:[%s1781_s1 + $0x98] sm:$0xff]   ;;  %v1313_v19 = vld [vmem:[%s1781_s1 + $0xa0] sm:$0xff]   ;;  %v1317_v23 = vld [vmem:[%s1781_s1 + $0xa8] sm:$0xff]  }
   0x9   :  { %1187 = vmatpush3.bf16.msra.mxu1 %v1301_v7  ;;  %1166 = vmatprep.subr.bf16.mxu0 %v1302_v8  ;;  %v1318_v24 = vld [vmem:[%s1781_s1 + $0x70] sm:$0xff]   ;;  %v1322_v28 = vld [vmem:[%s1781_s1 + $0x78] sm:$0xff]   ;;  %v22_v32 = vld [vmem:[%s1782_s0 + $0x8] sm:$0xff] }
   0xa   :  { %1188 = vmatprep.subr.bf16.mxu1 %v1303_v9  ;;  %v1319_v25 = vld [vmem:[%s1781_s1 + $0xf0] sm:$0xff]   ;;  %v1323_v29 = vld [vmem:[%s1781_s1 + $0xf8] sm:$0xff]   ;;  %v26_v33 = vld [vmem:[%s1782_s0 + $0x28] sm:$0xff] }
   0xb   :  { %v1320_v26 = vld [vmem:[%s1781_s1 + $0x30] sm:$0xff]   ;;  %v1324_v30 = vld [vmem:[%s1781_s1 + $0x38] sm:$0xff]   ;;  %v1530_v35 = vpack.c.bf16 %v26_v33, %v22_v32  ;;  %v21_v37 = vld [vmem:[%s1782_s0] sm:$0xff] }
   0xc   :  { %1167 = vmatpush3.bf16.msra.mxu0 %v1304_v10  ;;  %v1321_v27 = vld [vmem:[%s1781_s1 + $0xb0] sm:$0xff]   ;;  %v1325_v31 = vld [vmem:[%s1781_s1 + $0xb8] sm:$0xff]   ;;  %v25_v38 = vld [vmem:[%s1782_s0 + $0x20] sm:$0xff] }
   0xd   :  { %1189 = vmatpush3.bf16.msra.mxu1 %v1305_v11  ;;  %1168 = vmatprep.subr.bf16.mxu0 %v1306_v12  ;;  %v24_v34 = vld [vmem:[%s1782_s0 + $0x18] sm:$0xff]  ;;  %v1543_v40 = vpack.c.bf16 %v25_v38, %v21_v37  ;;  %v23_v41 = vld [vmem:[%s1782_s0 + $0x10] sm:$0xff]  ;;  %v1326_v44 = vld [vmem:[%s1783_s2 + $0x40] sm:$0xff]  }
   0xe   :  { %1190 = vmatprep.subr.bf16.mxu1 %v1307_v13  ;;  %v28_v36 = vld [vmem:[%s1782_s0 + $0x38] sm:$0xff]  ;;  %v27_v42 = vld [vmem:[%s1782_s0 + $0x30] sm:$0xff]  ;;  %321 = vmatprep.mubr.bf16.mxu0 %v1530_v35  ;;  %v1327_v45 = vld [vmem:[%s1783_s2 + $0xc0] sm:$0xff]  }
   0xf   :  { %v1541_v39 = vpack.c.bf16 %v28_v36, %v24_v34  ;;  %v1552_v43 = vpack.c.bf16 %v27_v42, %v23_v41  ;;  %v1328_v46 = vld [vmem:[%s1783_s2] sm:$0xff]   ;;  %v1330_v48 = vld [vmem:[%s1783_s2 + $0x48] sm:$0xff]   ;;  %v1334_v52 = vld [vmem:[%s1783_s2 + $0x50] sm:$0xff]  }
  0x10   :  { %1169 = vmatpush3.bf16.msra.mxu0 %v1308_v14  ;;  %v1329_v47 = vld [vmem:[%s1783_s2 + $0x80] sm:$0xff]   ;;  %v1331_v49 = vld [vmem:[%s1783_s2 + $0xc8] sm:$0xff]   ;;  %v1335_v53 = vld [vmem:[%s1783_s2 + $0xd0] sm:$0xff]  }
  0x11   :  { %1191 = vmatpush3.bf16.msra.mxu1 %v1309_v15  ;;  %1170 = vmatprep.subr.bf16.mxu0 %v1310_v16  ;;  %v1332_v50 = vld [vmem:[%s1783_s2 + $0x8] sm:$0xff]   ;;  %v1336_v54 = vld [vmem:[%s1783_s2 + $0x10] sm:$0xff]   ;;  %v1338_v56 = vld [vmem:[%s1783_s2 + $0x58] sm:$0xff]  }
  0x12   :  { %1192 = vmatprep.subr.bf16.mxu1 %v1311_v17  ;;  %362 = vmatprep.mubr.bf16.mxu1 %v1541_v39  ;;  %v1333_v51 = vld [vmem:[%s1783_s2 + $0x88] sm:$0xff]   ;;  %v1337_v55 = vld [vmem:[%s1783_s2 + $0x90] sm:$0xff]   ;;  %v1339_v57 = vld [vmem:[%s1783_s2 + $0xd8] sm:$0xff]  }
  0x13   :  { %v1340_v58 = vld [vmem:[%s1783_s2 + $0x18] sm:$0xff]   ;;  %v1342_v60 = vld [vmem:[%s1783_s2 + $0x60] sm:$0xff]   ;;  %v1346_v0 = vld [vmem:[%s1783_s2 + $0x68] sm:$0xff]  }
  0x14   :  { %1171 = vmatpush3.bf16.msra.mxu0 %v1312_v18  ;;  %v1341_v59 = vld [vmem:[%s1783_s2 + $0x98] sm:$0xff]   ;;  %v1343_v61 = vld [vmem:[%s1783_s2 + $0xe0] sm:$0xff]   ;;  %v1347_v1 = vld [vmem:[%s1783_s2 + $0xe8] sm:$0xff]  }
  0x15   :  { %1193 = vmatpush3.bf16.msra.mxu1 %v1313_v19  ;;  %1172 = vmatprep.subr.bf16.mxu0 %v1314_v20  ;;  %v1344_v62 = vld [vmem:[%s1783_s2 + $0x20] sm:$0xff]   ;;  %v1348_v2 = vld [vmem:[%s1783_s2 + $0x28] sm:$0xff]   ;;  %v1350_v4 = vld [vmem:[%s1783_s2 + $0x70] sm:$0xff]  }
  0x16   :  { %1194 = vmatprep.subr.bf16.mxu1 %v1315_v21  ;;  %v1345_v63 = vld [vmem:[%s1783_s2 + $0xa0] sm:$0xff]   ;;  %v1349_v3 = vld [vmem:[%s1783_s2 + $0xa8] sm:$0xff]   ;;  %v1351_v5 = vld [vmem:[%s1783_s2 + $0xf0] sm:$0xff]  }
  0x17   :  { %v1352_v6 = vld [vmem:[%s1783_s2 + $0x30] sm:$0xff]   ;;  %v1354_v8 = vld [vmem:[%s1783_s2 + $0x78] sm:$0xff]   ;;  %v1358_v12 = vld [vmem:[%s1784_s3 + $0x40] sm:$0xff]  }
  0x18   :  { %1173 = vmatpush3.bf16.msra.mxu0 %v1316_v22  ;;  %v1353_v7 = vld [vmem:[%s1783_s2 + $0xb0] sm:$0xff]   ;;  %v1355_v9 = vld [vmem:[%s1783_s2 + $0xf8] sm:$0xff]   ;;  %v1359_v13 = vld [vmem:[%s1784_s3 + $0xc0] sm:$0xff]  }
  0x19   :  { %1195 = vmatpush3.bf16.msra.mxu1 %v1317_v23  ;;  %1174 = vmatprep.subr.bf16.mxu0 %v1318_v24  ;;  %v1356_v10 = vld [vmem:[%s1783_s2 + $0x38] sm:$0xff]   ;;  %v1360_v14 = vld [vmem:[%s1784_s3] sm:$0xff]   ;;  %v1362_v16 = vld [vmem:[%s1784_s3 + $0x48] sm:$0xff]  }
  0x1a   :  { %1196 = vmatprep.subr.bf16.mxu1 %v1319_v25  ;;  %v1357_v11 = vld [vmem:[%s1783_s2 + $0xb8] sm:$0xff]   ;;  %v1361_v15 = vld [vmem:[%s1784_s3 + $0x80] sm:$0xff]   ;;  %v1363_v17 = vld [vmem:[%s1784_s3 + $0xc8] sm:$0xff]  }
  0x1b   :  { %v1364_v18 = vld [vmem:[%s1784_s3 + $0x8] sm:$0xff]   ;;  %v1366_v20 = vld [vmem:[%s1784_s3 + $0x50] sm:$0xff]   ;;  %v1370_v24 = vld [vmem:[%s1784_s3 + $0x58] sm:$0xff]  }
  0x1c   :  { %1175 = vmatpush3.bf16.msra.mxu0 %v1320_v26  ;;  %v1365_v19 = vld [vmem:[%s1784_s3 + $0x88] sm:$0xff]   ;;  %v1367_v21 = vld [vmem:[%s1784_s3 + $0xd0] sm:$0xff]   ;;  %v1371_v25 = vld [vmem:[%s1784_s3 + $0xd8] sm:$0xff]  }
  0x1d   :  { %1197 = vmatpush3.bf16.msra.mxu1 %v1321_v27  ;;  %1176 = vmatprep.subr.bf16.mxu0 %v1322_v28  ;;  %v1368_v22 = vld [vmem:[%s1784_s3 + $0x10] sm:$0xff]   ;;  %v1372_v26 = vld [vmem:[%s1784_s3 + $0x18] sm:$0xff]   ;;  %v1374_v28 = vld [vmem:[%s1784_s3 + $0x60] sm:$0xff]  }
  0x1e   :  { %1198 = vmatprep.subr.bf16.mxu1 %v1323_v29  ;;  %v1369_v23 = vld [vmem:[%s1784_s3 + $0x90] sm:$0xff]   ;;  %v1373_v27 = vld [vmem:[%s1784_s3 + $0x98] sm:$0xff]   ;;  %v1375_v29 = vld [vmem:[%s1784_s3 + $0xe0] sm:$0xff]  }
  0x1f   :  { %v1378_v32 = vld [vmem:[%s1784_s3 + $0x68] sm:$0xff]   ;;  %v1382_v36 = vld [vmem:[%s1784_s3 + $0x70] sm:$0xff]   ;;  %v1386_v41 = vld [vmem:[%s1784_s3 + $0x78] sm:$0xff]  }
  0x20   :  { %1177 = vmatpush3.bf16.msra.mxu0 %v1324_v30  ;;  %v1376_v30 = vld [vmem:[%s1784_s3 + $0x20] sm:$0xff]   ;;  %v1379_v33 = vld [vmem:[%s1784_s3 + $0xe8] sm:$0xff]   ;;  %v1383_v37 = vld [vmem:[%s1784_s3 + $0xf0] sm:$0xff]  }
  0x21   :  { %1199 = vmatpush3.bf16.msra.mxu1 %v1325_v31  ;;  %1206 = vmatprep.subr.bf16.mxu0 %v1326_v44  ;;  %v1377_v31 = vld [vmem:[%s1784_s3 + $0xa0] sm:$0xff]   ;;  %v1380_v34 = vld [vmem:[%s1784_s3 + $0x28] sm:$0xff]   ;;  %v1384_v38 = vld [vmem:[%s1784_s3 + $0x30] sm:$0xff]  }
  0x22   :  { %1228 = vmatprep.subr.bf16.mxu1 %v1327_v45  ;;  %v1387_v42 = vld [vmem:[%s1784_s3 + $0xf8] sm:$0xff]  }
  0x23   :  { %322 = vmatmul.mubr.bf16.vlgmr.msra.gmra.mrb[0].mxu0 %v1543_v40  ;;  %v1388_v44 = vld [vmem:[%s1784_s3 + $0x38] sm:$0xff]  }
  0x24   :  { %363 = vmatmul.mubr.bf16.vlgmr.msra.gmra.mrb[0].mxu1 %v1552_v43  ;;  %662 = vmatprep.mubr.bf16.mxu0 %v1530_v35  ;;  %v1389_v45 = vld [vmem:[%s1784_s3 + $0xb8] sm:$0xff]  }
  0x25   :  { %1207 = vmatpush3.bf16.msra.mxu0 %v1328_v46  ;;  %703 = vmatprep.mubr.bf16.mxu1 %v1541_v39 }
  0x26   :  { %1229 = vmatpush3.bf16.msra.mxu1 %v1329_v47  ;;  %1208 = vmatprep.subr.bf16.mxu0 %v1330_v48 }
  0x27   :  { %1230 = vmatprep.subr.bf16.mxu1 %v1331_v49 }
  0x29   :  { %1209 = vmatpush3.bf16.msra.mxu0 %v1332_v50 }
  0x2a   :  { %1231 = vmatpush3.bf16.msra.mxu1 %v1333_v51  ;;  %1210 = vmatprep.subr.bf16.mxu0 %v1334_v52 }
  0x2b   :  { %1232 = vmatprep.subr.bf16.mxu1 %v1335_v53 }
  0x2d   :  { %1211 = vmatpush3.bf16.msra.mxu0 %v1336_v54 }
  0x2e   :  { %1233 = vmatpush3.bf16.msra.mxu1 %v1337_v55  ;;  %1212 = vmatprep.subr.bf16.mxu0 %v1338_v56 }
  0x2f   :  { %1234 = vmatprep.subr.bf16.mxu1 %v1339_v57 }
  0x31   :  { %1213 = vmatpush3.bf16.msra.mxu0 %v1340_v58 }
  0x32   :  { %1235 = vmatpush3.bf16.msra.mxu1 %v1341_v59  ;;  %1214 = vmatprep.subr.bf16.mxu0 %v1342_v60 }
  0x33   :  { %1236 = vmatprep.subr.bf16.mxu1 %v1343_v61 }
  0x35   :  { %1215 = vmatpush3.bf16.msra.mxu0 %v1344_v62 }
  0x36   :  { %1237 = vmatpush3.bf16.msra.mxu1 %v1345_v63  ;;  %1216 = vmatprep.subr.bf16.mxu0 %v1346_v0 }
  0x37   :  { %1238 = vmatprep.subr.bf16.mxu1 %v1347_v1 }
  0x39   :  { %1217 = vmatpush3.bf16.msra.mxu0 %v1348_v2 }
  0x3a   :  { %1239 = vmatpush3.bf16.msra.mxu1 %v1349_v3  ;;  %1218 = vmatprep.subr.bf16.mxu0 %v1350_v4 }
  0x3b   :  { %1240 = vmatprep.subr.bf16.mxu1 %v1351_v5 }
  0x3d   :  { %1219 = vmatpush3.bf16.msra.mxu0 %v1352_v6 }
  0x3e   :  { %1241 = vmatpush3.bf16.msra.mxu1 %v1353_v7  ;;  %1220 = vmatprep.subr.bf16.mxu0 %v1354_v8 }
  0x3f   :  { %1242 = vmatprep.subr.bf16.mxu1 %v1355_v9 }
  0x41   :  { %1221 = vmatpush3.bf16.msra.mxu0 %v1356_v10 }
  0x42   :  { %1243 = vmatpush3.bf16.msra.mxu1 %v1357_v11  ;;  %1250 = vmatprep.subr.bf16.mxu0 %v1358_v12 }
  0x43   :  { %1272 = vmatprep.subr.bf16.mxu1 %v1359_v13 }
  0x44   :  { %663 = vmatmul.mubr.bf16.vlgmr.msra.gmra.mrb[4].mxu0 %v1543_v40 }
  0x45   :  { %704 = vmatmul.mubr.bf16.vlgmr.msra.gmra.mrb[4].mxu1 %v1552_v43  ;;  %1251 = vmatpush3.bf16.msra.mxu0 %v1360_v14 }
  0x46   :  { %1273 = vmatpush3.bf16.msra.mxu1 %v1361_v15  ;;  %1002 = vmatprep.mubr.bf16.mxu0 %v1530_v35  ;;  %v1381_v35 = vld [vmem:[%s1784_s3 + $0xa8] sm:$0xff]  }
  0x47   :  { %1252 = vmatprep.subr.bf16.mxu0 %v1362_v16  ;;  %1043 = vmatprep.mubr.bf16.mxu1 %v1541_v39  ;;  %v1385_v39 = vld [vmem:[%s1784_s3 + $0xb0] sm:$0xff]  }
  0x48   :  { %1274 = vmatprep.subr.bf16.mxu1 %v1363_v17 }
  0x49   :  { %1253 = vmatpush3.bf16.msra.mxu0 %v1364_v18 }
  0x4a   :  { %1275 = vmatpush3.bf16.msra.mxu1 %v1365_v19  ;;  %1254 = vmatprep.subr.bf16.mxu0 %v1366_v20 }
  0x4b   :  { %1276 = vmatprep.subr.bf16.mxu1 %v1367_v21 }
  0x4d   :  { %1255 = vmatpush3.bf16.msra.mxu0 %v1368_v22 }
  0x4e   :  { %1277 = vmatpush3.bf16.msra.mxu1 %v1369_v23  ;;  %1256 = vmatprep.subr.bf16.mxu0 %v1370_v24 }
  0x4f   :  { %1278 = vmatprep.subr.bf16.mxu1 %v1371_v25 }
  0x51   :  { %1257 = vmatpush3.bf16.msra.mxu0 %v1372_v26 }
  0x52   :  { %1279 = vmatpush3.bf16.msra.mxu1 %v1373_v27  ;;  %1258 = vmatprep.subr.bf16.mxu0 %v1374_v28 }
  0x53   :  { %1280 = vmatprep.subr.bf16.mxu1 %v1375_v29 }
  0x55   :  { %1259 = vmatpush3.bf16.msra.mxu0 %v1376_v30 }
  0x56   :  { %1281 = vmatpush3.bf16.msra.mxu1 %v1377_v31  ;;  %1260 = vmatprep.subr.bf16.mxu0 %v1378_v32 }
  0x57   :  { %1282 = vmatprep.subr.bf16.mxu1 %v1379_v33 }
  0x59   :  { %1261 = vmatpush3.bf16.msra.mxu0 %v1380_v34 }
  0x5a   :  { %1283 = vmatpush3.bf16.msra.mxu1 %v1381_v35  ;;  %1262 = vmatprep.subr.bf16.mxu0 %v1382_v36 }
  0x5b   :  { %1284 = vmatprep.subr.bf16.mxu1 %v1383_v37 }
  0x5d   :  { %1263 = vmatpush3.bf16.msra.mxu0 %v1384_v38 }
  0x5e   :  { %1285 = vmatpush3.bf16.msra.mxu1 %v1385_v39  ;;  %1264 = vmatprep.subr.bf16.mxu0 %v1386_v41 }
  0x5f   :  { %1286 = vmatprep.subr.bf16.mxu1 %v1387_v42 }
  0x61   :  { %1265 = vmatpush3.bf16.msra.mxu0 %v1388_v44 }
  0x62   :  { %1287 = vmatpush3.bf16.msra.mxu1 %v1389_v45 }
  0x64   :  { %1003 = vmatmul.mubr.bf16.vlgmr.msra.gmra.mrb[8].mxu0 %v1543_v40 }
  0x65   :  { %1044 = vmatmul.mubr.bf16.vlgmr.msra.gmra.mrb[8].mxu1 %v1552_v43 }
  0xf6   :  { %v1178_v46 = vpop.f32.mrb[0].mxu0 }
  0xf7   :  { %v1200_v47 = vpop.f32.mrb[0].mxu1  ;;  %v1179_v48 = vpop.f32.mrb[1].mxu0 }
  0xf8   :  { %v1180_v49 = vadd.f32 %v1179_v48, %v1178_v46  ;;  %v1201_v50 = vpop.f32.mrb[1].mxu1  ;;  %v1181_v51 = vpop.f32.mrb[2].mxu0 }
  0xf9   :  { %v1202_v52 = vadd.f32 %v1201_v50, %v1200_v47  ;;  %v1203_v53 = vpop.f32.mrb[2].mxu1  ;;  %v1182_v54 = vpop.f32.mrb[3].mxu0 }
  0xfa   :  { %v1183_v55 = vadd.f32 %v1182_v54, %v1181_v51  ;;  %v1204_v56 = vpop.f32.mrb[3].mxu1 }
  0xfb   :  { %v365_v57 = vadd.f32 %v1202_v52, %v1180_v49  ;;  %v1205_v58 = vadd.f32 %v1204_v56, %v1203_v53 }
  0xfd   :  { %372 = vst.msk [vmem:[%s1785_s4] sm:$0xff] %vm371_vm0, %v365_v57  ;;  %v368_v40 = vadd.f32 %v1205_v58, %v1183_v55 }
  0xff   :  { %373 = vst.msk [vmem:[%s1785_s4 + $0x8] sm:$0xff] %vm371_vm0, %v368_v40 }
 0x117   :  { %v1222_v43 = vpop.f32.mrb[4].mxu0 }
 0x118   :  { %v1244_v59 = vpop.f32.mrb[4].mxu1  ;;  %v1223_v60 = vpop.f32.mrb[5].mxu0 }
 0x119   :  { %v1224_v61 = vadd.f32 %v1223_v60, %v1222_v43  ;;  %v1245_v62 = vpop.f32.mrb[5].mxu1  ;;  %v1225_v63 = vpop.f32.mrb[6].mxu0 }
 0x11a   :  { %v1246_v0 = vadd.f32 %v1245_v62, %v1244_v59  ;;  %v1247_v1 = vpop.f32.mrb[6].mxu1  ;;  %v1226_v2 = vpop.f32.mrb[7].mxu0 }
 0x11b   :  { %v1227_v3 = vadd.f32 %v1226_v2, %v1225_v63  ;;  %v1248_v4 = vpop.f32.mrb[7].mxu1 }
 0x11c   :  { %v706_v5 = vadd.f32 %v1246_v0, %v1224_v61  ;;  %v1249_v6 = vadd.f32 %v1248_v4, %v1247_v1 }
 0x11e   :  { %712 = vst.msk [vmem:[%s1786_s5] sm:$0xff] %vm371_vm0, %v706_v5  ;;  %v709_v7 = vadd.f32 %v1249_v6, %v1227_v3 }
 0x120   :  { %713 = vst.msk [vmem:[%s1786_s5 + $0x8] sm:$0xff] %vm371_vm0, %v709_v7 }
 0x137   :  { %v1266_v8 = vpop.f32.mrb[8].mxu0 }
 0x138   :  { %v1288_v9 = vpop.f32.mrb[8].mxu1  ;;  %v1267_v10 = vpop.f32.mrb[9].mxu0 }
 0x139   :  { %v1268_v11 = vadd.f32 %v1267_v10, %v1266_v8  ;;  %v1289_v12 = vpop.f32.mrb[9].mxu1  ;;  %v1269_v13 = vpop.f32.mrb[10].mxu0 }
 0x13a   :  { %v1290_v14 = vadd.f32 %v1289_v12, %v1288_v9  ;;  %v1291_v15 = vpop.f32.mrb[10].mxu1  ;;  %v1270_v16 = vpop.f32.mrb[11].mxu0 }
 0x13b   :  { %v1271_v17 = vadd.f32 %v1270_v16, %v1269_v13  ;;  %v1292_v18 = vpop.f32.mrb[11].mxu1 }
 0x13c   :  { %v1046_v19 = vadd.f32 %v1290_v14, %v1268_v11  ;;  %v1293_v20 = vadd.f32 %v1292_v18, %v1291_v15 }
 0x13e   :  { %1052 = vst.msk [vmem:[%s1787_s6] sm:$0xff] %vm371_vm0, %v1046_v19  ;;  %v1049_v21 = vadd.f32 %v1293_v20, %v1271_v17 }
 0x140   :  { %1053 = vst.msk [vmem:[%s1787_s6 + $0x8] sm:$0xff] %vm371_vm0, %v1049_v21 }

// kernel: mamba_bit_forward.30
= control target key start
LH: loop header
LB: loop body
LE: loop exit
PB: predicated region body
PF: predicated region fallthrough
CT: control target
= control target key end

     0   :  { %s418_s1 = inlined_call_operand.vmem [shape: s8[512,256], index: 1, kind: input, shape index: {}]   ;;  %s419_s0 = inlined_call_operand.vmem [shape: f32[16,512], index: 0, kind: input, shape index: {}]   ;;  %s420_s2 = inlined_call_operand.vmem [shape: f32[1,256], index: 2, kind: input, shape index: {}]   ;;  %s421_s3 = inlined_call_operand.vmem [shape: f32[1,256], index: 3, kind: input, shape index: {}]   ;;  %s422_s4 = inlined_call_operand.vmem [shape: f32[16,256], index: 4, kind: output, shape index: {}]  }
   0x1   :  { %v30_v0 = vld [vmem:[%s418_s1 + $0x8] sm:$0xff]  ;;  %v29_v2 = vld [vmem:[%s418_s1] sm:$0xff]  ;;  %v32_v10 = vld [vmem:[%s418_s1 + $0x18] sm:$0xff] }
   0x2   :  { %v46_v1 = vld [vmem:[%s418_s1 + $0x88] sm:$0xff]  ;;  %v62_v3 = vunpack.c.l.s8.bf16 %v30_v0  ;;  %v64_v4 = vunpack.c.h.s8.bf16 %v30_v0  ;;  %v45_v7 = vld [vmem:[%s418_s1 + $0x80] sm:$0xff]  ;;  %v61_v8 = vunpack.c.l.s8.bf16 %v29_v2  ;;  %v48_v11 = vld [vmem:[%s418_s1 + $0x98] sm:$0xff]  ;;  %v63_v12 = vunpack.c.h.s8.bf16 %v29_v2 }
   0x3   :  { %v94_v5 = vunpack.c.l.s8.bf16 %v46_v1  ;;  %v96_v6 = vunpack.c.h.s8.bf16 %v46_v1  ;;  %v93_v9 = vunpack.c.l.s8.bf16 %v45_v7  ;;  %v95_v13 = vunpack.c.h.s8.bf16 %v45_v7  ;;  %v31_v16 = vld [vmem:[%s418_s1 + $0x10] sm:$0xff]  ;;  %v34_v22 = vld [vmem:[%s418_s1 + $0x28] sm:$0xff]  ;;  %v33_v28 = vld [vmem:[%s418_s1 + $0x20] sm:$0xff] }
   0x4   :  { %125 = vmatprep.subr.bf16.mxu1 %v62_v3  ;;  %v66_v14 = vunpack.c.l.s8.bf16 %v32_v10  ;;  %v98_v15 = vunpack.c.l.s8.bf16 %v48_v11  ;;  %v47_v17 = vld [vmem:[%s418_s1 + $0x90] sm:$0xff]  ;;  %v65_v18 = vunpack.c.l.s8.bf16 %v31_v16  ;;  %v68_v20 = vunpack.c.h.s8.bf16 %v32_v10  ;;  %v50_v23 = vld [vmem:[%s418_s1 + $0xa8] sm:$0xff]  ;;  %v49_v29 = vld [vmem:[%s418_s1 + $0xa0] sm:$0xff] }
   0x5   :  { %168 = vmatprep.subr.bf16.mxu0 %v94_v5  ;;  %126 = vmatpush1.bf16.msra.mxu1 %v61_v8  ;;  %v97_v19 = vunpack.c.l.s8.bf16 %v47_v17  ;;  %v100_v21 = vunpack.c.h.s8.bf16 %v48_v11  ;;  %v67_v24 = vunpack.c.h.s8.bf16 %v31_v16  ;;  %v99_v25 = vunpack.c.h.s8.bf16 %v47_v17  ;;  %v18_v30 = vld [vmem:[%s419_s0 + $0x8] sm:$0xff]  ;;  %v20_v32 = vld [vmem:[%s419_s0 + $0x18] sm:$0xff]  ;;  %v35_v46 = vld [vmem:[%s418_s1 + $0x30] sm:$0xff] }
   0x6   :  { %169 = vmatpush1.bf16.msra.mxu0 %v93_v9  ;;  %127 = vmatprep.subr.bf16.mxu1 %v64_v4  ;;  %v70_v26 = vunpack.c.l.s8.bf16 %v34_v22  ;;  %v102_v27 = vunpack.c.l.s8.bf16 %v50_v23  ;;  %v22_v31 = vld [vmem:[%s419_s0 + $0x28] sm:$0xff]  ;;  %v24_v33 = vld [vmem:[%s419_s0 + $0x38] sm:$0xff]  ;;  %v69_v34 = vunpack.c.l.s8.bf16 %v33_v28  ;;  %v101_v35 = vunpack.c.l.s8.bf16 %v49_v29  ;;  %v51_v47 = vld [vmem:[%s418_s1 + $0xb0] sm:$0xff] }
   0x7   :  { %170 = vmatprep.subr.bf16.mxu0 %v96_v6  ;;  %v72_v36 = vunpack.c.h.s8.bf16 %v34_v22  ;;  %v104_v37 = vunpack.c.h.s8.bf16 %v50_v23  ;;  %v26_v38 = vpack.c.bf16 %v22_v31, %v18_v30  ;;  %v28_v39 = vpack.c.bf16 %v24_v33, %v20_v32  ;;  %v36_v40 = vld [vmem:[%s418_s1 + $0x38] sm:$0xff]  ;;  %v38_v52 = vld [vmem:[%s418_s1 + $0x48] sm:$0xff]  ;;  %v37_v58 = vld [vmem:[%s418_s1 + $0x40] sm:$0xff] }
   0x8   :  { %v52_v41 = vld [vmem:[%s418_s1 + $0xb8] sm:$0xff]  ;;  %v71_v42 = vunpack.c.h.s8.bf16 %v33_v28  ;;  %v103_v43 = vunpack.c.h.s8.bf16 %v49_v29  ;;  %v74_v44 = vunpack.c.l.s8.bf16 %v36_v40  ;;  %v73_v48 = vunpack.c.l.s8.bf16 %v35_v46  ;;  %v54_v53 = vld [vmem:[%s418_s1 + $0xc8] sm:$0xff]  ;;  %v53_v59 = vld [vmem:[%s418_s1 + $0xc0] sm:$0xff] }
   0x9   :  { %128 = vmatpush1.bf16.msra.mxu1 %v63_v12  ;;  %157 = vmatprep.mubr.bf16.mxu1 %v26_v38  ;;  %v106_v45 = vunpack.c.l.s8.bf16 %v52_v41  ;;  %v105_v49 = vunpack.c.l.s8.bf16 %v51_v47  ;;  %v76_v50 = vunpack.c.h.s8.bf16 %v36_v40  ;;  %v108_v51 = vunpack.c.h.s8.bf16 %v52_v41  ;;  %v40_v0 = vld [vmem:[%s418_s1 + $0x58] sm:$0xff]  ;;  %v39_v6 = vld [vmem:[%s418_s1 + $0x50] sm:$0xff]  ;;  %v42_v12 = vld [vmem:[%s418_s1 + $0x68] sm:$0xff] }
   0xa   :  { %171 = vmatpush1.bf16.msra.mxu0 %v95_v13  ;;  %129 = vmatprep.subr.bf16.mxu1 %v66_v14  ;;  %v75_v54 = vunpack.c.h.s8.bf16 %v35_v46  ;;  %v107_v55 = vunpack.c.h.s8.bf16 %v51_v47  ;;  %v78_v56 = vunpack.c.l.s8.bf16 %v38_v52  ;;  %v110_v57 = vunpack.c.l.s8.bf16 %v54_v53  ;;  %v56_v1 = vld [vmem:[%s418_s1 + $0xd8] sm:$0xff]  ;;  %v55_v7 = vld [vmem:[%s418_s1 + $0xd0] sm:$0xff]  ;;  %v58_v13 = vld [vmem:[%s418_s1 + $0xe8] sm:$0xff] }
   0xb   :  { %172 = vmatprep.subr.bf16.mxu0 %v98_v15  ;;  %200 = vmatprep.mubr.bf16.mxu0 %v28_v39  ;;  %v77_v60 = vunpack.c.l.s8.bf16 %v37_v58  ;;  %v109_v61 = vunpack.c.l.s8.bf16 %v53_v59  ;;  %v80_v62 = vunpack.c.h.s8.bf16 %v38_v52  ;;  %v112_v63 = vunpack.c.h.s8.bf16 %v54_v53  ;;  %v43_v30 = vld [vmem:[%s418_s1 + $0x70] sm:$0xff]  ;;  %v21_v39 = vld [vmem:[%s419_s0 + $0x20] sm:$0xff] }
   0xc   :  { %v79_v2 = vunpack.c.h.s8.bf16 %v37_v58  ;;  %v111_v3 = vunpack.c.h.s8.bf16 %v53_v59  ;;  %v82_v4 = vunpack.c.l.s8.bf16 %v40_v0  ;;  %v114_v5 = vunpack.c.l.s8.bf16 %v56_v1  ;;  %v59_v31 = vld [vmem:[%s418_s1 + $0xf0] sm:$0xff]  ;;  %v211_v47 = vld [vmem:[%s420_s2] sm:$0x3] }
   0xd   :  { %130 = vmatpush1.bf16.msra.mxu1 %v65_v18  ;;  %v81_v8 = vunpack.c.l.s8.bf16 %v39_v6  ;;  %v113_v9 = vunpack.c.l.s8.bf16 %v55_v7  ;;  %v84_v10 = vunpack.c.h.s8.bf16 %v40_v0  ;;  %v116_v11 = vunpack.c.h.s8.bf16 %v56_v1  ;;  %v41_v18 = vld [vmem:[%s418_s1 + $0x60] sm:$0xff]  ;;  %v19_v40 = vld [vmem:[%s419_s0 + $0x10] sm:$0xff] }
   0xe   :  { %173 = vmatpush1.bf16.msra.mxu0 %v97_v19  ;;  %131 = vmatprep.subr.bf16.mxu1 %v68_v20  ;;  %v83_v14 = vunpack.c.h.s8.bf16 %v39_v6  ;;  %v115_v15 = vunpack.c.h.s8.bf16 %v55_v7  ;;  %v86_v16 = vunpack.c.l.s8.bf16 %v42_v12  ;;  %v118_v17 = vunpack.c.l.s8.bf16 %v58_v13  ;;  %v57_v19 = vld [vmem:[%s418_s1 + $0xe0] sm:$0xff]  ;;  %v23_v41 = vld [vmem:[%s419_s0 + $0x30] sm:$0xff] }
   0xf   :  { %174 = vmatprep.subr.bf16.mxu0 %v100_v21  ;;  %v85_v20 = vunpack.c.l.s8.bf16 %v41_v18  ;;  %v117_v21 = vunpack.c.l.s8.bf16 %v57_v19  ;;  %v88_v22 = vunpack.c.h.s8.bf16 %v42_v12  ;;  %v120_v23 = vunpack.c.h.s8.bf16 %v58_v13 }
  0x10   :  { %v89_v32 = vunpack.c.l.s8.bf16 %v43_v30  ;;  %v121_v33 = vunpack.c.l.s8.bf16 %v59_v31  ;;  %v123_v38 = vunpack.c.h.s8.bf16 %v59_v31 }
  0x11   :  { %132 = vmatpush1.bf16.msra.mxu1 %v67_v24  ;;  %v44_v24 = vld [vmem:[%s418_s1 + $0x78] sm:$0xff] }
  0x12   :  { %175 = vmatpush1.bf16.msra.mxu0 %v99_v25  ;;  %133 = vmatprep.subr.bf16.mxu1 %v70_v26  ;;  %v60_v25 = vld [vmem:[%s418_s1 + $0xf8] sm:$0xff]  ;;  %v87_v26 = vunpack.c.h.s8.bf16 %v41_v18  ;;  %v90_v28 = vunpack.c.l.s8.bf16 %v44_v24 }
  0x13   :  { %176 = vmatprep.subr.bf16.mxu0 %v102_v27  ;;  %v119_v27 = vunpack.c.h.s8.bf16 %v57_v19  ;;  %v122_v29 = vunpack.c.l.s8.bf16 %v60_v25 }
  0x15   :  { %134 = vmatpush1.bf16.msra.mxu1 %v69_v34  ;;  %v92_v34 = vunpack.c.h.s8.bf16 %v44_v24 }
  0x16   :  { %177 = vmatpush1.bf16.msra.mxu0 %v101_v35  ;;  %135 = vmatprep.subr.bf16.mxu1 %v72_v36  ;;  %v124_v35 = vunpack.c.h.s8.bf16 %v60_v25  ;;  %v17_v36 = vld [vmem:[%s419_s0] sm:$0xff] }
  0x17   :  { %178 = vmatprep.subr.bf16.mxu0 %v104_v37  ;;  %v91_v37 = vunpack.c.h.s8.bf16 %v43_v30 }
  0x19   :  { %136 = vmatpush1.bf16.msra.mxu1 %v71_v42  ;;  %v25_v42 = vpack.c.bf16 %v21_v39, %v17_v36 }
  0x1a   :  { %179 = vmatpush1.bf16.msra.mxu0 %v103_v43  ;;  %137 = vmatprep.subr.bf16.mxu1 %v74_v44  ;;  %v27_v43 = vpack.c.bf16 %v23_v41, %v19_v40  ;;  %v213_v44 = vlaneseq }
  0x1b   :  { %180 = vmatprep.subr.bf16.mxu0 %v106_v45 }
  0x1c   :  { %v214_v45 = vshrl.u32 %v213_v44, 7 }
  0x1d   :  { %138 = vmatpush1.bf16.msra.mxu1 %v73_v48 }
  0x1e   :  { %181 = vmatpush1.bf16.msra.mxu0 %v105_v49  ;;  %139 = vmatprep.subr.bf16.mxu1 %v76_v50  ;;  %v215_v46 = vsub.s32 0, %v214_v45  ;;  %v219_v48 = vsub.s32 1, %v214_v45  ;;  %v227_v49 = vld [vmem:[%s421_s3] sm:$0x3] }
  0x1f   :  { %182 = vmatprep.subr.bf16.mxu0 %v108_v51 }
  0x20   :  { %v216_v50 = vrot.slane %v211_v47, %v215_v46  ;;  %v220_v53 = vrot.slane %v211_v47, %v219_v48  ;;  %v236_v59 = vrot.slane %v227_v49, %v219_v48 }
  0x21   :  { %140 = vmatpush1.bf16.msra.mxu1 %v75_v54 }
  0x22   :  { %183 = vmatpush1.bf16.msra.mxu0 %v107_v55  ;;  %141 = vmatprep.subr.bf16.mxu1 %v78_v56  ;;  %v232_v55 = vrot.slane %v227_v49, %v215_v46 }
  0x23   :  { %184 = vmatprep.subr.bf16.mxu0 %v110_v57 }
  0x25   :  { %142 = vmatpush1.bf16.msra.mxu1 %v77_v60 }
  0x26   :  { %185 = vmatpush1.bf16.msra.mxu0 %v109_v61  ;;  %143 = vmatprep.subr.bf16.mxu1 %v80_v62 }
  0x27   :  { %186 = vmatprep.subr.bf16.mxu0 %v112_v63 }
  0x29   :  { %144 = vmatpush1.bf16.msra.mxu1 %v79_v2 }
  0x2a   :  { %187 = vmatpush1.bf16.msra.mxu0 %v111_v3  ;;  %145 = vmatprep.subr.bf16.mxu1 %v82_v4 }
  0x2b   :  { %188 = vmatprep.subr.bf16.mxu0 %v114_v5 }
  0x2d   :  { %146 = vmatpush1.bf16.msra.mxu1 %v81_v8 }
  0x2e   :  { %189 = vmatpush1.bf16.msra.mxu0 %v113_v9  ;;  %147 = vmatprep.subr.bf16.mxu1 %v84_v10 }
  0x2f   :  { %190 = vmatprep.subr.bf16.mxu0 %v116_v11 }
  0x31   :  { %148 = vmatpush1.bf16.msra.mxu1 %v83_v14 }
  0x32   :  { %191 = vmatpush1.bf16.msra.mxu0 %v115_v15  ;;  %149 = vmatprep.subr.bf16.mxu1 %v86_v16 }
  0x33   :  { %192 = vmatprep.subr.bf16.mxu0 %v118_v17 }
  0x35   :  { %150 = vmatpush1.bf16.msra.mxu1 %v85_v20 }
  0x36   :  { %193 = vmatpush1.bf16.msra.mxu0 %v117_v21  ;;  %151 = vmatprep.subr.bf16.mxu1 %v88_v22 }
  0x37   :  { %194 = vmatprep.subr.bf16.mxu0 %v120_v23 }
  0x39   :  { %152 = vmatpush1.bf16.msra.mxu1 %v87_v26 }
  0x3a   :  { %195 = vmatpush1.bf16.msra.mxu0 %v119_v27  ;;  %153 = vmatprep.subr.bf16.mxu1 %v90_v28 }
  0x3b   :  { %196 = vmatprep.subr.bf16.mxu0 %v122_v29 }
  0x3d   :  { %154 = vmatpush1.bf16.msra.mxu1 %v89_v32 }
  0x3e   :  { %197 = vmatpush1.bf16.msra.mxu0 %v121_v33  ;;  %155 = vmatprep.subr.bf16.mxu1 %v92_v34 }
  0x3f   :  { %198 = vmatprep.subr.bf16.mxu0 %v124_v35 }
  0x41   :  { %156 = vmatpush1.bf16.msra.mxu1 %v91_v37 }
  0x42   :  { %199 = vmatpush1.bf16.msra.mxu0 %v123_v38 }
  0x44   :  { %158 = vmatmul.mubr.bf16.vlgmr.msra.gmra.mrb[0].mxu1 %v25_v42 }
  0x45   :  { %201 = vmatmul.mubr.bf16.vlgmr.msra.gmra.mrb[0].mxu0 %v27_v43 }
 0x117   :  { %v159_v51 = vpop.f32.mrb[0].mxu1 }
 0x118   :  { %v202_v52 = vpop.f32.mrb[0].mxu0  ;;  %v161_v56 = vpop.f32.mrb[1].mxu1 }
 0x119   :  { %v203_v54 = vadd.f32 %v202_v52, %v159_v51  ;;  %v204_v57 = vpop.f32.mrb[1].mxu0  ;;  %v163_v60 = vpop.f32.mrb[2].mxu1 }
 0x11a   :  { %v205_v58 = vadd.f32 %v204_v57, %v161_v56  ;;  %v206_v61 = vpop.f32.mrb[2].mxu0  ;;  %v165_v0 = vpop.f32.mrb[3].mxu1 }
 0x11b   :  { %v223_v62 = vmul.f32 %v216_v50, %v203_v54  ;;  %v207_v63 = vadd.f32 %v206_v61, %v163_v60  ;;  %v208_v1 = vpop.f32.mrb[3].mxu0 }
 0x11c   :  { %v224_v2 = vmul.f32 %v220_v53, %v205_v58  ;;  %v209_v3 = vadd.f32 %v208_v1, %v165_v0 }
 0x11d   :  { %v239_v4 = vadd.f32 %v232_v55, %v223_v62  ;;  %v225_v5 = vmul.f32 %v216_v50, %v207_v63 }
 0x11e   :  { %v240_v6 = vadd.f32 %v236_v59, %v224_v2  ;;  %v226_v7 = vmul.f32 %v220_v53, %v209_v3 }
 0x11f   :  { %243 = vst [vmem:[%s422_s4] sm:$0xff] %v239_v4  ;;  %v241_v8 = vadd.f32 %v232_v55, %v225_v5 }
 0x120   :  { %244 = vst [vmem:[%s422_s4 + $0x8] sm:$0xff] %v240_v6  ;;  %v242_v9 = vadd.f32 %v236_v59, %v226_v7 }
 0x121   :  { %245 = vst [vmem:[%s422_s4 + $0x10] sm:$0xff] %v241_v8 }
 0x122   :  { %246 = vst [vmem:[%s422_s4 + $0x18] sm:$0xff] %v242_v9 }

// kernel: mamba_bit_forward.31
= control target key start
LH: loop header
LB: loop body
LE: loop exit
PB: predicated region body
PF: predicated region fallthrough
CT: control target
= control target key end

     0   :  { %s781_s1 = inlined_call_operand.vmem [shape: s8[256,512], index: 1, kind: input, shape index: {}]   ;;  %s782_s0 = inlined_call_operand.vmem [shape: f32[16,256], index: 0, kind: input, shape index: {}]   ;;  %s783_s3 = inlined_call_operand.vmem [shape: s8[256,512], index: 3, kind: input, shape index: {}]   ;;  %s784_s2 = inlined_call_operand.vmem [shape: f32[1,512], index: 2, kind: input, shape index: {}]   ;;  %s785_s5 = inlined_call_operand.vmem [shape: f32[16,512], index: 5, kind: output, shape index: {0}]   ;;  %s786_s4 = inlined_call_operand.vmem [shape: f32[1,512], index: 4, kind: input, shape index: {}]   ;;  %s787_s6 = inlined_call_operand.vmem [shape: f32[16,512], index: 6, kind: output, shape index: {1}]  }
   0x1   :  { %v29_v0 = vld [vmem:[%s781_s1 + $0x8] sm:$0xff]  ;;  %v31_v1 = vld [vmem:[%s781_s1 + $0x18] sm:$0xff]  ;;  %v28_v2 = vld [vmem:[%s781_s1] sm:$0xff] }
   0x2   :  { %v61_v3 = vunpack.c.l.s8.bf16 %v29_v0  ;;  %v65_v4 = vunpack.c.h.s8.bf16 %v29_v0  ;;  %v63_v5 = vunpack.c.l.s8.bf16 %v31_v1  ;;  %v67_v6 = vunpack.c.h.s8.bf16 %v31_v1  ;;  %v30_v7 = vld [vmem:[%s781_s1 + $0x10] sm:$0xff]  ;;  %v33_v10 = vld [vmem:[%s781_s1 + $0x28] sm:$0xff]  ;;  %v35_v11 = vld [vmem:[%s781_s1 + $0x38] sm:$0xff] }
   0x3   :  { %v60_v8 = vunpack.c.l.s8.bf16 %v28_v2  ;;  %v62_v9 = vunpack.c.l.s8.bf16 %v30_v7  ;;  %v64_v12 = vunpack.c.h.s8.bf16 %v28_v2  ;;  %v66_v13 = vunpack.c.h.s8.bf16 %v30_v7  ;;  %v32_v16 = vld [vmem:[%s781_s1 + $0x20] sm:$0xff]  ;;  %v34_v17 = vld [vmem:[%s781_s1 + $0x30] sm:$0xff]  ;;  %v37_v22 = vld [vmem:[%s781_s1 + $0x48] sm:$0xff] }
   0x4   :  { %220 = vmatprep.subr.bf16.mxu0 %v61_v3  ;;  %263 = vmatprep.subr.bf16.mxu1 %v63_v5  ;;  %v69_v14 = vunpack.c.l.s8.bf16 %v33_v10  ;;  %v71_v15 = vunpack.c.l.s8.bf16 %v35_v11  ;;  %v68_v18 = vunpack.c.l.s8.bf16 %v32_v16  ;;  %v70_v19 = vunpack.c.l.s8.bf16 %v34_v17  ;;  %v39_v23 = vld [vmem:[%s781_s1 + $0x58] sm:$0xff]  ;;  %v36_v28 = vld [vmem:[%s781_s1 + $0x40] sm:$0xff]  ;;  %v38_v29 = vld [vmem:[%s781_s1 + $0x50] sm:$0xff] }
   0x5   :  { %221 = vmatpush1.bf16.msra.mxu0 %v60_v8  ;;  %264 = vmatpush1.bf16.msra.mxu1 %v62_v9  ;;  %v73_v20 = vunpack.c.h.s8.bf16 %v33_v10  ;;  %v75_v21 = vunpack.c.h.s8.bf16 %v35_v11  ;;  %v72_v24 = vunpack.c.h.s8.bf16 %v32_v16  ;;  %v74_v25 = vunpack.c.h.s8.bf16 %v34_v17  ;;  %v23_v30 = vld [vmem:[%s782_s0 + $0x8] sm:$0xff]  ;;  %v25_v31 = vld [vmem:[%s782_s0 + $0x18] sm:$0xff]  ;;  %v40_v43 = vld [vmem:[%s781_s1 + $0x60] sm:$0xff] }
   0x6   :  { %222 = vmatprep.subr.bf16.mxu0 %v65_v4  ;;  %265 = vmatprep.subr.bf16.mxu1 %v67_v6  ;;  %v77_v26 = vunpack.c.l.s8.bf16 %v37_v22  ;;  %v79_v27 = vunpack.c.l.s8.bf16 %v39_v23  ;;  %v76_v32 = vunpack.c.l.s8.bf16 %v36_v28  ;;  %v78_v33 = vunpack.c.l.s8.bf16 %v38_v29  ;;  %v41_v37 = vld [vmem:[%s781_s1 + $0x68] sm:$0xff]  ;;  %v43_v38 = vld [vmem:[%s781_s1 + $0x78] sm:$0xff]  ;;  %v42_v44 = vld [vmem:[%s781_s1 + $0x70] sm:$0xff] }
   0x7   :  { %v81_v34 = vunpack.c.h.s8.bf16 %v37_v22  ;;  %v83_v35 = vunpack.c.h.s8.bf16 %v39_v23  ;;  %v553_v36 = vpack.c.bf16 %v25_v31, %v23_v30  ;;  %v80_v39 = vunpack.c.h.s8.bf16 %v36_v28  ;;  %v45_v49 = vld [vmem:[%s781_s1 + $0x88] sm:$0xff]  ;;  %v47_v50 = vld [vmem:[%s781_s1 + $0x98] sm:$0xff]  ;;  %v44_v55 = vld [vmem:[%s781_s1 + $0x80] sm:$0xff] }
   0x8   :  { %v82_v40 = vunpack.c.h.s8.bf16 %v38_v29  ;;  %v85_v41 = vunpack.c.l.s8.bf16 %v41_v37  ;;  %v87_v42 = vunpack.c.l.s8.bf16 %v43_v38  ;;  %v84_v45 = vunpack.c.l.s8.bf16 %v40_v43  ;;  %v46_v56 = vld [vmem:[%s781_s1 + $0x90] sm:$0xff]  ;;  %v49_v61 = vld [vmem:[%s781_s1 + $0xa8] sm:$0xff]  ;;  %v51_v62 = vld [vmem:[%s781_s1 + $0xb8] sm:$0xff] }
   0x9   :  { %223 = vmatpush1.bf16.msra.mxu0 %v64_v12  ;;  %266 = vmatpush1.bf16.msra.mxu1 %v66_v13  ;;  %v86_v46 = vunpack.c.l.s8.bf16 %v42_v44  ;;  %v89_v47 = vunpack.c.h.s8.bf16 %v41_v37  ;;  %v91_v48 = vunpack.c.h.s8.bf16 %v43_v38  ;;  %v88_v51 = vunpack.c.h.s8.bf16 %v40_v43  ;;  %v48_v3 = vld [vmem:[%s781_s1 + $0xa0] sm:$0xff]  ;;  %v50_v4 = vld [vmem:[%s781_s1 + $0xb0] sm:$0xff]  ;;  %v53_v9 = vld [vmem:[%s781_s1 + $0xc8] sm:$0xff] }
   0xa   :  { %224 = vmatprep.subr.bf16.mxu0 %v69_v14  ;;  %267 = vmatprep.subr.bf16.mxu1 %v71_v15  ;;  %v90_v52 = vunpack.c.h.s8.bf16 %v42_v44  ;;  %v93_v53 = vunpack.c.l.s8.bf16 %v45_v49  ;;  %v95_v54 = vunpack.c.l.s8.bf16 %v47_v50  ;;  %v92_v57 = vunpack.c.l.s8.bf16 %v44_v55  ;;  %v55_v10 = vld [vmem:[%s781_s1 + $0xd8] sm:$0xff]  ;;  %v52_v15 = vld [vmem:[%s781_s1 + $0xc0] sm:$0xff]  ;;  %v54_v16 = vld [vmem:[%s781_s1 + $0xd0] sm:$0xff] }
   0xb   :  { %252 = vmatprep.mubr.bf16.mxu0 %v553_v36  ;;  %295 = vmatprep.mubr.bf16.mxu1 %v553_v36  ;;  %v94_v58 = vunpack.c.l.s8.bf16 %v46_v56  ;;  %v97_v59 = vunpack.c.h.s8.bf16 %v45_v49  ;;  %v99_v60 = vunpack.c.h.s8.bf16 %v47_v50  ;;  %v96_v63 = vunpack.c.h.s8.bf16 %v44_v55  ;;  %v59_v22 = vld [vmem:[%s781_s1 + $0xf8] sm:$0xff]  ;;  %v58_v28 = vld [vmem:[%s781_s1 + $0xf0] sm:$0xff]  ;;  %v22_v38 = vld [vmem:[%s782_s0] sm:$0xff] }
   0xc   :  { %v98_v0 = vunpack.c.h.s8.bf16 %v46_v56  ;;  %v101_v1 = vunpack.c.l.s8.bf16 %v49_v61  ;;  %v103_v2 = vunpack.c.l.s8.bf16 %v51_v62  ;;  %v100_v5 = vunpack.c.l.s8.bf16 %v48_v3  ;;  %v126_v43 = vld [vmem:[%s783_s3 + $0x10] sm:$0xff]  ;;  %v129_v49 = vld [vmem:[%s783_s3 + $0x28] sm:$0xff]  ;;  %v131_v50 = vld [vmem:[%s783_s3 + $0x38] sm:$0xff] }
   0xd   :  { %225 = vmatpush1.bf16.msra.mxu0 %v68_v18  ;;  %268 = vmatpush1.bf16.msra.mxu1 %v70_v19  ;;  %v102_v6 = vunpack.c.l.s8.bf16 %v50_v4  ;;  %v105_v7 = vunpack.c.h.s8.bf16 %v49_v61  ;;  %v107_v8 = vunpack.c.h.s8.bf16 %v51_v62  ;;  %v104_v11 = vunpack.c.h.s8.bf16 %v48_v3  ;;  %v128_v55 = vld [vmem:[%s783_s3 + $0x20] sm:$0xff]  ;;  %v130_v56 = vld [vmem:[%s783_s3 + $0x30] sm:$0xff]  ;;  %v133_v61 = vld [vmem:[%s783_s3 + $0x48] sm:$0xff] }
   0xe   :  { %226 = vmatprep.subr.bf16.mxu0 %v73_v20  ;;  %269 = vmatprep.subr.bf16.mxu1 %v75_v21  ;;  %v106_v12 = vunpack.c.h.s8.bf16 %v50_v4  ;;  %v109_v13 = vunpack.c.l.s8.bf16 %v53_v9  ;;  %v111_v14 = vunpack.c.l.s8.bf16 %v55_v10  ;;  %v108_v17 = vunpack.c.l.s8.bf16 %v52_v15  ;;  %v57_v21 = vld [vmem:[%s781_s1 + $0xe8] sm:$0xff]  ;;  %v135_v62 = vld [vmem:[%s783_s3 + $0x58] sm:$0xff]  ;;  %v134_v3 = vld [vmem:[%s783_s3 + $0x50] sm:$0xff] }
   0xf   :  { %v110_v18 = vunpack.c.l.s8.bf16 %v54_v16  ;;  %v113_v19 = vunpack.c.h.s8.bf16 %v53_v9  ;;  %v115_v20 = vunpack.c.h.s8.bf16 %v55_v10  ;;  %v112_v23 = vunpack.c.h.s8.bf16 %v52_v15  ;;  %v139_v9 = vld [vmem:[%s783_s3 + $0x78] sm:$0xff]  ;;  %v138_v15 = vld [vmem:[%s783_s3 + $0x70] sm:$0xff] }
  0x10   :  { %v118_v30 = vunpack.c.l.s8.bf16 %v58_v28  ;;  %v121_v31 = vunpack.c.h.s8.bf16 %v57_v21  ;;  %v122_v37 = vunpack.c.h.s8.bf16 %v58_v28 }
  0x11   :  { %227 = vmatpush1.bf16.msra.mxu0 %v72_v24  ;;  %270 = vmatpush1.bf16.msra.mxu1 %v74_v25  ;;  %v114_v24 = vunpack.c.h.s8.bf16 %v54_v16  ;;  %v117_v25 = vunpack.c.l.s8.bf16 %v57_v21  ;;  %v143_v21 = vld [vmem:[%s783_s3 + $0x98] sm:$0xff] }
  0x12   :  { %228 = vmatprep.subr.bf16.mxu0 %v77_v26  ;;  %271 = vmatprep.subr.bf16.mxu1 %v79_v27  ;;  %v119_v26 = vunpack.c.l.s8.bf16 %v59_v22  ;;  %v56_v27 = vld [vmem:[%s781_s1 + $0xe0] sm:$0xff] }
  0x13   :  { %v116_v29 = vunpack.c.l.s8.bf16 %v56_v27 }
  0x15   :  { %229 = vmatpush1.bf16.msra.mxu0 %v76_v32  ;;  %272 = vmatpush1.bf16.msra.mxu1 %v78_v33  ;;  %v123_v32 = vunpack.c.h.s8.bf16 %v59_v22  ;;  %v125_v33 = vld [vmem:[%s783_s3 + $0x8] sm:$0xff] }
  0x16   :  { %230 = vmatprep.subr.bf16.mxu0 %v81_v34  ;;  %273 = vmatprep.subr.bf16.mxu1 %v83_v35  ;;  %v127_v34 = vld [vmem:[%s783_s3 + $0x18] sm:$0xff]  ;;  %v120_v35 = vunpack.c.h.s8.bf16 %v56_v27  ;;  %v142_v27 = vld [vmem:[%s783_s3 + $0x90] sm:$0xff] }
  0x19   :  { %231 = vmatpush1.bf16.msra.mxu0 %v80_v39  ;;  %274 = vmatpush1.bf16.msra.mxu1 %v82_v40  ;;  %v24_v39 = vld [vmem:[%s782_s0 + $0x10] sm:$0xff]  ;;  %v157_v40 = vunpack.c.l.s8.bf16 %v125_v33 }
  0x1a   :  { %232 = vmatprep.subr.bf16.mxu0 %v85_v41  ;;  %275 = vmatprep.subr.bf16.mxu1 %v87_v42  ;;  %v159_v41 = vunpack.c.l.s8.bf16 %v127_v34  ;;  %v124_v42 = vld [vmem:[%s783_s3] sm:$0xff]  ;;  %v635_v44 = vpack.c.bf16 %v24_v39, %v22_v38 }
  0x1b   :  { %v144_v39 = vld [vmem:[%s783_s3 + $0xa0] sm:$0xff] }
  0x1d   :  { %233 = vmatpush1.bf16.msra.mxu0 %v84_v45  ;;  %276 = vmatpush1.bf16.msra.mxu1 %v86_v46  ;;  %v156_v45 = vunpack.c.l.s8.bf16 %v124_v42  ;;  %v158_v46 = vunpack.c.l.s8.bf16 %v126_v43 }
  0x1e   :  { %234 = vmatprep.subr.bf16.mxu0 %v89_v47  ;;  %277 = vmatprep.subr.bf16.mxu1 %v91_v48  ;;  %v161_v47 = vunpack.c.h.s8.bf16 %v125_v33  ;;  %v163_v48 = vunpack.c.h.s8.bf16 %v127_v34  ;;  %v147_v33 = vld [vmem:[%s783_s3 + $0xb8] sm:$0xff] }
  0x1f   :  { %v199_v38 = vunpack.c.l.s8.bf16 %v147_v33 }
  0x21   :  { %235 = vmatpush1.bf16.msra.mxu0 %v88_v51  ;;  %278 = vmatpush1.bf16.msra.mxu1 %v90_v52  ;;  %v160_v51 = vunpack.c.h.s8.bf16 %v124_v42  ;;  %v162_v52 = vunpack.c.h.s8.bf16 %v126_v43 }
  0x22   :  { %236 = vmatprep.subr.bf16.mxu0 %v93_v53  ;;  %279 = vmatprep.subr.bf16.mxu1 %v95_v54  ;;  %v165_v53 = vunpack.c.l.s8.bf16 %v129_v49  ;;  %v167_v54 = vunpack.c.l.s8.bf16 %v131_v50 }
  0x25   :  { %237 = vmatpush1.bf16.msra.mxu0 %v92_v57  ;;  %280 = vmatpush1.bf16.msra.mxu1 %v94_v58  ;;  %v164_v57 = vunpack.c.l.s8.bf16 %v128_v55  ;;  %v166_v58 = vunpack.c.l.s8.bf16 %v130_v56 }
  0x26   :  { %238 = vmatprep.subr.bf16.mxu0 %v97_v59  ;;  %281 = vmatprep.subr.bf16.mxu1 %v99_v60  ;;  %v169_v59 = vunpack.c.h.s8.bf16 %v129_v49  ;;  %v171_v60 = vunpack.c.h.s8.bf16 %v131_v50 }
  0x29   :  { %239 = vmatpush1.bf16.msra.mxu0 %v96_v63  ;;  %282 = vmatpush1.bf16.msra.mxu1 %v98_v0  ;;  %v168_v63 = vunpack.c.h.s8.bf16 %v128_v55  ;;  %v173_v0 = vunpack.c.l.s8.bf16 %v133_v61 }
  0x2a   :  { %240 = vmatprep.subr.bf16.mxu0 %v101_v1  ;;  %283 = vmatprep.subr.bf16.mxu1 %v103_v2  ;;  %v175_v1 = vunpack.c.l.s8.bf16 %v135_v62  ;;  %v132_v2 = vld [vmem:[%s783_s3 + $0x40] sm:$0xff] }
  0x2b   :  { %v172_v4 = vunpack.c.l.s8.bf16 %v132_v2  ;;  %v176_v10 = vunpack.c.h.s8.bf16 %v132_v2 }
  0x2d   :  { %241 = vmatpush1.bf16.msra.mxu0 %v100_v5  ;;  %284 = vmatpush1.bf16.msra.mxu1 %v102_v6  ;;  %v174_v5 = vunpack.c.l.s8.bf16 %v134_v3  ;;  %v177_v6 = vunpack.c.h.s8.bf16 %v133_v61 }
  0x2e   :  { %242 = vmatprep.subr.bf16.mxu0 %v105_v7  ;;  %285 = vmatprep.subr.bf16.mxu1 %v107_v8  ;;  %v179_v7 = vunpack.c.h.s8.bf16 %v135_v62  ;;  %v137_v8 = vld [vmem:[%s783_s3 + $0x68] sm:$0xff] }
  0x31   :  { %243 = vmatpush1.bf16.msra.mxu0 %v104_v11  ;;  %286 = vmatpush1.bf16.msra.mxu1 %v106_v12  ;;  %v178_v11 = vunpack.c.h.s8.bf16 %v134_v3  ;;  %v181_v12 = vunpack.c.l.s8.bf16 %v137_v8 }
  0x32   :  { %244 = vmatprep.subr.bf16.mxu0 %v109_v13  ;;  %287 = vmatprep.subr.bf16.mxu1 %v111_v14  ;;  %v183_v13 = vunpack.c.l.s8.bf16 %v139_v9  ;;  %v136_v14 = vld [vmem:[%s783_s3 + $0x60] sm:$0xff] }
  0x33   :  { %v180_v16 = vunpack.c.l.s8.bf16 %v136_v14  ;;  %v184_v22 = vunpack.c.h.s8.bf16 %v136_v14 }
  0x35   :  { %245 = vmatpush1.bf16.msra.mxu0 %v108_v17  ;;  %288 = vmatpush1.bf16.msra.mxu1 %v110_v18  ;;  %v182_v17 = vunpack.c.l.s8.bf16 %v138_v15  ;;  %v185_v18 = vunpack.c.h.s8.bf16 %v137_v8 }
  0x36   :  { %246 = vmatprep.subr.bf16.mxu0 %v113_v19  ;;  %289 = vmatprep.subr.bf16.mxu1 %v115_v20  ;;  %v187_v19 = vunpack.c.h.s8.bf16 %v139_v9  ;;  %v141_v20 = vld [vmem:[%s783_s3 + $0x88] sm:$0xff] }
  0x39   :  { %247 = vmatpush1.bf16.msra.mxu0 %v112_v23  ;;  %290 = vmatpush1.bf16.msra.mxu1 %v114_v24  ;;  %v186_v23 = vunpack.c.h.s8.bf16 %v138_v15  ;;  %v189_v24 = vunpack.c.l.s8.bf16 %v141_v20 }
  0x3a   :  { %248 = vmatprep.subr.bf16.mxu0 %v117_v25  ;;  %291 = vmatprep.subr.bf16.mxu1 %v119_v26  ;;  %v191_v25 = vunpack.c.l.s8.bf16 %v143_v21  ;;  %v140_v26 = vld [vmem:[%s783_s3 + $0x80] sm:$0xff] }
  0x3b   :  { %v188_v28 = vunpack.c.l.s8.bf16 %v140_v26  ;;  %v192_v34 = vunpack.c.h.s8.bf16 %v140_v26 }
  0x3d   :  { %249 = vmatpush1.bf16.msra.mxu0 %v116_v29  ;;  %292 = vmatpush1.bf16.msra.mxu1 %v118_v30  ;;  %v190_v29 = vunpack.c.l.s8.bf16 %v142_v27  ;;  %v193_v30 = vunpack.c.h.s8.bf16 %v141_v20 }
  0x3e   :  { %250 = vmatprep.subr.bf16.mxu0 %v121_v31  ;;  %293 = vmatprep.subr.bf16.mxu1 %v123_v32  ;;  %v195_v31 = vunpack.c.h.s8.bf16 %v143_v21  ;;  %v145_v32 = vld [vmem:[%s783_s3 + $0xa8] sm:$0xff] }
  0x3f   :  { %v201_v43 = vunpack.c.h.s8.bf16 %v145_v32 }
  0x41   :  { %251 = vmatpush1.bf16.msra.mxu0 %v120_v35  ;;  %294 = vmatpush1.bf16.msra.mxu1 %v122_v37  ;;  %v194_v35 = vunpack.c.h.s8.bf16 %v142_v27  ;;  %v197_v37 = vunpack.c.l.s8.bf16 %v145_v32 }
  0x42   :  { %344 = vmatprep.subr.bf16.mxu0 %v157_v40  ;;  %387 = vmatprep.subr.bf16.mxu1 %v159_v41  ;;  %v146_v40 = vld [vmem:[%s783_s3 + $0xb0] sm:$0xff]  ;;  %v196_v41 = vunpack.c.l.s8.bf16 %v144_v39 }
  0x43   :  { %v198_v42 = vunpack.c.l.s8.bf16 %v146_v40  ;;  %v202_v49 = vunpack.c.h.s8.bf16 %v146_v40 }
  0x44   :  { %253 = vmatmul.mubr.bf16.vlgmr.msra.gmra.mrb[0].mxu0 %v635_v44  ;;  %296 = vmatmul.mubr.bf16.vlgmr.msra.gmra.mrb[0].mxu1 %v635_v44 }
  0x45   :  { %345 = vmatpush1.bf16.msra.mxu0 %v156_v45  ;;  %388 = vmatpush1.bf16.msra.mxu1 %v158_v46  ;;  %v203_v45 = vunpack.c.h.s8.bf16 %v147_v33  ;;  %v149_v46 = vld [vmem:[%s783_s3 + $0xc8] sm:$0xff]  ;;  %v430_v33 = vld [vmem:[%s786_s4] sm:$0xf] }
  0x46   :  { %346 = vmatprep.subr.bf16.mxu0 %v161_v47  ;;  %389 = vmatprep.subr.bf16.mxu1 %v163_v48  ;;  %v151_v47 = vld [vmem:[%s783_s3 + $0xd8] sm:$0xff]  ;;  %v200_v48 = vunpack.c.h.s8.bf16 %v144_v39  ;;  %v205_v50 = vunpack.c.l.s8.bf16 %v149_v46 }
  0x47   :  { %376 = vmatprep.mubr.bf16.mxu0 %v553_v36  ;;  %419 = vmatprep.mubr.bf16.mxu1 %v553_v36  ;;  %v170_v36 = vunpack.c.h.s8.bf16 %v130_v56  ;;  %v209_v56 = vunpack.c.h.s8.bf16 %v149_v46 }
  0x49   :  { %347 = vmatpush1.bf16.msra.mxu0 %v160_v51  ;;  %390 = vmatpush1.bf16.msra.mxu1 %v162_v52  ;;  %v207_v51 = vunpack.c.l.s8.bf16 %v151_v47  ;;  %v148_v52 = vld [vmem:[%s783_s3 + $0xc0] sm:$0xff] }
  0x4a   :  { %348 = vmatprep.subr.bf16.mxu0 %v165_v53  ;;  %391 = vmatprep.subr.bf16.mxu1 %v167_v54  ;;  %v150_v53 = vld [vmem:[%s783_s3 + $0xd0] sm:$0xff]  ;;  %v204_v54 = vunpack.c.l.s8.bf16 %v148_v52 }
  0x4b   :  { %v206_v55 = vunpack.c.l.s8.bf16 %v150_v53  ;;  %v210_v61 = vunpack.c.h.s8.bf16 %v150_v53 }
  0x4d   :  { %349 = vmatpush1.bf16.msra.mxu0 %v164_v57  ;;  %392 = vmatpush1.bf16.msra.mxu1 %v166_v58  ;;  %v211_v57 = vunpack.c.h.s8.bf16 %v151_v47  ;;  %v153_v58 = vld [vmem:[%s783_s3 + $0xe8] sm:$0xff] }
  0x4e   :  { %350 = vmatprep.subr.bf16.mxu0 %v169_v59  ;;  %393 = vmatprep.subr.bf16.mxu1 %v171_v60  ;;  %v155_v59 = vld [vmem:[%s783_s3 + $0xf8] sm:$0xff]  ;;  %v208_v60 = vunpack.c.h.s8.bf16 %v148_v52  ;;  %v213_v62 = vunpack.c.l.s8.bf16 %v153_v58  ;;  %v217_v3 = vunpack.c.h.s8.bf16 %v153_v58 }
  0x51   :  { %351 = vmatpush1.bf16.msra.mxu0 %v168_v63  ;;  %394 = vmatpush1.bf16.msra.mxu1 %v170_v36  ;;  %v215_v63 = vunpack.c.l.s8.bf16 %v155_v59  ;;  %v152_v36 = vld [vmem:[%s783_s3 + $0xe0] sm:$0xff] }
  0x52   :  { %352 = vmatprep.subr.bf16.mxu0 %v173_v0  ;;  %395 = vmatprep.subr.bf16.mxu1 %v175_v1  ;;  %v154_v0 = vld [vmem:[%s783_s3 + $0xf0] sm:$0xff]  ;;  %v212_v1 = vunpack.c.l.s8.bf16 %v152_v36 }
  0x53   :  { %v214_v2 = vunpack.c.l.s8.bf16 %v154_v0 }
  0x55   :  { %353 = vmatpush1.bf16.msra.mxu0 %v172_v4  ;;  %396 = vmatpush1.bf16.msra.mxu1 %v174_v5  ;;  %v219_v4 = vunpack.c.h.s8.bf16 %v155_v59  ;;  %v216_v5 = vunpack.c.h.s8.bf16 %v152_v36 }
  0x56   :  { %354 = vmatprep.subr.bf16.mxu0 %v177_v6  ;;  %397 = vmatprep.subr.bf16.mxu1 %v179_v7  ;;  %v218_v6 = vunpack.c.h.s8.bf16 %v154_v0  ;;  %v308_v7 = vlaneseq }
  0x58   :  { %v309_v8 = vshrl.u32 %v308_v7, 7 }
  0x59   :  { %355 = vmatpush1.bf16.msra.mxu0 %v176_v10  ;;  %398 = vmatpush1.bf16.msra.mxu1 %v178_v11  ;;  %v306_v11 = vld [vmem:[%s784_s2] sm:$0xf] }
  0x5a   :  { %356 = vmatprep.subr.bf16.mxu0 %v181_v12  ;;  %399 = vmatprep.subr.bf16.mxu1 %v183_v13  ;;  %v310_v9 = vsub.s32 0, %v309_v8  ;;  %v318_v10 = vsub.s32 2, %v309_v8  ;;  %v314_v12 = vsub.s32 1, %v309_v8  ;;  %v322_v13 = vsub.s32 3, %v309_v8 }
  0x5c   :  { %v311_v14 = vrot.slane %v306_v11, %v310_v9  ;;  %v319_v15 = vrot.slane %v306_v11, %v318_v10 }
  0x5d   :  { %357 = vmatpush1.bf16.msra.mxu0 %v180_v16  ;;  %400 = vmatpush1.bf16.msra.mxu1 %v182_v17  ;;  %v315_v16 = vrot.slane %v306_v11, %v314_v12  ;;  %v323_v17 = vrot.slane %v306_v11, %v322_v13 }
  0x5e   :  { %358 = vmatprep.subr.bf16.mxu0 %v185_v18  ;;  %401 = vmatprep.subr.bf16.mxu1 %v187_v19 }
  0x61   :  { %359 = vmatpush1.bf16.msra.mxu0 %v184_v22  ;;  %402 = vmatpush1.bf16.msra.mxu1 %v186_v23 }
  0x62   :  { %360 = vmatprep.subr.bf16.mxu0 %v189_v24  ;;  %403 = vmatprep.subr.bf16.mxu1 %v191_v25 }
  0x65   :  { %361 = vmatpush1.bf16.msra.mxu0 %v188_v28  ;;  %404 = vmatpush1.bf16.msra.mxu1 %v190_v29 }
  0x66   :  { %362 = vmatprep.subr.bf16.mxu0 %v193_v30  ;;  %405 = vmatprep.subr.bf16.mxu1 %v195_v31 }
  0x69   :  { %363 = vmatpush1.bf16.msra.mxu0 %v192_v34  ;;  %406 = vmatpush1.bf16.msra.mxu1 %v194_v35  ;;  %v435_v34 = vrot.slane %v430_v33, %v310_v9  ;;  %v443_v35 = vrot.slane %v430_v33, %v318_v10 }
  0x6a   :  { %364 = vmatprep.subr.bf16.mxu0 %v197_v37  ;;  %407 = vmatprep.subr.bf16.mxu1 %v199_v38  ;;  %v439_v37 = vrot.slane %v430_v33, %v314_v12  ;;  %v447_v38 = vrot.slane %v430_v33, %v322_v13 }
  0x6d   :  { %365 = vmatpush1.bf16.msra.mxu0 %v196_v41  ;;  %408 = vmatpush1.bf16.msra.mxu1 %v198_v42 }
  0x6e   :  { %366 = vmatprep.subr.bf16.mxu0 %v201_v43  ;;  %409 = vmatprep.subr.bf16.mxu1 %v203_v45 }
  0x71   :  { %367 = vmatpush1.bf16.msra.mxu0 %v200_v48  ;;  %410 = vmatpush1.bf16.msra.mxu1 %v202_v49 }
  0x72   :  { %368 = vmatprep.subr.bf16.mxu0 %v205_v50  ;;  %411 = vmatprep.subr.bf16.mxu1 %v207_v51 }
  0x75   :  { %369 = vmatpush1.bf16.msra.mxu0 %v204_v54  ;;  %412 = vmatpush1.bf16.msra.mxu1 %v206_v55 }
  0x76   :  { %370 = vmatprep.subr.bf16.mxu0 %v209_v56  ;;  %413 = vmatprep.subr.bf16.mxu1 %v211_v57 }
  0x79   :  { %371 = vmatpush1.bf16.msra.mxu0 %v208_v60  ;;  %414 = vmatpush1.bf16.msra.mxu1 %v210_v61 }
  0x7a   :  { %372 = vmatprep.subr.bf16.mxu0 %v213_v62  ;;  %415 = vmatprep.subr.bf16.mxu1 %v215_v63 }
  0x7d   :  { %373 = vmatpush1.bf16.msra.mxu0 %v212_v1  ;;  %416 = vmatpush1.bf16.msra.mxu1 %v214_v2 }
  0x7e   :  { %374 = vmatprep.subr.bf16.mxu0 %v217_v3  ;;  %417 = vmatprep.subr.bf16.mxu1 %v219_v4 }
  0x81   :  { %375 = vmatpush1.bf16.msra.mxu0 %v216_v5  ;;  %418 = vmatpush1.bf16.msra.mxu1 %v218_v6 }
  0x84   :  { %377 = vmatmul.mubr.bf16.vlgmr.msra.gmra.mrb[4].mxu0 %v635_v44  ;;  %420 = vmatmul.mubr.bf16.vlgmr.msra.gmra.mrb[4].mxu1 %v635_v44 }
 0x117   :  { %v254_v18 = vpop.f32.mrb[0].mxu0  ;;  %v297_v19 = vpop.f32.mrb[0].mxu1 }
 0x118   :  { %v328_v20 = vmul.f32 %v311_v14, %v254_v18  ;;  %v330_v21 = vmul.f32 %v319_v15, %v297_v19  ;;  %v256_v22 = vpop.f32.mrb[1].mxu0  ;;  %v299_v44 = vpop.f32.mrb[1].mxu1 }
 0x119   :  { %v329_v23 = vmul.f32 %v315_v16, %v256_v22  ;;  %v331_v24 = vmul.f32 %v323_v17, %v299_v44  ;;  %v258_v25 = vpop.f32.mrb[2].mxu0  ;;  %v301_v26 = vpop.f32.mrb[2].mxu1 }
 0x11a   :  { %336 = vst [vmem:[%s785_s5] sm:$0xff] %v328_v20  ;;  %338 = vst [vmem:[%s785_s5 + $0x10] sm:$0xff] %v330_v21  ;;  %v332_v27 = vmul.f32 %v311_v14, %v258_v25  ;;  %v334_v28 = vmul.f32 %v319_v15, %v301_v26  ;;  %v260_v29 = vpop.f32.mrb[3].mxu0  ;;  %v303_v30 = vpop.f32.mrb[3].mxu1 }
 0x11b   :  { %337 = vst [vmem:[%s785_s5 + $0x8] sm:$0xff] %v329_v23  ;;  %339 = vst [vmem:[%s785_s5 + $0x18] sm:$0xff] %v331_v24  ;;  %v333_v31 = vmul.f32 %v315_v16, %v260_v29  ;;  %v335_v32 = vmul.f32 %v323_v17, %v303_v30 }
 0x11c   :  { %340 = vst [vmem:[%s785_s5 + $0x20] sm:$0xff] %v332_v27  ;;  %342 = vst [vmem:[%s785_s5 + $0x30] sm:$0xff] %v334_v28 }
 0x11d   :  { %341 = vst [vmem:[%s785_s5 + $0x28] sm:$0xff] %v333_v31  ;;  %343 = vst [vmem:[%s785_s5 + $0x38] sm:$0xff] %v335_v32 }
 0x157   :  { %v378_v39 = vpop.f32.mrb[4].mxu0  ;;  %v421_v40 = vpop.f32.mrb[4].mxu1 }
 0x158   :  { %v452_v41 = vmul.f32 %v435_v34, %v378_v39  ;;  %v454_v42 = vmul.f32 %v443_v35, %v421_v40  ;;  %v380_v43 = vpop.f32.mrb[5].mxu0  ;;  %v423_v45 = vpop.f32.mrb[5].mxu1 }
 0x159   :  { %v453_v46 = vmul.f32 %v439_v37, %v380_v43  ;;  %v455_v47 = vmul.f32 %v447_v38, %v423_v45  ;;  %v382_v48 = vpop.f32.mrb[6].mxu0  ;;  %v425_v49 = vpop.f32.mrb[6].mxu1 }
 0x15a   :  { %460 = vst [vmem:[%s787_s6] sm:$0xff] %v452_v41  ;;  %462 = vst [vmem:[%s787_s6 + $0x10] sm:$0xff] %v454_v42  ;;  %v456_v50 = vmul.f32 %v435_v34, %v382_v48  ;;  %v458_v51 = vmul.f32 %v443_v35, %v425_v49  ;;  %v384_v52 = vpop.f32.mrb[7].mxu0  ;;  %v427_v53 = vpop.f32.mrb[7].mxu1 }
 0x15b   :  { %461 = vst [vmem:[%s787_s6 + $0x8] sm:$0xff] %v453_v46  ;;  %463 = vst [vmem:[%s787_s6 + $0x18] sm:$0xff] %v455_v47  ;;  %v457_v54 = vmul.f32 %v439_v37, %v384_v52  ;;  %v459_v55 = vmul.f32 %v447_v38, %v427_v53 }
 0x15c   :  { %464 = vst [vmem:[%s787_s6 + $0x20] sm:$0xff] %v456_v50  ;;  %466 = vst [vmem:[%s787_s6 + $0x30] sm:$0xff] %v458_v51 }
 0x15d   :  { %465 = vst [vmem:[%s787_s6 + $0x28] sm:$0xff] %v457_v54  ;;  %467 = vst [vmem:[%s787_s6 + $0x38] sm:$0xff] %v459_v55 }

// kernel: mamba_bit_forward.49
= control target key start
LH: loop header
LB: loop body
LE: loop exit
PB: predicated region body
PF: predicated region fallthrough
CT: control target
= control target key end

     0   :  { %v57_v40 = vlaneseq  ;;  %s419_s0 = inlined_call_operand.vmem [shape: f32[16,256], index: 0, kind: input, shape index: {}]   ;;  %s420_s3 = inlined_call_operand.vmem [shape: bf16[256,128], index: 3, kind: input, shape index: {}]   ;;  %s421_s1 = inlined_call_operand.vmem [shape: f32[1,256], index: 1, kind: input, shape index: {}]   ;;  %s422_s2 = inlined_call_operand.vmem [shape: f32[1,256], index: 2, kind: input, shape index: {}]   ;;  %s423_s4 = inlined_call_operand.vmem [shape: f32[16,128], index: 4, kind: output, shape index: {}]  }
   0x1   :  { %v18_v0 = vld [vmem:[%s419_s0] sm:$0xff]  ;;  %v19_v1 = vld [vmem:[%s419_s0 + $0x8] sm:$0xff]  ;;  %v20_v2 = vld [vmem:[%s419_s0 + $0x10] sm:$0xff] }
   0x2   :  { %v22_v3 = vadd.f32 %v19_v1, %v18_v0  ;;  %v21_v4 = vld [vmem:[%s419_s0 + $0x18] sm:$0xff]  ;;  %v302_v6 = vld [vmem:[%s420_s3 + $0x40] sm:$0xff]   ;;  %v304_v22 = vld [vmem:[%s420_s3 + $0x48] sm:$0xff]   ;;  %v58_v43 = vshrl.u32 %v57_v40, 7 }
   0x3   :  { %v25_v5 = vadd.f32 %v21_v4, %v20_v2  ;;  %v303_v7 = vld [vmem:[%s420_s3] sm:$0xff]   ;;  %280 = vmatprep.subr.bf16.mxu0 %v302_v6  ;;  %v305_v23 = vld [vmem:[%s420_s3 + $0x8] sm:$0xff]   ;;  %v306_v24 = vld [vmem:[%s420_s3 + $0x50] sm:$0xff]  }
   0x4   :  { %23 = vadd.xlane.f32.xlu0 %v22_v3  ;;  %281 = vmatpush3.bf16.msra.mxu0 %v303_v7  ;;  %v307_v25 = vld [vmem:[%s420_s3 + $0x10] sm:$0xff]   ;;  %v308_v26 = vld [vmem:[%s420_s3 + $0x58] sm:$0xff]   ;;  %v310_v28 = vld [vmem:[%s420_s3 + $0x60] sm:$0xff]   ;;  %v59_v44 = vsub.s32 0, %v58_v43  ;;  %v63_v45 = vsub.s32 1, %v58_v43 }
   0x5   :  { %282 = vmatprep.subr.bf16.mxu0 %v304_v22  ;;  %v309_v27 = vld [vmem:[%s420_s3 + $0x18] sm:$0xff]   ;;  %v311_v29 = vld [vmem:[%s420_s3 + $0x20] sm:$0xff]   ;;  %v312_v30 = vld [vmem:[%s420_s3 + $0x68] sm:$0xff]  }
   0x6   :  { %v313_v31 = vld [vmem:[%s420_s3 + $0x28] sm:$0xff]   ;;  %v314_v32 = vld [vmem:[%s420_s3 + $0x70] sm:$0xff]   ;;  %v316_v34 = vld [vmem:[%s420_s3 + $0x78] sm:$0xff]  }
   0x7   :  { %v315_v33 = vld [vmem:[%s420_s3 + $0x30] sm:$0xff]   ;;  %v317_v35 = vld [vmem:[%s420_s3 + $0x38] sm:$0xff]   ;;  %v55_v46 = vld [vmem:[%s421_s1] sm:$0x3] }
   0x8   :  { %26 = vadd.xlane.f32.xlu0 %v25_v5  ;;  %283 = vmatpush3.bf16.msra.mxu0 %v305_v23  ;;  %v60_v49 = vrot.slane %v55_v46, %v59_v44  ;;  %v64_v50 = vrot.slane %v55_v46, %v63_v45  ;;  %v71_v51 = vld [vmem:[%s422_s2] sm:$0x3] }
   0x9   :  { %284 = vmatprep.subr.bf16.mxu0 %v306_v24  ;;  %v76_v54 = vrot.slane %v71_v51, %v59_v44  ;;  %v80_v55 = vrot.slane %v71_v51, %v63_v45 }
   0xc   :  { %285 = vmatpush3.bf16.msra.mxu0 %v307_v25 }
   0xd   :  { %286 = vmatprep.subr.bf16.mxu0 %v308_v26 }
  0x10   :  { %287 = vmatpush3.bf16.msra.mxu0 %v309_v27 }
  0x11   :  { %288 = vmatprep.subr.bf16.mxu0 %v310_v28 }
  0x14   :  { %289 = vmatpush3.bf16.msra.mxu0 %v311_v29 }
  0x15   :  { %290 = vmatprep.subr.bf16.mxu0 %v312_v30 }
  0x18   :  { %291 = vmatpush3.bf16.msra.mxu0 %v313_v31 }
  0x19   :  { %292 = vmatprep.subr.bf16.mxu0 %v314_v32 }
  0x1c   :  { %293 = vmatpush3.bf16.msra.mxu0 %v315_v33 }
  0x1d   :  { %294 = vmatprep.subr.bf16.mxu0 %v316_v34 }
  0x20   :  { %295 = vmatpush3.bf16.msra.mxu0 %v317_v35 }
  0x91   :  { %v24_v8 = vpop.xlane.xlu0 %23 }
  0x92   :  { %v29_v9 = vmul.f32 0.00390625, %v24_v8 }
  0x94   :  { %v31_v10 = vsub.f32 %v18_v0, %v29_v9  ;;  %v32_v11 = vsub.f32 %v19_v1, %v29_v9 }
  0x95   :  { %v27_v12 = vpop.xlane.xlu0 %26 }
  0x96   :  { %v30_v13 = vmul.f32 0.00390625, %v27_v12  ;;  %v35_v14 = vmul.f32 %v31_v10, %v31_v10  ;;  %v36_v15 = vmul.f32 %v32_v11, %v32_v11 }
  0x98   :  { %v33_v16 = vsub.f32 %v20_v2, %v30_v13  ;;  %v34_v17 = vsub.f32 %v21_v4, %v30_v13  ;;  %v39_v18 = vadd.f32 %v36_v15, %v35_v14 }
  0x9a   :  { %40 = vadd.xlane.f32.xlu1 %v39_v18  ;;  %v37_v19 = vmul.f32 %v33_v16, %v33_v16  ;;  %v38_v20 = vmul.f32 %v34_v17, %v34_v17 }
  0x9c   :  { %v42_v21 = vadd.f32 %v38_v20, %v37_v19 }
  0x9e   :  { %43 = vadd.xlane.f32.xlu1 %v42_v21 }
 0x127   :  { %v41_v36 = vpop.xlane.xlu1 %40 }
 0x128   :  { %v45_v37 = vmul.f32 0.00390625, %v41_v36 }
 0x12a   :  { %v47_v38 = vadd.f32 1e-05, %v45_v37 }
 0x12b   :  { %v44_v39 = vpop.xlane.xlu1 %43 }
 0x12c   :  { %318 = vrsqrt.f32 %v47_v38  ;;  %v46_v41 = vmul.f32 0.00390625, %v44_v39 }
 0x12e   :  { %v48_v42 = vadd.f32 1e-05, %v46_v41 }
 0x130   :  { %320 = vrsqrt.f32 %v48_v42 }
 0x136   :  { %v319_v47 = vpop.eup %318 }
 0x137   :  { %v52_v48 = vmul.f32 %v319_v47, %v32_v11  ;;  %v51_v52 = vmul.f32 %v319_v47, %v31_v10 }
 0x139   :  { %v68_v57 = vmul.f32 %v64_v50, %v52_v48  ;;  %v67_v59 = vmul.f32 %v60_v49, %v51_v52 }
 0x13a   :  { %v321_v53 = vpop.eup %320 }
 0x13b   :  { %v54_v56 = vmul.f32 %v321_v53, %v34_v17  ;;  %v53_v58 = vmul.f32 %v321_v53, %v33_v16  ;;  %v84_v62 = vadd.f32 %v80_v55, %v68_v57  ;;  %v83_v0 = vadd.f32 %v76_v54, %v67_v59 }
 0x13d   :  { %v70_v60 = vmul.f32 %v64_v50, %v54_v56  ;;  %v69_v61 = vmul.f32 %v60_v49, %v53_v58 }
 0x13f   :  { %v86_v63 = vadd.f32 %v80_v55, %v70_v60  ;;  %v85_v1 = vadd.f32 %v76_v54, %v69_v61 }
 0x141   :  { %v88_v2 = vpack.c.bf16 %v86_v63, %v84_v62  ;;  %v87_v3 = vpack.c.bf16 %v85_v1, %v83_v0 }
 0x143   :  { %249 = vmatprep.mubr.bf16.mxu0 %v88_v2 }
 0x144   :  { %250 = vmatmul.mubr.bf16.vlgmr.msra.gmra.mrb[0].mxu0 %v87_v3 }
 0x217   :  { %v296_v4 = vpop.f32.mrb[0].mxu0 }
 0x218   :  { %v297_v5 = vpop.f32.mrb[1].mxu0 }
 0x219   :  { %v298_v6 = vadd.f32 %v297_v5, %v296_v4  ;;  %v299_v7 = vpop.f32.mrb[2].mxu0 }
 0x21a   :  { %v300_v8 = vpop.f32.mrb[3].mxu0 }
 0x21b   :  { %258 = vst [vmem:[%s423_s4] sm:$0xff] %v298_v6  ;;  %v301_v9 = vadd.f32 %v300_v8, %v299_v7 }
 0x21d   :  { %259 = vst [vmem:[%s423_s4 + $0x8] sm:$0xff] %v301_v9 }

// kernel: mamba_bit_forward.29
= control target key start
LH: loop header
LB: loop body
LE: loop exit
PB: predicated region body
PF: predicated region fallthrough
CT: control target
= control target key end

     0   :  { %s2488_s24 = smov 0   ;;  %s2490_s25 = smov 0   ;;  %s3620_s0 = inlined_call_operand.vmem [shape: f32[2,8,512], index: 0, kind: input, shape index: {}]   ;;  %s3621_s1 = inlined_call_operand.vmem [shape: f32[2,8,512], index: 1, kind: input, shape index: {}]   ;;  %s3622_s2 = inlined_call_operand.vmem [shape: f32[2,8,512], index: 2, kind: input, shape index: {}]   ;;  %s3623_s3 = inlined_call_operand.vmem [shape: f32[2,8,16,1], index: 3, kind: input, shape index: {}]   ;;  %s3624_s4 = inlined_call_operand.vmem [shape: f32[2,8,16,1], index: 4, kind: input, shape index: {}]   ;;  %s3625_s5 = inlined_call_operand.vmem [shape: f32[16,512], index: 5, kind: input, shape index: {}]   ;;  %s3626_s6 = inlined_call_operand.vmem [shape: f32[1,512], index: 6, kind: input, shape index: {}]   ;;  %s3627_s7 = inlined_call_operand.vmem [shape: f32[2,8,512], index: 7, kind: output, shape index: {}]  }
   0x1   :  { %s2492_s26 = smov 0  }
   0x2 LB: > { %s29_s27 = sadd.s32 1, %s2440_s25  ;;  %p2174_p0 = scmp.ge.s32.totalorder %s2444_s26, 1  ;;  %s2444_s26 = sphi %s2492_s26, %s17_s26   ;;  %s2440_s25 = sphi %s2490_s25, %s3832_s25   ;;  %s2436_s24 = sphi %s2488_s24, %s3831_s24  }
   0x3   : > { %p31_p1 = scmp.ge.s32.totalorder %s29_s27, 2  ;;  %p333_p2 = scmp.lt.s32.totalorder %s2444_s26, 3 }
   0x5   : > { %s3834_s27 = smov (%p31_p1, %s29_s27), 0  ;;  %p334_p3 = pnand %p2174_p0, %p333_p2 }
   0x7   : > { %337 = sbr.rel (%p334_p3) target bundleno = 310 (0x136), region = 48 }
   0xe   : > { %p411_p4 = scmp.lt.s32.totalorder %s2436_s24, 1  ;;  %v2446_v0 = vmov 0   ;;  %v3628_v5 = vlaneseq  ;;  %v1924_v26 = vld [vmem:[%s3626_s6] sm:$0xf] }
   0xf   : > { %2257 = vset.pattern.permute.xlu1 %v2446_v0  ;;  %2256 = vset.pattern.permute.xlu0 %v2446_v0 }
  0x10   : > { %s3836_s24 = smov (!%p411_p4, %s2436_s24), 1  ;;  %v2526_v8 = vshrl.u32 %v3628_v5, 7 }
  0x11   : > { %s2227_s28 = sshll.u32 %s3836_s24, 7  ;;  %s2523_s9 = sshll.u32 %s3836_s24, 5 }
  0x12   : > { %s2514_s8 = scalar_lea.vmem %s3623_s3, %s2227_s28  ;;  %s428_s12 = scalar_lea.vmem %s3621_s1, %s2523_s9  ;;  %v2541_v14 = vsub.s32 1, %v2526_v8  ;;  %v2547_v17 = vsub.s32 0, %v2526_v8  ;;  %v2550_v18 = vsub.s32 2, %v2526_v8  ;;  %v2562_v25 = vsub.s32 3, %v2526_v8 }
  0x13   : > { %v2187_v1 = vld [vmem:[%s2514_s8 + $0x10] sm:$0xff]  ;;  %v575_v2 = vld [vmem:[%s2514_s8] sm:$0xff]  ;;  %v2188_v3 = vld [vmem:[%s2514_s8 + $0x18] sm:$0xff]  ;;  %s418_s15 = scalar_lea.vmem %s3620_s0, %s2523_s9  ;;  %s2602_s20 = scalar_lea.vmem %s3624_s4, %s2227_s28  ;;  %v2814_v5 = vsub.s32 4, %v2526_v8 }
  0x14   : > { %755 = vperm.xlu1 %2257, %v2187_v1   ;;  %579 = vperm.xlu0 %2256, %v575_v2   ;;  %v576_v4 = vld [vmem:[%s2514_s8 + $0x8] sm:$0xff]  ;;  %v2192_v7 = vld [vmem:[%s2514_s8 + $0x20] sm:$0xff]  ;;  %v2198_v9 = vld [vmem:[%s2514_s8 + $0x38] sm:$0xff]  ;;  %v1929_v30 = vrot.slane %v1924_v26, %v2547_v17  ;;  %v1933_v31 = vrot.slane %v1924_v26, %v2541_v14  ;;  %v1937_v37 = vrot.slane %v1924_v26, %v2550_v18  ;;  %s2616_s23 = scalar_lea.vmem %s3622_s2, %s2523_s9  ;;  %s3470_s24 = scalar_lea.vmem %s3627_s7, %s2523_s9 }
  0x15   : > { %v2193_v6 = vld [vmem:[%s2514_s8 + $0x28] sm:$0xff]  ;;  %v2197_v10 = vld [vmem:[%s2514_s8 + $0x30] sm:$0xff]  ;;  %v2534_v11 = vld [vmem:[%s428_s12] sm:$0xff]  ;;  %v1941_v38 = vrot.slane %v1924_v26, %v2562_v25 }
  0x16   : > { %v2536_v12 = vld [vmem:[%s428_s12 + $0x8] sm:$0xff]  ;;  %v2538_v13 = vld [vmem:[%s428_s12 + $0x10] sm:$0xff]  ;;  %v2543_v15 = vld [vmem:[%s428_s12 + $0x18] sm:$0xff]  ;;  %v483_v16 = vand.u32 2147483647, %v2534_v11 }
  0x17   : > { %v2203_v19 = vld [vmem:[%s2514_s8 + $0x48] sm:$0xff]  ;;  %v2202_v20 = vld [vmem:[%s2514_s8 + $0x40] sm:$0xff]  ;;  %v484_v21 = vand.u32 2147483647, %v2536_v12  ;;  %v485_v22 = vand.u32 2147483647, %v2538_v13 }
  0x18   : > { %760 = vperm.xlu1 %2257, %v2188_v3   ;;  %584 = vperm.xlu0 %2256, %v576_v4   ;;  %v486_v23 = vand.u32 2147483647, %v2543_v15  ;;  %v487_v24 = vsub.f32 0.0, %v483_v16  ;;  %v2208_v27 = vld [vmem:[%s2514_s8 + $0x58] sm:$0xff]  ;;  %v2207_v32 = vld [vmem:[%s2514_s8 + $0x50] sm:$0xff]  ;;  %v2571_v33 = vld [vmem:[%s418_s15] sm:$0xff] }
  0x19   : > { %v488_v28 = vsub.f32 0.0, %v484_v21  ;;  %v489_v29 = vsub.f32 0.0, %v485_v22  ;;  %v2573_v34 = vld [vmem:[%s418_s15 + $0x8] sm:$0xff]  ;;  %v2577_v39 = vld [vmem:[%s418_s15 + $0x10] sm:$0xff]  ;;  %v2579_v40 = vld [vmem:[%s418_s15 + $0x18] sm:$0xff]  ;;  %v2582_v43 = vmul.f32 %v1929_v30, %v2571_v33  ;;  %v481_v21 = vmax.f32 %v2538_v13, 0.0 }
  0x1a   : > { %v490_v35 = vsub.f32 0.0, %v486_v23  ;;  %v491_v36 = vmul.f32 1.442695, %v487_v24  ;;  %v2585_v44 = vmul.f32 %v1933_v31, %v2573_v34  ;;  %v2588_v46 = vmul.f32 %v1937_v37, %v2577_v39  ;;  %v2213_v48 = vld [vmem:[%s2514_s8 + $0x68] sm:$0xff]  ;;  %v2212_v49 = vld [vmem:[%s2514_s8 + $0x60] sm:$0xff]  ;;  %v2218_v50 = vld [vmem:[%s2514_s8 + $0x78] sm:$0xff] }
  0x1b   : > { %v493_v41 = vmul.f32 1.442695, %v488_v28  ;;  %v495_v42 = vmul.f32 1.442695, %v489_v29  ;;  %3640 = vst [vmem:[#allocation2_spill] sm:$0xff] %v2582_v43  ;;  %v2591_v47 = vmul.f32 %v1941_v38, %v2579_v40  ;;  %v2217_v51 = vld [vmem:[%s2514_s8 + $0x70] sm:$0xff] }
  0x1c   : > { %934 = vperm.xlu1 %2257, %v2193_v6   ;;  %929 = vperm.xlu0 %2256, %v2192_v7   ;;  %3641 = vst [vmem:[#allocation3_spill] sm:$0xff] %v2585_v44  ;;  %2258 = vpow2.f32 %v491_v36  ;;  %v497_v45 = vmul.f32 1.442695, %v490_v35  ;;  %3642 = vst [vmem:[#allocation4_spill] sm:$0xff] %v2588_v46  ;;  %v620_v54 = vld [vmem:[%s2602_s20 + $0x8] sm:$0xff]  ;;  %v619_v55 = vld [vmem:[%s2602_s20] sm:$0xff] }
  0x1d   : > { %3643 = vst [vmem:[#allocation5_spill] sm:$0xff] %v2591_v47  ;;  %2260 = vpow2.f32 %v493_v41  ;;  %v2190_v62 = vld [vmem:[%s2602_s20 + $0x18] sm:$0xff]  ;;  %v2189_v63 = vld [vmem:[%s2602_s20 + $0x10] sm:$0xff]  ;;  %v2195_v0 = vld [vmem:[%s2602_s20 + $0x28] sm:$0xff]  ;;  %v482_v26 = vmax.f32 %v2543_v15, 0.0 }
  0x1e   : > { %2262 = vpow2.f32 %v495_v42  ;;  %v2194_v1 = vld [vmem:[%s2602_s20 + $0x20] sm:$0xff]  ;;  %v2200_v2 = vld [vmem:[%s2602_s20 + $0x38] sm:$0xff]  ;;  %v2199_v3 = vld [vmem:[%s2602_s20 + $0x30] sm:$0xff] }
  0x1f   : > { %2264 = vpow2.f32 %v497_v45  ;;  %v2204_v16 = vld [vmem:[%s2602_s20 + $0x40] sm:$0xff]  ;;  %v1955_v29 = vld [vmem:[%s2616_s23 + $0x8] sm:$0xff]  ;;  %v2210_v30 = vld [vmem:[%s2602_s20 + $0x58] sm:$0xff]  ;;  %v2644_v45 = vsub.s32 6, %v2526_v8 }
  0x20   : > { %1108 = vperm.xlu1 %2257, %v2198_v9   ;;  %1103 = vperm.xlu0 %2256, %v2197_v10   ;;  %v2205_v10 = vld [vmem:[%s2602_s20 + $0x48] sm:$0xff]  ;;  %v1954_v24 = vld [vmem:[%s2616_s23] sm:$0xff]  ;;  %v2209_v31 = vld [vmem:[%s2602_s20 + $0x50] sm:$0xff]  ;;  %v1959_v13 = vsub.f32 0.0, %v1955_v29 }
  0x21   : > { %v2215_v38 = vld [vmem:[%s2602_s20 + $0x68] sm:$0xff]  ;;  %v2214_v41 = vld [vmem:[%s2602_s20 + $0x60] sm:$0xff] }
  0x24   : > { %1282 = vperm.xlu1 %2257, %v2203_v19   ;;  %1277 = vperm.xlu0 %2256, %v2202_v20   ;;  %v479_v19 = vmax.f32 %v2534_v11, 0.0  ;;  %v480_v20 = vmax.f32 %v2536_v12, 0.0  ;;  %v1958_v11 = vsub.f32 0.0, %v1954_v24 }
  0x26   : > { %v2259_v52 = vpop.eup %2258 }
  0x27   : > { %v2261_v53 = vpop.eup %2260  ;;  %v499_v56 = vadd.f32 1.0, %v2259_v52  ;;  %v1964_v52 = vmul.f32 1.442695, %v1959_v13 }
  0x28   : > { %1456 = vperm.xlu1 %2257, %v2208_v27   ;;  %1451 = vperm.xlu0 %2256, %v2207_v32   ;;  %v2263_v57 = vpop.eup %2262  ;;  %v500_v58 = vadd.f32 1.0, %v2261_v53  ;;  %v1956_v32 = vld [vmem:[%s2616_s23 + $0x10] sm:$0xff] }
  0x29   : > { %v2265_v59 = vpop.eup %2264  ;;  %v501_v60 = vadd.f32 1.0, %v2263_v57  ;;  %2266 = vlog2.f32 %v499_v56  ;;  %v1960_v15 = vsub.f32 0.0, %v1956_v32 }
  0x2a   : > { %v502_v61 = vadd.f32 1.0, %v2265_v59  ;;  %2268 = vlog2.f32 %v500_v58  ;;  %v2694_v59 = vld [vmem:[%s3625_s5 + $0x30] sm:$0xff] }
  0x2b   : > { %2270 = vlog2.f32 %v501_v60  ;;  %v2699_v60 = vld [vmem:[%s3625_s5 + $0x38] sm:$0xff] }
  0x2c   : > { %1630 = vperm.xlu1 %2257, %v2213_v48   ;;  %1625 = vperm.xlu0 %2256, %v2212_v49   ;;  %2272 = vlog2.f32 %v502_v61  ;;  %v2647_v48 = vsub.s32 7, %v2526_v8  ;;  %v2220_v61 = vld [vmem:[%s2602_s20 + $0x78] sm:$0xff] }
  0x30   : > { %1804 = vperm.xlu1 %2257, %v2218_v50   ;;  %1799 = vperm.xlu0 %2256, %v2217_v51  }
  0x33   : > { %v2267_v4 = vpop.eup %2266 }
  0x34   : > { %628 = vperm.xlu1 %2257, %v620_v54   ;;  %623 = vperm.xlu0 %2256, %v619_v55   ;;  %v2269_v6 = vpop.eup %2268  ;;  %v504_v22 = vmul.f32 0.6931472, %v2267_v4  ;;  %v1966_v55 = vmul.f32 1.442695, %v1960_v15 }
  0x35   : > { %v2271_v7 = vpop.eup %2270  ;;  %v506_v23 = vmul.f32 0.6931472, %v2269_v6 }
  0x36   : > { %v2273_v9 = vpop.eup %2272  ;;  %v508_v27 = vmul.f32 0.6931472, %v2271_v7  ;;  %v2629_v35 = vadd.f32 %v504_v22, %v479_v19  ;;  %v2745_v22 = vld [vmem:[%s3625_s5 + $0x18] sm:$0xff] }
  0x37   : > { %v510_v28 = vmul.f32 0.6931472, %v2273_v9  ;;  %v2631_v12 = vadd.f32 %v506_v23, %v480_v20 }
  0x38   : > { %805 = vperm.xlu1 %2257, %v2190_v62   ;;  %800 = vperm.xlu0 %2256, %v2189_v63   ;;  %v2633_v36 = vadd.f32 %v508_v27, %v481_v21  ;;  %v2641_v42 = vmul.f32 %v2629_v35, %v2571_v33  ;;  %v1962_v33 = vmul.f32 1.442695, %v1958_v11  ;;  %v2219_v62 = vld [vmem:[%s2602_s20 + $0x70] sm:$0xff]  ;;  %v705_v29 = vrot.slane %v2629_v35, %v2541_v14 }
  0x39   : > { %v2635_v37 = vadd.f32 %v510_v28, %v482_v26  ;;  %v2651_v49 = vmul.f32 %v2631_v12, %v2573_v34  ;;  %v2668_v34 = vld [vmem:[%s3625_s5 + $0x20] sm:$0xff]  ;;  %v534_v54 = vrot.slane %v2631_v12, %v2547_v17  ;;  %v709_v32 = vrot.slane %v2631_v12, %v2541_v14 }
  0x3a   : > { %v2655_v50 = vmul.f32 %v2633_v36, %v2577_v39  ;;  %v2663_v53 = vrot.slane %v2641_v42, %v2644_v45  ;;  %v2673_v39 = vld [vmem:[%s3625_s5 + $0x28] sm:$0xff]  ;;  %v2705_v63 = vrot.slane %v2641_v42, %v2647_v48  ;;  %v538_v4 = vrot.slane %v2633_v36, %v2547_v17 }
  0x3b   : > { %v2659_v51 = vmul.f32 %v2635_v37, %v2579_v40  ;;  %v530_v40 = vrot.slane %v2629_v35, %v2547_v17  ;;  %v2681_v56 = vrot.slane %v2651_v49, %v2644_v45  ;;  %v542_v6 = vrot.slane %v2635_v37, %v2547_v17 }
  0x3c   : > { %979 = vperm.xlu1 %2257, %v2195_v0   ;;  %974 = vperm.xlu0 %2256, %v2194_v1   ;;  %3644 = vst [vmem:[#allocation6_spill] sm:$0xff] %v2663_v53  ;;  %v2685_v57 = vrot.slane %v2655_v50, %v2644_v45  ;;  %3648 = vst [vmem:[#allocation10_spill] sm:$0xff] %v2705_v63  ;;  %v2709_v0 = vrot.slane %v2651_v49, %v2647_v48  ;;  %2274 = vpow2.f32 %v1962_v33 }
  0x3d   : > { %3645 = vst [vmem:[#allocation7_spill] sm:$0xff] %v2681_v56  ;;  %v2689_v58 = vrot.slane %v2659_v51, %v2644_v45  ;;  %v2713_v1 = vrot.slane %v2655_v50, %v2647_v48  ;;  %v547_v7 = vmul.f32 %v530_v40, %v2668_v34  ;;  %v548_v9 = vmul.f32 %v534_v54, %v2673_v39 }
  0x3e   : > { %3646 = vst [vmem:[#allocation8_spill] sm:$0xff] %v2685_v57  ;;  %3649 = vst [vmem:[#allocation11_spill] sm:$0xff] %v2709_v0  ;;  %v549_v19 = vmul.f32 %v538_v4, %v2694_v59  ;;  %v550_v20 = vmul.f32 %v542_v6, %v2699_v60  ;;  %2276 = vpow2.f32 %v1964_v52  ;;  %v713_v11 = vrot.slane %v2633_v36, %v2541_v14 }
  0x3f   : > { %3647 = vst [vmem:[#allocation9_spill] sm:$0xff] %v2689_v58  ;;  %3650 = vst [vmem:[#allocation12_spill] sm:$0xff] %v2713_v1  ;;  %v559_v21 = vmul.f32 1.442695, %v547_v7  ;;  %v561_v24 = vmul.f32 1.442695, %v548_v9  ;;  %2278 = vpow2.f32 %v1966_v55  ;;  %v717_v15 = vrot.slane %v2635_v37, %v2541_v14 }
  0x40   : > { %1153 = vperm.xlu1 %2257, %v2200_v2   ;;  %1148 = vperm.xlu0 %2256, %v2199_v3   ;;  %v2717_v2 = vrot.slane %v2659_v51, %v2647_v48  ;;  %v2722_v3 = vld [vmem:[%s3625_s5] sm:$0xff]  ;;  %v563_v27 = vmul.f32 1.442695, %v549_v19  ;;  %v723_v33 = vmul.f32 %v709_v32, %v2673_v39  ;;  %v724_v52 = vmul.f32 %v713_v11, %v2694_v59 }
  0x41   : > { %v543_v23 = vmul.f32 %v530_v40, %v2722_v3  ;;  %2280 = vpow2.f32 %v559_v21  ;;  %v879_v21 = vrot.slane %v2629_v35, %v2550_v18 }
  0x42   : > { %3651 = vst [vmem:[#allocation13_spill] sm:$0xff] %v2717_v2  ;;  %2282 = vpow2.f32 %v561_v24  ;;  %v736_v7 = vmul.f32 1.442695, %v723_v33  ;;  %v738_v9 = vmul.f32 1.442695, %v724_v52  ;;  %v721_v24 = vmul.f32 %v717_v15, %v2745_v22 }
  0x43   : > { %v551_v13 = vmul.f32 1.442695, %v543_v23  ;;  %2284 = vpow2.f32 %v563_v27  ;;  %v887_v27 = vrot.slane %v2633_v36, %v2550_v18 }
  0x44   : > { %1327 = vperm.xlu1 %2257, %v2205_v10   ;;  %1322 = vperm.xlu0 %2256, %v2204_v16   ;;  %v2733_v10 = vld [vmem:[%s3625_s5 + $0x8] sm:$0xff]  ;;  %v2738_v16 = vld [vmem:[%s3625_s5 + $0x10] sm:$0xff]  ;;  %v732_v33 = vmul.f32 1.442695, %v721_v24 }
  0x45   : > { %v544_v26 = vmul.f32 %v534_v54, %v2733_v10  ;;  %v545_v28 = vmul.f32 %v538_v4, %v2738_v16  ;;  %v725_v54 = vmul.f32 %v717_v15, %v2699_v60  ;;  %v719_v4 = vmul.f32 %v709_v32, %v2733_v10 }
  0x46   : > { %v891_v32 = vrot.slane %v2635_v37, %v2550_v18 }
  0x47   : > { %v555_v40 = vmul.f32 1.442695, %v545_v28  ;;  %v740_v19 = vmul.f32 1.442695, %v725_v54 }
  0x48   : > { %1501 = vperm.xlu1 %2257, %v2210_v30   ;;  %1496 = vperm.xlu0 %2256, %v2209_v31   ;;  %v565_v30 = vmul.f32 1.442695, %v550_v20  ;;  %v546_v31 = vmul.f32 %v542_v6, %v2745_v22  ;;  %v2765_v6 = vpop.eup %2274  ;;  %v720_v20 = vmul.f32 %v713_v11, %v2738_v16  ;;  %v899_v52 = vmul.f32 %v891_v32, %v2699_v60 }
  0x49   : > { %3652 = vst [vmem:[#allocation14_spill] sm:$0xff] %v2765_v6  ;;  %v2770_v23 = vpop.eup %2276 }
  0x4a   : > { %2286 = vpow2.f32 %v565_v30  ;;  %v557_v55 = vmul.f32 1.442695, %v546_v31  ;;  %3653 = vst [vmem:[#allocation15_spill] sm:$0xff] %v2770_v23  ;;  %v2777_v28 = vpop.eup %2278  ;;  %v728_v30 = vmul.f32 1.442695, %v719_v4  ;;  %v896_v31 = vmul.f32 %v879_v21, %v2668_v34 }
  0x4b   : > { %2288 = vpow2.f32 %v551_v13  ;;  %3654 = vst [vmem:[#allocation16_spill] sm:$0xff] %v2777_v28  ;;  %v898_v13 = vmul.f32 %v887_v27, %v2694_v59  ;;  %v2784_v15 = vpop.eup %2280 }
  0x4c   : > { %1675 = vperm.xlu1 %2257, %v2215_v38   ;;  %1670 = vperm.xlu0 %2256, %v2214_v41   ;;  %v722_v38 = vmul.f32 %v705_v29, %v2668_v34  ;;  %v553_v41 = vmul.f32 1.442695, %v544_v26  ;;  %v883_v26 = vrot.slane %v2631_v12, %v2550_v18 }
  0x4d   : > { %v912_v4 = vmul.f32 1.442695, %v898_v13 }
  0x4e   : > { %2290 = vpow2.f32 %v553_v41  ;;  %v897_v11 = vmul.f32 %v883_v26, %v2673_v39  ;;  %v2786_v41 = vpop.eup %2282 }
  0x4f   : > { %2292 = vpow2.f32 %v555_v40  ;;  %v892_v40 = vmul.f32 %v879_v21, %v2722_v3  ;;  %v2790_v54 = vpop.eup %2284  ;;  %v1057_v21 = vrot.slane %v2631_v12, %v2562_v25 }
  0x50   : > { %1849 = vperm.xlu1 %2257, %v2220_v61   ;;  %1844 = vperm.xlu0 %2256, %v2219_v62   ;;  %v734_v61 = vmul.f32 1.442695, %v722_v38  ;;  %v718_v62 = vmul.f32 %v705_v29, %v2722_v3  ;;  %2294 = vpow2.f32 %v557_v55  ;;  %v730_v38 = vmul.f32 1.442695, %v720_v20 }
  0x51   : > { %v908_v55 = vmul.f32 1.442695, %v896_v31  ;;  %v1053_v20 = vrot.slane %v2629_v35, %v2562_v25  ;;  %v900_v31 = vmul.f32 1.442695, %v892_v40  ;;  %v1071_v13 = vmul.f32 %v1057_v21, %v2673_v39 }
  0x52   : > { %2296 = vpow2.f32 %v734_v61  ;;  %v726_v29 = vmul.f32 1.442695, %v718_v62  ;;  %v910_v62 = vmul.f32 1.442695, %v897_v11  ;;  %v2821_v40 = vsub.s32 5, %v2526_v8 }
  0x53   : > { %2298 = vpow2.f32 %v736_v7  ;;  %v893_v7 = vmul.f32 %v883_v26, %v2733_v10  ;;  %v1061_v26 = vrot.slane %v2633_v36, %v2562_v25  ;;  %v1084_v28 = vmul.f32 1.442695, %v1071_v13 }
  0x54   : > { %2300 = vpow2.f32 %v738_v9  ;;  %v2792_v61 = vpop.eup %2286  ;;  %v1066_v23 = vmul.f32 %v1053_v20, %v2722_v3  ;;  %v1235_v13 = vrot.slane %v2633_v36, %v2814_v5 }
  0x55   : > { %2302 = vpow2.f32 %v740_v19  ;;  %v2795_v9 = vpop.eup %2288  ;;  %v894_v19 = vmul.f32 %v887_v27, %v2738_v16  ;;  %v1070_v27 = vmul.f32 %v1053_v20, %v2668_v34  ;;  %v1072_v47 = vmul.f32 %v1061_v26, %v2694_v59 }
  0x56   : > { %2304 = vpow2.f32 %v726_v29  ;;  %v914_v29 = vmul.f32 1.442695, %v899_v52  ;;  %v1246_v57 = vmul.f32 %v1235_v13, %v2694_v59 }
  0x57   : > { %2306 = vpow2.f32 %v728_v30  ;;  %v895_v30 = vmul.f32 %v891_v32, %v2745_v22  ;;  %v1065_v32 = vrot.slane %v2635_v37, %v2562_v25  ;;  %v1086_v2 = vmul.f32 1.442695, %v1072_v47 }
  0x58   : > { %2308 = vpow2.f32 %v730_v38  ;;  %v2802_v24 = vpop.eup %2290 }
  0x59   : > { %2310 = vpow2.f32 %v732_v33  ;;  %v2805_v11 = vpop.eup %2292  ;;  %v902_v33 = vmul.f32 1.442695, %v893_v7  ;;  %v906_v44 = vmul.f32 1.442695, %v895_v30  ;;  %v1073_v43 = vmul.f32 %v1065_v32, %v2699_v60 }
  0x5a   : > { %2312 = vpow2.f32 %v908_v55  ;;  %v2811_v38 = vpop.eup %2294  ;;  %v904_v55 = vmul.f32 1.442695, %v894_v19  ;;  %v1082_v7 = vmul.f32 1.442695, %v1070_v27  ;;  %v1227_v19 = vrot.slane %v2629_v35, %v2814_v5 }
  0x5b   : > { %2314 = vpow2.f32 %v910_v62  ;;  %v1069_v27 = vmul.f32 %v1065_v32, %v2745_v22  ;;  %v1074_v32 = vmul.f32 1.442695, %v1066_v23 }
  0x5c   : > { %v2818_v52 = vpop.eup %2296  ;;  %2316 = vpow2.f32 %v912_v4  ;;  %v1067_v4 = vmul.f32 %v1057_v21, %v2733_v10  ;;  %v1239_v21 = vrot.slane %v2635_v37, %v2814_v5 }
  0x5d   : > { %3655 = vst [vmem:[#allocation17_spill] sm:$0xff] %v2818_v52  ;;  %v2824_v46 = vpop.eup %2298  ;;  %2318 = vpow2.f32 %v914_v29  ;;  %v1231_v29 = vrot.slane %v2631_v12, %v2814_v5 }
  0x5e   : > { %3656 = vst [vmem:[#allocation18_spill] sm:$0xff] %v2824_v46  ;;  %v2827_v62 = vpop.eup %2300  ;;  %2320 = vpow2.f32 %v900_v31  ;;  %v1068_v31 = vmul.f32 %v1061_v26, %v2738_v16  ;;  %v1088_v26 = vmul.f32 1.442695, %v1073_v43  ;;  %v1076_v58 = vmul.f32 1.442695, %v1067_v4 }
  0x5f   : > { %3657 = vst [vmem:[#allocation19_spill] sm:$0xff] %v2827_v62  ;;  %v2830_v6 = vpop.eup %2302  ;;  %2322 = vpow2.f32 %v902_v33  ;;  %v1244_v33 = vmul.f32 %v1227_v19, %v2668_v34  ;;  %v1245_v1 = vmul.f32 %v1231_v29, %v2673_v39  ;;  %v1247_v56 = vmul.f32 %v1239_v21, %v2699_v60 }
  0x60   : > { %3658 = vst [vmem:[#allocation20_spill] sm:$0xff] %v2830_v6  ;;  %v2837_v30 = vpop.eup %2304  ;;  %2324 = vpow2.f32 %v904_v55  ;;  %v2447_v55 = vmov 1966171168   ;;  %v1078_v6 = vmul.f32 1.442695, %v1068_v31  ;;  %v1240_v62 = vmul.f32 %v1227_v19, %v2722_v3 }
  0x61   : > { %v2841_v20 = vpop.eup %2306  ;;  %v2851_v47 = vunpack.c.l.s4 %v2447_v55  ;;  %2326 = vpow2.f32 %v906_v44  ;;  %v1241_v55 = vmul.f32 %v1231_v29, %v2733_v10  ;;  %v1080_v43 = vmul.f32 1.442695, %v1069_v27 }
  0x62   : > { %3659 = vst [vmem:[#allocation21_spill] sm:$0xff] %v2841_v20  ;;  %v2849_v0 = vpop.eup %2308  ;;  %2328 = vpow2.f32 %v1082_v7  ;;  %v1256_v44 = vmul.f32 1.442695, %v1244_v33  ;;  %v1258_v23 = vmul.f32 1.442695, %v1245_v1  ;;  %v1242_v4 = vmul.f32 %v1235_v13, %v2738_v16 }
  0x63   : > { %3660 = vst [vmem:[#allocation22_spill] sm:$0xff] %v2849_v0  ;;  %v2853_v63 = vpop.eup %2310  ;;  %2330 = vpow2.f32 %v1084_v28  ;;  %v1243_v52 = vmul.f32 %v1239_v21, %v2745_v22  ;;  %v1401_v28 = vrot.slane %v2629_v35, %v2821_v40  ;;  %v1260_v19 = vmul.f32 1.442695, %v1246_v57 }
  0x64   : > { %3661 = vst [vmem:[#allocation23_spill] sm:$0xff] %v2853_v63  ;;  %v2857_v53 = vpop.eup %2312  ;;  %2332 = vpow2.f32 %v1086_v2  ;;  %v1262_v29 = vmul.f32 1.442695, %v1247_v56  ;;  %v1575_v2 = vrot.slane %v2629_v35, %v2644_v45  ;;  %v1248_v1 = vmul.f32 1.442695, %v1240_v62 }
  0x65   : > { %3662 = vst [vmem:[#allocation24_spill] sm:$0xff] %v2857_v53  ;;  %v2861_v46 = vpop.eup %2314  ;;  %2334 = vpow2.f32 %v1088_v26  ;;  %v1250_v33 = vmul.f32 1.442695, %v1241_v55  ;;  %v1418_v13 = vmul.f32 %v1401_v28, %v2668_v34  ;;  %v1405_v21 = vrot.slane %v2631_v12, %v2821_v40 }
  0x66   : > { %3663 = vst [vmem:[#allocation25_spill] sm:$0xff] %v2861_v46  ;;  %v2863_v7 = vpop.eup %2316  ;;  %2336 = vpow2.f32 %v1074_v32  ;;  %v1409_v57 = vrot.slane %v2633_v36, %v2821_v40  ;;  %v1413_v56 = vrot.slane %v2635_v37, %v2821_v40  ;;  %v1254_v62 = vmul.f32 1.442695, %v1243_v52 }
  0x67   : > { %3664 = vst [vmem:[#allocation26_spill] sm:$0xff] %v2863_v7  ;;  %v2869_v31 = vpop.eup %2318  ;;  %2338 = vpow2.f32 %v1076_v58  ;;  %v1252_v58 = vmul.f32 1.442695, %v1242_v4  ;;  %v1414_v55 = vmul.f32 %v1401_v28, %v2722_v3  ;;  %v1430_v53 = vmul.f32 1.442695, %v1418_v13 }
  0x68   : > { %3665 = vst [vmem:[#allocation27_spill] sm:$0xff] %v2869_v31  ;;  %v2873_v27 = vpop.eup %2320  ;;  %2340 = vpow2.f32 %v1078_v6  ;;  %v1419_v31 = vmul.f32 %v1405_v21, %v2673_v39  ;;  %v1420_v6 = vmul.f32 %v1409_v57, %v2694_v59  ;;  %v1421_v7 = vmul.f32 %v1413_v56, %v2699_v60 }
  0x69   : > { %3666 = vst [vmem:[#allocation28_spill] sm:$0xff] %v2873_v27  ;;  %v2876_v26 = vpop.eup %2322  ;;  %2342 = vpow2.f32 %v1080_v43  ;;  %v1583_v43 = vrot.slane %v2633_v36, %v2644_v45  ;;  %v1587_v4 = vrot.slane %v2635_v37, %v2644_v45  ;;  %v1592_v28 = vmul.f32 %v1575_v2, %v2668_v34 }
  0x6a   : > { %3667 = vst [vmem:[#allocation29_spill] sm:$0xff] %v2876_v26  ;;  %v2884_v32 = vpop.eup %2324  ;;  %2344 = vpow2.f32 %v1256_v44  ;;  %v1579_v26 = vrot.slane %v2631_v12, %v2644_v45  ;;  %v1415_v44 = vmul.f32 %v1405_v21, %v2733_v10 }
  0x6b   : > { %3668 = vst [vmem:[#allocation30_spill] sm:$0xff] %v2884_v32  ;;  %v2890_v46 = vpop.eup %2326  ;;  %2346 = vpow2.f32 %v1258_v23  ;;  %v1594_v13 = vmul.f32 %v1583_v43, %v2694_v59  ;;  %v1595_v21 = vmul.f32 %v1587_v4, %v2699_v60  ;;  %v1590_v63 = vmul.f32 %v1583_v43, %v2738_v16 }
  0x6c   : > { %3669 = vst [vmem:[#allocation31_spill] sm:$0xff] %v2890_v46  ;;  %v2896_v52 = vpop.eup %2328  ;;  %2348 = vpow2.f32 %v1260_v19  ;;  %v1593_v23 = vmul.f32 %v1579_v26, %v2673_v39  ;;  %v1588_v46 = vmul.f32 %v1575_v2, %v2722_v3  ;;  %v1416_v19 = vmul.f32 %v1409_v57, %v2738_v16 }
  0x6d   : > { %3670 = vst [vmem:[#allocation32_spill] sm:$0xff] %v2896_v52  ;;  %v2902_v32 = vpop.eup %2330  ;;  %2350 = vpow2.f32 %v1262_v29  ;;  %v1589_v45 = vmul.f32 %v1579_v26, %v2733_v10  ;;  %v1434_v29 = vmul.f32 1.442695, %v1420_v6  ;;  %v1436_v2 = vmul.f32 1.442695, %v1421_v7 }
  0x6e   : > { %3671 = vst [vmem:[#allocation33_spill] sm:$0xff] %v2902_v32  ;;  %v2907_v27 = vpop.eup %2332  ;;  %2352 = vpow2.f32 %v1248_v1  ;;  %v1432_v32 = vmul.f32 1.442695, %v1419_v31  ;;  %v1591_v1 = vmul.f32 %v1587_v4, %v2745_v22  ;;  %v1422_v26 = vmul.f32 1.442695, %v1414_v55 }
  0x6f   : > { %3672 = vst [vmem:[#allocation34_spill] sm:$0xff] %v2907_v27  ;;  %v2912_v52 = vpop.eup %2334  ;;  %2354 = vpow2.f32 %v1250_v33  ;;  %v1417_v27 = vmul.f32 %v1413_v56, %v2745_v22  ;;  %v1424_v20 = vmul.f32 1.442695, %v1415_v44  ;;  %v1749_v31 = vrot.slane %v2629_v35, %v2647_v48 }
  0x70   : > { %v2915_v0 = vpop.eup %2336  ;;  %2356 = vpow2.f32 %v1252_v58  ;;  %v1426_v6 = vmul.f32 1.442695, %v1416_v19  ;;  %v1753_v7 = vrot.slane %v2631_v12, %v2647_v48  ;;  %v1757_v56 = vrot.slane %v2633_v36, %v2647_v48 }
  0x71   : > { %v2919_v57 = vpop.eup %2338  ;;  %2358 = vpow2.f32 %v1254_v62  ;;  %v1761_v62 = vrot.slane %v2635_v37, %v2647_v48  ;;  %v1766_v55 = vmul.f32 %v1749_v31, %v2668_v34  ;;  %v2935_v35 = vmul.f32 %v1749_v31, %v2722_v3 }
  0x72   : > { %v2923_v33 = vpop.eup %2340  ;;  %2360 = vpow2.f32 %v1430_v53  ;;  %v1957_v53 = vld [vmem:[%s2616_s23 + $0x18] sm:$0xff]  ;;  %v1767_v12 = vmul.f32 %v1753_v7, %v2673_v39  ;;  %v1768_v44 = vmul.f32 %v1757_v56, %v2694_v59  ;;  %v2943_v36 = vmul.f32 %v1753_v7, %v2733_v10 }
  0x73   : > { %v2929_v58 = vpop.eup %2342  ;;  %2362 = vpow2.f32 %v1432_v32  ;;  %v1428_v37 = vmul.f32 1.442695, %v1417_v27  ;;  %v1769_v48 = vmul.f32 %v1761_v62, %v2699_v60  ;;  %v2949_v34 = vmul.f32 %v1757_v56, %v2738_v16 }
  0x74   : > { %v2937_v43 = vpop.eup %2344  ;;  %2364 = vpow2.f32 %v1434_v29  ;;  %v1604_v4 = vmul.f32 1.442695, %v1592_v28  ;;  %v2954_v39 = vmul.f32 %v1761_v62, %v2745_v22  ;;  %v1961_v10 = vsub.f32 0.0, %v1957_v53 }
  0x75   : > { %3673 = vst [vmem:[#allocation35_spill] sm:$0xff] %v2937_v43  ;;  %v2945_v32 = vpop.eup %2346  ;;  %2366 = vpow2.f32 %v1436_v2  ;;  %v675_v19 = vunpack.c.0.s8 %v2851_v47  ;;  %v1606_v29 = vmul.f32 1.442695, %v1593_v23  ;;  %v1608_v60 = vmul.f32 1.442695, %v1594_v13 }
  0x76   : > { %3674 = vst [vmem:[#allocation36_spill] sm:$0xff] %v2945_v32  ;;  %v2951_v3 = vpop.eup %2348  ;;  %2368 = vpow2.f32 %v1422_v26  ;;  %v1610_v2 = vmul.f32 1.442695, %v1595_v21  ;;  %v1596_v22 = vmul.f32 1.442695, %v1588_v46  ;;  %v2976_v13 = vrot.slane %v2641_v42, %v2541_v14 }
  0x77   : > { %3675 = vst [vmem:[#allocation37_spill] sm:$0xff] %v2951_v3  ;;  %v2956_v59 = vpop.eup %2350  ;;  %2370 = vpow2.f32 %v1424_v20  ;;  %v2967_v31 = vmul.f32 1.442695, %v1961_v10  ;;  %v2970_v47 = vsub.s32 %v675_v19, %v2526_v8  ;;  %v1598_v20 = vmul.f32 1.442695, %v1589_v45 }
  0x78   : > { %3676 = vst [vmem:[#allocation38_spill] sm:$0xff] %v2956_v59  ;;  %v2959_v27 = vpop.eup %2352  ;;  %2372 = vpow2.f32 %v1426_v6  ;;  %v2980_v21 = vrot.slane %v2641_v42, %v2547_v17  ;;  %v1600_v46 = vmul.f32 1.442695, %v1590_v63  ;;  %v2986_v8 = vrot.slane %v2651_v49, %v2541_v14 }
  0x79   : > { %v2961_v16 = vpop.eup %2354  ;;  %2374 = vpow2.f32 %v1428_v37  ;;  %3677 = vst [vmem:[#allocation39_spill] sm:$0xff] %v2967_v31  ;;  %3678 = vst [vmem:[#allocation40_spill] sm:$0xff] %v2970_v47  ;;  %v2990_v45 = vrot.slane %v2651_v49, %v2547_v17  ;;  %v1602_v7 = vmul.f32 1.442695, %v1591_v1  ;;  %v2996_v62 = vrot.slane %v2655_v50, %v2541_v14 }
  0x7a   : > { %v2963_v26 = vpop.eup %2356  ;;  %2376 = vpow2.f32 %v1604_v4  ;;  %v3000_v63 = vrot.slane %v2641_v42, %v2550_v18  ;;  %v1778_v53 = vmul.f32 1.442695, %v1766_v55  ;;  %v3006_v4 = vrot.slane %v2655_v50, %v2547_v17 }
  0x7b   : > { %v2965_v28 = vpop.eup %2358  ;;  %2378 = vpow2.f32 %v1606_v29  ;;  %v3010_v1 = vrot.slane %v2651_v49, %v2550_v18  ;;  %v1780_v10 = vmul.f32 1.442695, %v1767_v12  ;;  %v3016_v29 = vrot.slane %v2659_v51, %v2541_v14 }
  0x7c   : > { %v2972_v23 = vpop.eup %2360  ;;  %2380 = vpow2.f32 %v1608_v60  ;;  %v3020_v55 = vrot.slane %v2655_v50, %v2550_v18  ;;  %v1782_v60 = vmul.f32 1.442695, %v1768_v44  ;;  %v3030_v12 = vrot.slane %v2659_v51, %v2550_v18 }
  0x7d   : > { %3679 = vst [vmem:[#allocation41_spill] sm:$0xff] %v2972_v23  ;;  %v2982_v6 = vpop.eup %2362  ;;  %2382 = vpow2.f32 %v1610_v2  ;;  %v3036_v31 = vrot.slane %v2641_v42, %v2562_v25  ;;  %v3040_v44 = vrot.slane %v2651_v49, %v2562_v25  ;;  %v3047_v18 = vrot.slane %v2655_v50, %v2562_v25 }
  0x7e   : > { %3680 = vst [vmem:[#allocation42_spill] sm:$0xff] %v2982_v6  ;;  %v2992_v56 = vpop.eup %2364  ;;  %2384 = vpow2.f32 %v1596_v22  ;;  %v3026_v22 = vrot.slane %v2659_v51, %v2547_v17  ;;  %v1770_v17 = vmul.f32 1.442695, %v2935_v35  ;;  %v3062_v35 = vrot.slane %v2651_v49, %v2814_v5 }
  0x7f   : > { %3681 = vst [vmem:[#allocation43_spill] sm:$0xff] %v2992_v56  ;;  %v3002_v37 = vpop.eup %2366  ;;  %2386 = vpow2.f32 %v1598_v20  ;;  %v1784_v20 = vmul.f32 1.442695, %v1769_v48  ;;  %v3051_v48 = vrot.slane %v2659_v51, %v2562_v25  ;;  %v3069_v25 = vrot.slane %v2655_v50, %v2814_v5 }
  0x80   : > { %3682 = vst [vmem:[#allocation44_spill] sm:$0xff] %v3002_v37  ;;  %v3012_v19 = vpop.eup %2368  ;;  %2388 = vpow2.f32 %v1600_v46  ;;  %v568_v37 = vmul.f32 0.0, %v2802_v24 }
  0x81   : > { %3683 = vst [vmem:[#allocation45_spill] sm:$0xff] %v3012_v19  ;;  %v3022_v2 = vpop.eup %2370  ;;  %2390 = vpow2.f32 %v1602_v7  ;;  %v1772_v7 = vmul.f32 1.442695, %v2943_v36  ;;  %v3073_v36 = vrot.slane %v2659_v51, %v2814_v5 }
  0x82   : > { %3684 = vst [vmem:[#allocation46_spill] sm:$0xff] %v3022_v2  ;;  %v3032_v14 = vpop.eup %2372  ;;  %2392 = vpow2.f32 %v1778_v53  ;;  %v3058_v53 = vrot.slane %v2641_v42, %v2814_v5 }
  0x83   : > { %3685 = vst [vmem:[#allocation47_spill] sm:$0xff] %v3032_v14  ;;  %v3043_v46 = vpop.eup %2374  ;;  %2394 = vpow2.f32 %v1780_v10  ;;  %v1776_v10 = vmul.f32 1.442695, %v2954_v39  ;;  %v3094_v39 = vrot.slane %v2659_v51, %v2821_v40  ;;  %v572_v51 = vmul.f32 0.0, %v2786_v41 }
  0x84   : > { %3686 = vst [vmem:[#allocation48_spill] sm:$0xff] %v3043_v46  ;;  %v3054_v14 = vpop.eup %2376  ;;  %2396 = vpow2.f32 %v1782_v60  ;;  %v1774_v46 = vmul.f32 1.442695, %v2949_v34  ;;  %v3080_v60 = vrot.slane %v2641_v42, %v2821_v40  ;;  %v3084_v34 = vrot.slane %v2651_v49, %v2821_v40 }
  0x85   : > { %3687 = vst [vmem:[#allocation49_spill] sm:$0xff] %v3054_v14  ;;  %v3065_v2 = vpop.eup %2378  ;;  %2398 = vpow2.f32 %v1784_v20  ;;  %v571_v20 = vmul.f32 0.0, %v2784_v15  ;;  %v567_v42 = vmul.f32 0.0, %v2795_v9  ;;  %v573_v15 = vmul.f32 0.0, %v2790_v54 }
  0x86   : > { %3688 = vst [vmem:[#allocation50_spill] sm:$0xff] %v3065_v2  ;;  %v3076_v14 = vpop.eup %2380  ;;  %v3088_v2 = vrot.slane %v2655_v50, %v2821_v40  ;;  %2400 = vpow2.f32 %v1770_v17  ;;  %v569_v50 = vmul.f32 0.0, %v2805_v11  ;;  %v570_v17 = vmul.f32 0.0, %v2811_v38 }
  0x87   : > { %3689 = vst [vmem:[#allocation51_spill] sm:$0xff] %v3076_v14  ;;  %v3090_v5 = vpop.eup %2382  ;;  %2402 = vpow2.f32 %v1772_v7  ;;  %v574_v9 = vmul.f32 0.0, %v2792_v61 }
  0x88   : > { %3690 = vst [vmem:[#allocation52_spill] sm:$0xff] %v3090_v5  ;;  %v3098_v14 = vpop.eup %2384  ;;  %2404 = vpow2.f32 %v1774_v46 }
  0x89   : > { %3691 = vst [vmem:[#allocation53_spill] sm:$0xff] %v3098_v14  ;;  %v3103_v5 = vpop.eup %2386  ;;  %2406 = vpow2.f32 %v1776_v10 }
  0x8a   : > { %3692 = vst [vmem:[#allocation54_spill] sm:$0xff] %v3103_v5  ;;  %v3108_v40 = vpop.eup %2388 }
  0x8b   : > { %3693 = vst [vmem:[#allocation55_spill] sm:$0xff] %v3108_v40  ;;  %v3114_v46 = vpop.eup %2390 }
  0x8c   : > { %3694 = vst [vmem:[#allocation56_spill] sm:$0xff] %v3114_v46  ;;  %v3120_v10 = vpop.eup %2392 }
  0x8d   : > { %3695 = vst [vmem:[#allocation57_spill] sm:$0xff] %v3120_v10  ;;  %v3130_v46 = vpop.eup %2394 }
  0x8e   : > { %3698 = vst [vmem:[#allocation60_spill] sm:$0xff] %v3130_v46  ;;  %v3136_v3 = vpop.eup %2396 }
  0x8f   : > { %3699 = vst [vmem:[#allocation61_spill] sm:$0xff] %v3136_v3 }
  0x93   : > { %v756_v49 = vpop.permute.xlu1 %755  ;;  %v580_v19 = vpop.permute.xlu0 %579 }
  0x94   : > { %v603_v7 = vmul.f32 %v2980_v21, %v580_v19  ;;  %v604_v24 = vmul.f32 %v2990_v45, %v580_v19  ;;  %v605_v11 = vmul.f32 %v3006_v4, %v580_v19  ;;  %v606_v38 = vmul.f32 %v3026_v22, %v580_v19 }
  0x95   : > { %v779_v5 = vmul.f32 %v2976_v13, %v756_v49  ;;  %v780_v41 = vmul.f32 %v2986_v8, %v756_v49  ;;  %v781_v54 = vmul.f32 %v2996_v62, %v756_v49  ;;  %v782_v61 = vmul.f32 %v3016_v29, %v756_v49 }
  0x96   : > { %v3122_v56 = vadd.f32 %v603_v7, %v567_v42  ;;  %v3124_v6 = vadd.f32 %v604_v24, %v568_v37  ;;  %v3126_v23 = vadd.f32 %v605_v11, %v569_v50  ;;  %v3128_v19 = vadd.f32 %v606_v38, %v570_v17  ;;  %v3142_v7 = vpop.eup %2398  ;;  %v3703_v24 = vld [vmem:[#allocation23_spill] sm:$0xff] }
  0x97   : > { %v761_v40 = vpop.permute.xlu1 %760  ;;  %v585_v14 = vpop.permute.xlu0 %584  ;;  %3700 = vst [vmem:[#allocation62_spill] sm:$0xff] %v3142_v7 }
  0x98   : > { %3696 = vst [vmem:[#allocation58_spill] sm:$0xff] %v3126_v23  ;;  %3697 = vst [vmem:[#allocation59_spill] sm:$0xff] %v3128_v19  ;;  %v783_v47 = vmul.f32 %v2976_v13, %v761_v40  ;;  %v784_v59 = vmul.f32 %v2986_v8, %v761_v40  ;;  %v785_v49 = vmul.f32 %v2996_v62, %v761_v40  ;;  %v3701_v8 = vld [vmem:[#allocation21_spill] sm:$0xff]  ;;  %v3152_v11 = vpop.eup %2400 }
  0x99   : > { %v786_v10 = vmul.f32 %v3016_v29, %v761_v40  ;;  %v607_v42 = vmul.f32 %v2980_v21, %v585_v14  ;;  %v608_v37 = vmul.f32 %v2990_v45, %v585_v14  ;;  %v609_v50 = vmul.f32 %v3006_v4, %v585_v14  ;;  %v3702_v29 = vld [vmem:[#allocation22_spill] sm:$0xff]  ;;  %3704 = vst [vmem:[#allocation21_spill] sm:$0xff] %v3152_v11  ;;  %v3162_v7 = vpop.eup %2402 }
  0x9a   : > { %v610_v17 = vmul.f32 %v3026_v22, %v585_v14  ;;  %v742_v13 = vmul.f32 %v2837_v30, %v3122_v56  ;;  %v743_v62 = vmul.f32 %v3701_v8, %v3124_v6  ;;  %v744_v40 = vmul.f32 %v3702_v29, %v3126_v23  ;;  %3705 = vst [vmem:[#allocation22_spill] sm:$0xff] %v3162_v7  ;;  %v3709_v11 = vld [vmem:[#allocation18_spill] sm:$0xff] }
  0x9b   : > { %v745_v21 = vmul.f32 %v3703_v24, %v3128_v19  ;;  %v935_v45 = vpop.permute.xlu1 %934  ;;  %v930_v4 = vpop.permute.xlu0 %929  ;;  %v3154_v38 = vadd.f32 %v607_v42, %v571_v20  ;;  %v3156_v22 = vadd.f32 %v608_v37, %v572_v51  ;;  %v3158_v14 = vadd.f32 %v609_v50, %v573_v15  ;;  %v3713_v19 = vld [vmem:[#allocation29_spill] sm:$0xff]  ;;  %v3714_v23 = vld [vmem:[#allocation30_spill] sm:$0xff] }
  0x9c   : > { %v3160_v30 = vadd.f32 %v610_v17, %v574_v9  ;;  %v3165_v8 = vmul.f32 %v3000_v63, %v935_v45  ;;  %v3168_v29 = vmul.f32 %v3010_v1, %v935_v45  ;;  %v3171_v24 = vmul.f32 %v3020_v55, %v935_v45  ;;  %v3176_v51 = vpop.eup %2404  ;;  %v3708_v17 = vld [vmem:[#allocation17_spill] sm:$0xff] }
  0x9d   : > { %v3174_v20 = vmul.f32 %v3030_v12, %v935_v45  ;;  %3706 = vst [vmem:[#allocation23_spill] sm:$0xff] %v3176_v51  ;;  %v953_v15 = vmul.f32 %v3000_v63, %v930_v4  ;;  %v954_v9 = vmul.f32 %v3010_v1, %v930_v4  ;;  %v955_v42 = vmul.f32 %v3020_v55, %v930_v4  ;;  %v3182_v50 = vpop.eup %2406  ;;  %v3710_v45 = vld [vmem:[#allocation19_spill] sm:$0xff]  ;;  %v3711_v51 = vld [vmem:[#allocation20_spill] sm:$0xff] }
  0x9e   : > { %v956_v37 = vmul.f32 %v3030_v12, %v930_v4  ;;  %3707 = vst [vmem:[#allocation63_spill] sm:$0xff] %v3182_v50  ;;  %v746_v7 = vmul.f32 %v3708_v17, %v3154_v38  ;;  %v747_v3 = vmul.f32 %v3709_v11, %v3156_v22  ;;  %v748_v46 = vmul.f32 %v3710_v45, %v3158_v14  ;;  %v3712_v50 = vld [vmem:[#allocation28_spill] sm:$0xff] }
  0x9f   : > { %v749_v63 = vmul.f32 %v3711_v51, %v3160_v30  ;;  %v1109_v32 = vpop.permute.xlu1 %1108  ;;  %v1104_v1 = vpop.permute.xlu0 %1103  ;;  %v3192_v43 = vadd.f32 %v779_v5, %v742_v13  ;;  %v3194_v55 = vadd.f32 %v780_v41, %v743_v62  ;;  %v3196_v12 = vadd.f32 %v781_v54, %v744_v40 }
  0xa0   : > { %v3198_v4 = vadd.f32 %v782_v61, %v745_v21  ;;  %v3201_v17 = vmul.f32 %v3036_v31, %v1109_v32  ;;  %v3204_v11 = vmul.f32 %v3040_v44, %v1109_v32  ;;  %v3207_v45 = vmul.f32 %v3047_v18, %v1109_v32 }
  0xa1   : > { %v3210_v51 = vmul.f32 %v3051_v48, %v1109_v32  ;;  %v3213_v5 = vmul.f32 %v3036_v31, %v1104_v1  ;;  %v3216_v41 = vmul.f32 %v3040_v44, %v1104_v1  ;;  %v3219_v54 = vmul.f32 %v3047_v18, %v1104_v1 }
  0xa2   : > { %v3222_v61 = vmul.f32 %v3051_v48, %v1104_v1  ;;  %v3224_v13 = vadd.f32 %v783_v47, %v746_v7  ;;  %v3226_v62 = vadd.f32 %v784_v59, %v747_v3  ;;  %v3228_v40 = vadd.f32 %v785_v49, %v748_v46  ;;  %v3715_v47 = vld [vmem:[#allocation31_spill] sm:$0xff] }
  0xa3   : > { %v3230_v32 = vadd.f32 %v786_v10, %v749_v63  ;;  %v1283_v21 = vpop.permute.xlu1 %1282  ;;  %v1278_v31 = vpop.permute.xlu0 %1277  ;;  %v916_v44 = vmul.f32 %v3712_v50, %v3192_v43  ;;  %v917_v18 = vmul.f32 %v3713_v19, %v3194_v55  ;;  %v918_v48 = vmul.f32 %v3714_v23, %v3196_v12  ;;  %v3721_v63 = vld [vmem:[#allocation24_spill] sm:$0xff] }
  0xa4   : > { %v919_v7 = vmul.f32 %v3715_v47, %v3198_v4  ;;  %v3241_v3 = vmul.f32 %v3058_v53, %v1283_v21  ;;  %v3244_v59 = vmul.f32 %v3062_v35, %v1283_v21  ;;  %v3247_v46 = vmul.f32 %v3069_v25, %v1283_v21  ;;  %v3722_v47 = vld [vmem:[#allocation25_spill] sm:$0xff] }
  0xa5   : > { %v3250_v10 = vmul.f32 %v3073_v36, %v1283_v21  ;;  %v3253_v19 = vmul.f32 %v3058_v53, %v1278_v31  ;;  %v3256_v23 = vmul.f32 %v3062_v35, %v1278_v31  ;;  %v3259_v49 = vmul.f32 %v3069_v25, %v1278_v31  ;;  %v3723_v21 = vld [vmem:[#allocation26_spill] sm:$0xff]  ;;  %v3724_v53 = vld [vmem:[#allocation27_spill] sm:$0xff] }
  0xa6   : > { %3716 = vst [vmem:[#allocation17_spill] sm:$0xff] %v3244_v59  ;;  %3717 = vst [vmem:[#allocation18_spill] sm:$0xff] %v3247_v46  ;;  %v3262_v50 = vmul.f32 %v3073_v36, %v1278_v31  ;;  %v920_v1 = vmul.f32 %v3721_v63, %v3224_v13  ;;  %v921_v46 = vmul.f32 %v3722_v47, %v3226_v62 }
  0xa7   : > { %3718 = vst [vmem:[#allocation19_spill] sm:$0xff] %v3250_v10  ;;  %3719 = vst [vmem:[#allocation20_spill] sm:$0xff] %v3253_v19  ;;  %v922_v10 = vmul.f32 %v3723_v21, %v3228_v40  ;;  %v923_v19 = vmul.f32 %v3724_v53, %v3230_v32  ;;  %v1457_v35 = vpop.permute.xlu1 %1456  ;;  %v3272_v59 = vadd.f32 %v953_v15, %v916_v44 }
  0xa8   : > { %3720 = vst [vmem:[#allocation28_spill] sm:$0xff] %v3256_v23  ;;  %v1452_v23 = vpop.permute.xlu0 %1451  ;;  %v3274_v25 = vadd.f32 %v954_v9, %v917_v18  ;;  %v3276_v36 = vadd.f32 %v955_v42, %v918_v48  ;;  %v3278_v31 = vadd.f32 %v956_v37, %v919_v7  ;;  %v3281_v63 = vmul.f32 %v3080_v60, %v1457_v35 }
  0xa9   : > { %v3284_v47 = vmul.f32 %v3084_v34, %v1457_v35  ;;  %v3287_v21 = vmul.f32 %v3088_v2, %v1457_v35  ;;  %v3290_v53 = vmul.f32 %v3094_v39, %v1457_v35  ;;  %v3293_v15 = vmul.f32 %v3080_v60, %v1452_v23 }
  0xaa   : > { %3725 = vst [vmem:[#allocation29_spill] sm:$0xff] %v3281_v63  ;;  %v3296_v9 = vmul.f32 %v3084_v34, %v1452_v23  ;;  %v3299_v42 = vmul.f32 %v3088_v2, %v1452_v23  ;;  %v3302_v37 = vmul.f32 %v3094_v39, %v1452_v23  ;;  %v3305_v44 = vadd.f32 %v3165_v8, %v920_v1  ;;  %v3739_v1 = vld [vmem:[#allocation9_spill] sm:$0xff] }
  0xab   : > { %3726 = vst [vmem:[#allocation30_spill] sm:$0xff] %v3284_v47  ;;  %3727 = vst [vmem:[#allocation31_spill] sm:$0xff] %v3287_v21  ;;  %v3308_v18 = vadd.f32 %v3168_v29, %v921_v46  ;;  %v3311_v48 = vadd.f32 %v3171_v24, %v922_v10  ;;  %v3314_v60 = vadd.f32 %v3174_v20, %v923_v19  ;;  %v1631_v34 = vpop.permute.xlu1 %1630  ;;  %v3733_v46 = vld [vmem:[#allocation6_spill] sm:$0xff]  ;;  %v3735_v10 = vld [vmem:[#allocation7_spill] sm:$0xff] }
  0xac   : > { %3728 = vst [vmem:[#allocation24_spill] sm:$0xff] %v3290_v53  ;;  %3729 = vst [vmem:[#allocation25_spill] sm:$0xff] %v3293_v15  ;;  %v1626_v7 = vpop.permute.xlu0 %1625  ;;  %v1090_v2 = vmul.f32 %v2915_v0, %v3272_v59  ;;  %v1091_v39 = vmul.f32 %v2919_v57, %v3274_v25  ;;  %v1092_v8 = vmul.f32 %v2923_v33, %v3276_v36  ;;  %v3737_v19 = vld [vmem:[#allocation8_spill] sm:$0xff] }
  0xad   : > { %3730 = vst [vmem:[#allocation26_spill] sm:$0xff] %v3296_v9  ;;  %3731 = vst [vmem:[#allocation27_spill] sm:$0xff] %v3299_v42  ;;  %v1093_v29 = vmul.f32 %v2929_v58, %v3278_v31  ;;  %v3325_v24 = vmul.f32 %v3733_v46, %v1631_v34  ;;  %v3328_v20 = vmul.f32 %v3735_v10, %v1631_v34 }
  0xae   : > { %3732 = vst [vmem:[#allocation64_spill] sm:$0xff] %v3302_v37  ;;  %v3331_v23 = vmul.f32 %v3737_v19, %v1631_v34  ;;  %v3334_v0 = vmul.f32 %v3739_v1, %v1631_v34  ;;  %v3337_v57 = vmul.f32 %v3733_v46, %v1626_v7  ;;  %v3340_v33 = vmul.f32 %v3735_v10, %v1626_v7  ;;  %v3747_v34 = vld [vmem:[#allocation34_spill] sm:$0xff] }
  0xaf   : > { %3734 = vst [vmem:[#allocation6_spill] sm:$0xff] %v3325_v24  ;;  %3736 = vst [vmem:[#allocation7_spill] sm:$0xff] %v3328_v20  ;;  %v3343_v58 = vmul.f32 %v3737_v19, %v1626_v7  ;;  %v3346_v35 = vmul.f32 %v3739_v1, %v1626_v7  ;;  %v3745_v20 = vld [vmem:[#allocation32_spill] sm:$0xff]  ;;  %v1097_v46 = vmul.f32 %v2912_v52, %v3314_v60  ;;  %v1805_v10 = vpop.permute.xlu1 %1804 }
  0xb0   : > { %3738 = vst [vmem:[#allocation8_spill] sm:$0xff] %v3331_v23  ;;  %3740 = vst [vmem:[#allocation9_spill] sm:$0xff] %v3334_v0  ;;  %v1094_v24 = vmul.f32 %v3745_v20, %v3305_v44  ;;  %v3746_v23 = vld [vmem:[#allocation33_spill] sm:$0xff]  ;;  %v1096_v0 = vmul.f32 %v3747_v34, %v3311_v48  ;;  %v3357_v19 = vadd.f32 %v3213_v5, %v1090_v2  ;;  %v3750_v34 = vld [vmem:[#allocation11_spill] sm:$0xff] }
  0xb1   : > { %3741 = vst [vmem:[#allocation65_spill] sm:$0xff] %v3337_v57  ;;  %3742 = vst [vmem:[#allocation66_spill] sm:$0xff] %v3340_v33  ;;  %v1095_v37 = vmul.f32 %v3746_v23, %v3308_v18  ;;  %v1800_v33 = vpop.permute.xlu0 %1799  ;;  %v3360_v7 = vadd.f32 %v3216_v41, %v1091_v39  ;;  %v3363_v1 = vadd.f32 %v3219_v54, %v1092_v8  ;;  %v3748_v23 = vld [vmem:[#allocation10_spill] sm:$0xff]  ;;  %v3752_v52 = vld [vmem:[#allocation12_spill] sm:$0xff] }
  0xb2   : > { %3743 = vst [vmem:[#allocation67_spill] sm:$0xff] %v3343_v58  ;;  %3744 = vst [vmem:[#allocation68_spill] sm:$0xff] %v3346_v35  ;;  %v3366_v20 = vadd.f32 %v3222_v61, %v1093_v29  ;;  %v3369_v35 = vmul.f32 %v3748_v23, %v1805_v10  ;;  %v3372_v58 = vmul.f32 %v3750_v34, %v1805_v10  ;;  %v3754_v5 = vld [vmem:[#allocation13_spill] sm:$0xff] }
  0xb3   : > { %v3375_v57 = vmul.f32 %v3752_v52, %v1805_v10  ;;  %v3378_v2 = vmul.f32 %v3754_v5, %v1805_v10  ;;  %v3381_v41 = vmul.f32 %v3748_v23, %v1800_v33  ;;  %v3384_v54 = vmul.f32 %v3750_v34, %v1800_v33  ;;  %v629_v34 = vpop.permute.xlu1 %628 }
  0xb4   : > { %3749 = vst [vmem:[#allocation32_spill] sm:$0xff] %v3369_v35  ;;  %3751 = vst [vmem:[#allocation33_spill] sm:$0xff] %v3372_v58  ;;  %v3387_v61 = vmul.f32 %v3752_v52, %v1800_v33  ;;  %v3390_v39 = vmul.f32 %v3754_v5, %v1800_v33  ;;  %v3393_v8 = vadd.f32 %v3201_v17, %v1094_v24 }
  0xb5   : > { %3753 = vst [vmem:[#allocation34_spill] sm:$0xff] %v3375_v57  ;;  %3755 = vst [vmem:[#allocation10_spill] sm:$0xff] %v3378_v2  ;;  %v3396_v29 = vadd.f32 %v3204_v11, %v1095_v37  ;;  %v3399_v10 = vadd.f32 %v3207_v45, %v1096_v0  ;;  %v3402_v23 = vadd.f32 %v3210_v51, %v1097_v46  ;;  %v3760_v0 = vld [vmem:[#allocation58_spill] sm:$0xff] }
  0xb6   : > { %3756 = vst [vmem:[#allocation11_spill] sm:$0xff] %v3381_v41  ;;  %3757 = vst [vmem:[#allocation12_spill] sm:$0xff] %v3384_v54  ;;  %v624_v54 = vpop.permute.xlu0 %623  ;;  %v3406_v52 = vmul.f32 %v2959_v27, %v3357_v19  ;;  %v3410_v33 = vmul.f32 %v2961_v16, %v3360_v7  ;;  %v3414_v17 = vmul.f32 %v2963_v26, %v3363_v1  ;;  %v3761_v26 = vld [vmem:[#allocation59_spill] sm:$0xff] }
  0xb7   : > { %3758 = vst [vmem:[#allocation13_spill] sm:$0xff] %v3387_v61  ;;  %3759 = vst [vmem:[#allocation69_spill] sm:$0xff] %v3390_v39  ;;  %v3418_v11 = vmul.f32 %v2965_v28, %v3366_v20  ;;  %v635_v45 = vmul.f32 %v629_v34, %v3154_v38  ;;  %v636_v51 = vmul.f32 %v629_v34, %v3156_v22  ;;  %v3762_v39 = vld [vmem:[#allocation35_spill] sm:$0xff]  ;;  %v3763_v38 = vld [vmem:[#allocation36_spill] sm:$0xff] }
  0xb8   : > { %v637_v37 = vmul.f32 %v629_v34, %v3158_v14  ;;  %v638_v27 = vmul.f32 %v629_v34, %v3160_v30  ;;  %v631_v24 = vmul.f32 %v624_v54, %v3122_v56  ;;  %v632_v16 = vmul.f32 %v624_v54, %v3124_v6  ;;  %v3764_v22 = vld [vmem:[#allocation37_spill] sm:$0xff]  ;;  %v3765_v56 = vld [vmem:[#allocation38_spill] sm:$0xff] }
  0xb9   : > { %v633_v46 = vmul.f32 %v624_v54, %v3760_v0  ;;  %v634_v5 = vmul.f32 %v624_v54, %v3761_v26  ;;  %v3430_v28 = vmul.f32 %v3762_v39, %v3393_v8  ;;  %v3434_v61 = vmul.f32 %v3763_v38, %v3396_v29  ;;  %v806_v26 = vpop.permute.xlu1 %805 }
  0xba   : > { %v3438_v14 = vmul.f32 %v3764_v22, %v3399_v10  ;;  %v3442_v30 = vmul.f32 %v3765_v56, %v3402_v23  ;;  %v639_v6 = vadd.f32 %v635_v45, %v631_v24  ;;  %v646_v34 = vadd.f32 %v636_v51, %v632_v16  ;;  %v801_v41 = vpop.permute.xlu0 %800 }
  0xbb   : > { %v653_v0 = vadd.f32 %v637_v37, %v633_v46  ;;  %v660_v54 = vadd.f32 %v638_v27, %v634_v5  ;;  %v812_v39 = vmul.f32 %v806_v26, %v3224_v13  ;;  %v813_v2 = vmul.f32 %v806_v26, %v3226_v62 }
  0xbc   : > { %v814_v38 = vmul.f32 %v806_v26, %v3228_v40  ;;  %v815_v57 = vmul.f32 %v806_v26, %v3230_v32  ;;  %v640_v22 = vrot.slane %v639_v6, 4  ;;  %v647_v58 = vrot.slane %v646_v34, 4 }
  0xbd   : > { %v654_v35 = vrot.slane %v653_v0, 4  ;;  %v661_v42 = vrot.slane %v660_v54, 4  ;;  %v808_v56 = vmul.f32 %v801_v41, %v3192_v43  ;;  %v809_v45 = vmul.f32 %v801_v41, %v3194_v55 }
  0xbe   : > { %v810_v51 = vmul.f32 %v801_v41, %v3196_v12  ;;  %v811_v37 = vmul.f32 %v801_v41, %v3198_v4  ;;  %v641_v27 = vadd.f32 %v640_v22, %v639_v6  ;;  %v648_v13 = vadd.f32 %v647_v58, %v646_v34 }
  0xbf   : > { %v655_v24 = vadd.f32 %v654_v35, %v653_v0  ;;  %v662_v62 = vadd.f32 %v661_v42, %v660_v54  ;;  %v816_v16 = vadd.f32 %v812_v39, %v808_v56  ;;  %v823_v40 = vadd.f32 %v813_v2, %v809_v45  ;;  %v980_v0 = vpop.permute.xlu1 %979 }
  0xc0   : > { %v830_v46 = vadd.f32 %v814_v38, %v810_v51  ;;  %v837_v32 = vadd.f32 %v815_v57, %v811_v37  ;;  %v642_v5 = vrot.slane %v641_v27, 2  ;;  %v649_v26 = vrot.slane %v648_v13, 2 }
  0xc1   : > { %v656_v9 = vrot.slane %v655_v24, 2  ;;  %v663_v15 = vrot.slane %v662_v62, 2  ;;  %v817_v53 = vrot.slane %v816_v16, 4  ;;  %v824_v43 = vrot.slane %v823_v40, 4 }
  0xc2   : > { %v831_v21 = vrot.slane %v830_v46, 4  ;;  %v838_v55 = vrot.slane %v837_v32, 4  ;;  %v643_v47 = vadd.f32 %v642_v5, %v641_v27  ;;  %v650_v12 = vadd.f32 %v649_v26, %v648_v13 }
  0xc3   : > { %v657_v63 = vadd.f32 %v656_v9, %v655_v24  ;;  %v664_v4 = vadd.f32 %v663_v15, %v662_v62  ;;  %v818_v41 = vadd.f32 %v817_v53, %v816_v16  ;;  %v825_v58 = vadd.f32 %v824_v43, %v823_v40 }
  0xc4   : > { %v832_v35 = vadd.f32 %v831_v21, %v830_v46  ;;  %v839_v42 = vadd.f32 %v838_v55, %v837_v32  ;;  %v644_v6 = vrot.slane %v643_v47, 1  ;;  %v651_v2 = vrot.slane %v650_v12, 1  ;;  %v975_v46 = vpop.permute.xlu0 %974 }
  0xc5   : > { %v658_v34 = vrot.slane %v657_v63, 1  ;;  %v665_v57 = vrot.slane %v664_v4, 1  ;;  %v3766_v54 = vlaneseq  ;;  %v819_v38 = vrot.slane %v818_v41, 2 }
  0xc6   : > { %v826_v22 = vrot.slane %v825_v58, 2  ;;  %v833_v56 = vrot.slane %v832_v35, 2  ;;  %v840_v45 = vrot.slane %v839_v42, 2  ;;  %v645_v9 = vadd.f32 %v644_v6, %v643_v47  ;;  %v3769_v47 = vld [vmem:[#allocation40_spill] sm:$0xff] }
  0xc7   : > { %vm3453_vm0 = vcmp.lt.s32.totalorder %v3766_v54, 512  ;;  %v652_v15 = vadd.f32 %v651_v2, %v650_v12  ;;  %v659_v53 = vadd.f32 %v658_v34, %v657_v63  ;;  %v666_v51 = vadd.f32 %v665_v57, %v664_v4 }
  0xc8   : > { %v820_v21 = vadd.f32 %v819_v38, %v818_v41  ;;  %v827_v37 = vadd.f32 %v826_v22, %v825_v58  ;;  %v834_v27 = vadd.f32 %v833_v56, %v832_v35  ;;  %v841_v13 = vadd.f32 %v840_v45, %v839_v42  ;;  %v1154_v41 = vpop.permute.xlu1 %1153 }
  0xc9   : > { %v671_v24 = vcombine.low %v645_v9, %v652_v15  ;;  %v672_v62 = vcombine.low %v659_v53, %v666_v51  ;;  %v986_v16 = vmul.f32 %v980_v0, %v3305_v44  ;;  %v987_v40 = vmul.f32 %v980_v0, %v3308_v18 }
  0xca   : > { %v821_v32 = vrot.slane %v820_v21, 1  ;;  %v828_v5 = vrot.slane %v827_v37, 1  ;;  %v835_v26 = vrot.slane %v834_v27, 1  ;;  %v842_v43 = vrot.slane %v841_v13, 1 }
  0xcb   : > { %v679_v55 = vrot.slane %v671_v24, %v3769_v47  ;;  %v686_v63 = vrot.slane %v672_v62, %v3769_v47  ;;  %v988_v12 = vmul.f32 %v980_v0, %v3311_v48  ;;  %v989_v4 = vmul.f32 %v980_v0, %v3314_v60 }
  0xcc   : > { %v822_v58 = vadd.f32 %v821_v32, %v820_v21  ;;  %v829_v35 = vadd.f32 %v828_v5, %v827_v37  ;;  %v836_v44 = vadd.f32 %v835_v26, %v834_v27  ;;  %v843_v42 = vadd.f32 %v842_v43, %v841_v13 }
  0xcd   : > { %v687_v18 = vcombine.low %v679_v55, %v686_v63  ;;  %v982_v6 = vmul.f32 %v975_v46, %v3272_v59  ;;  %v983_v2 = vmul.f32 %v975_v46, %v3274_v25  ;;  %v984_v34 = vmul.f32 %v975_v46, %v3276_v36  ;;  %v1149_v25 = vpop.permute.xlu0 %1148 }
  0xce   : > { %v848_v48 = vcombine.low %v822_v58, %v829_v35  ;;  %v849_v60 = vcombine.low %v836_v44, %v843_v42  ;;  %v985_v57 = vmul.f32 %v975_v46, %v3278_v31  ;;  %v1160_v0 = vmul.f32 %v1154_v41, %v3393_v8 }
  0xcf   : > { %v694_v54 = vrot.slane %v687_v18, %v3769_v47  ;;  %v990_v38 = vadd.f32 %v986_v16, %v982_v6  ;;  %v997_v59 = vadd.f32 %v987_v40, %v983_v2  ;;  %v1004_v22 = vadd.f32 %v988_v12, %v984_v34 }
  0xd0   : > { %v856_v36 = vrot.slane %v848_v48, %v3769_v47  ;;  %v863_v56 = vrot.slane %v849_v60, %v3769_v47  ;;  %v1011_v45 = vadd.f32 %v989_v4, %v985_v57  ;;  %v1161_v9 = vmul.f32 %v1154_v41, %v3396_v29 }
  0xd1   : > { %700 = vst.msk [vmem:[%s3470_s24] ss:$8 sm:$0xf] %vm3453_vm0, %v694_v54  ;;  %v991_v15 = vrot.slane %v990_v38, 4  ;;  %v998_v31 = vrot.slane %v997_v59, 4  ;;  %v1005_v53 = vrot.slane %v1004_v22, 4  ;;  %v1162_v8 = vmul.f32 %v1154_v41, %v3399_v10 }
  0xd2   : > { %v864_v51 = vcombine.low %v856_v36, %v863_v56  ;;  %v1012_v21 = vrot.slane %v1011_v45, 4  ;;  %v1163_v37 = vmul.f32 %v1154_v41, %v3402_v23  ;;  %v1156_v27 = vmul.f32 %v1149_v25, %v3357_v19 }
  0xd3   : > { %v992_v13 = vadd.f32 %v991_v15, %v990_v38  ;;  %v999_v24 = vadd.f32 %v998_v31, %v997_v59  ;;  %v1006_v62 = vadd.f32 %v1005_v53, %v1004_v22  ;;  %v1157_v29 = vmul.f32 %v1149_v25, %v3360_v7  ;;  %v3770_v15 = vld [vmem:[#allocation17_spill] sm:$0xff] }
  0xd4   : > { %v871_v16 = vrot.slane %v864_v51, %v3769_v47  ;;  %v1013_v40 = vadd.f32 %v1012_v21, %v1011_v45  ;;  %v1158_v46 = vmul.f32 %v1149_v25, %v3363_v1  ;;  %v1159_v32 = vmul.f32 %v1149_v25, %v3366_v20 }
  0xd5   : > { %v993_v10 = vrot.slane %v992_v13, 2  ;;  %v1000_v5 = vrot.slane %v999_v24, 2  ;;  %v1007_v26 = vrot.slane %v1006_v62, 2  ;;  %v1164_v43 = vadd.f32 %v1160_v0, %v1156_v27 }
  0xd6   : > { %2191 = vst.msk [vmem:[%s3470_s24 + $0x1] ss:$8 sm:$0xf] %vm3453_vm0, %v871_v16  ;;  %v1014_v19 = vrot.slane %v1013_v40, 2  ;;  %v1171_v23 = vadd.f32 %v1161_v9, %v1157_v29  ;;  %v1178_v55 = vadd.f32 %v1162_v8, %v1158_v46  ;;  %v1185_v63 = vadd.f32 %v1163_v37, %v1159_v32  ;;  %v1328_v37 = vpop.permute.xlu1 %1327  ;;  %v3772_v29 = vld [vmem:[#allocation19_spill] sm:$0xff] }
  0xd7   : > { %v994_v12 = vadd.f32 %v993_v10, %v992_v13  ;;  %v1001_v7 = vadd.f32 %v1000_v5, %v999_v24  ;;  %v1008_v4 = vadd.f32 %v1007_v26, %v1006_v62  ;;  %v1165_v41 = vrot.slane %v1164_v43, 4  ;;  %v3771_v24 = vld [vmem:[#allocation18_spill] sm:$0xff] }
  0xd8   : > { %v1015_v58 = vadd.f32 %v1014_v19, %v1013_v40  ;;  %v1172_v35 = vrot.slane %v1171_v23, 4  ;;  %v1179_v1 = vrot.slane %v1178_v55, 4  ;;  %v1186_v44 = vrot.slane %v1185_v63, 4 }
  0xd9   : > { %v995_v20 = vrot.slane %v994_v12, 1  ;;  %v1002_v42 = vrot.slane %v1001_v7, 1  ;;  %v1009_v18 = vrot.slane %v1008_v4, 1  ;;  %v1166_v6 = vadd.f32 %v1165_v41, %v1164_v43 }
  0xda   : > { %v1016_v2 = vrot.slane %v1015_v58, 1  ;;  %v1173_v34 = vadd.f32 %v1172_v35, %v1171_v23  ;;  %v1180_v48 = vadd.f32 %v1179_v1, %v1178_v55  ;;  %v1187_v60 = vadd.f32 %v1186_v44, %v1185_v63  ;;  %v1323_v55 = vpop.permute.xlu0 %1322 }
  0xdb   : > { %v996_v57 = vadd.f32 %v995_v20, %v994_v12  ;;  %v1003_v0 = vadd.f32 %v1002_v42, %v1001_v7  ;;  %v1010_v54 = vadd.f32 %v1009_v18, %v1008_v4  ;;  %v1167_v38 = vrot.slane %v1166_v6, 2  ;;  %v3775_v18 = vld [vmem:[#allocation41_spill] sm:$0xff] }
  0xdc   : > { %v1017_v59 = vadd.f32 %v1016_v2, %v1015_v58  ;;  %v1174_v22 = vrot.slane %v1173_v34, 2  ;;  %v1181_v25 = vrot.slane %v1180_v48, 2  ;;  %v1188_v36 = vrot.slane %v1187_v60, 2 }
  0xdd   : > { %v1022_v56 = vcombine.low %v996_v57, %v1003_v0  ;;  %v1168_v45 = vadd.f32 %v1167_v38, %v1166_v6  ;;  %v1313_v9 = vadd.f32 %v3241_v3, %v3430_v28  ;;  %v1314_v31 = vadd.f32 %v3770_v15, %v3434_v61  ;;  %v3777_v57 = vld [vmem:[#allocation43_spill] sm:$0xff]  ;;  %v3778_v38 = vld [vmem:[#allocation44_spill] sm:$0xff] }
  0xde   : > { %v1023_v53 = vcombine.low %v1010_v54, %v1017_v59  ;;  %v1175_v8 = vadd.f32 %v1174_v22, %v1173_v34  ;;  %v1182_v51 = vadd.f32 %v1181_v25, %v1180_v48  ;;  %v1189_v21 = vadd.f32 %v1188_v36, %v1187_v60  ;;  %v1502_v54 = vpop.permute.xlu1 %1501  ;;  %v3779_v22 = vld [vmem:[#allocation29_spill] sm:$0xff] }
  0xdf   : > { %v1030_v27 = vrot.slane %v1022_v56, %v3769_v47  ;;  %v1169_v13 = vrot.slane %v1168_v45, 1  ;;  %v1315_v62 = vadd.f32 %v3771_v24, %v3438_v14  ;;  %v1316_v16 = vadd.f32 %v3772_v29, %v3442_v30  ;;  %v3773_v14 = vld [vmem:[#allocation20_spill] sm:$0xff] }
  0xe0   : > { %v1037_v40 = vrot.slane %v1023_v53, %v3769_v47  ;;  %v1176_v3 = vrot.slane %v1175_v8, 1  ;;  %v1183_v28 = vrot.slane %v1182_v51, 1  ;;  %v1190_v46 = vrot.slane %v1189_v21, 1  ;;  %v3774_v30 = vld [vmem:[#allocation28_spill] sm:$0xff] }
  0xe1   : > { %v1170_v61 = vadd.f32 %v1169_v13, %v1168_v45  ;;  %v1334_v32 = vmul.f32 %v1328_v37, %v1313_v9  ;;  %v1335_v10 = vmul.f32 %v1328_v37, %v1314_v31  ;;  %v1336_v5 = vmul.f32 %v1328_v37, %v1315_v62 }
  0xe2   : > { %v1038_v26 = vcombine.low %v1030_v27, %v1037_v40  ;;  %v1177_v43 = vadd.f32 %v1176_v3, %v1175_v8  ;;  %v1184_v19 = vadd.f32 %v1183_v28, %v1182_v51  ;;  %v1191_v23 = vadd.f32 %v1190_v46, %v1189_v21  ;;  %v3781_v8 = vld [vmem:[#allocation31_spill] sm:$0xff]  ;;  %v3782_v21 = vld [vmem:[#allocation24_spill] sm:$0xff] }
  0xe3   : > { %v1337_v63 = vmul.f32 %v1328_v37, %v1316_v16  ;;  %v1309_v12 = vadd.f32 %v3773_v14, %v3406_v52  ;;  %v1310_v7 = vadd.f32 %v3774_v30, %v3410_v33  ;;  %v1311_v4 = vadd.f32 %v3259_v49, %v3414_v17  ;;  %v3776_v17 = vld [vmem:[#allocation42_spill] sm:$0xff] }
  0xe4   : > { %v1045_v41 = vrot.slane %v1038_v26, %v3769_v47  ;;  %v1196_v58 = vcombine.low %v1170_v61, %v1177_v43  ;;  %v1197_v35 = vcombine.low %v1184_v19, %v1191_v23  ;;  %v1312_v1 = vadd.f32 %v3262_v50, %v3418_v11  ;;  %v1497_v26 = vpop.permute.xlu0 %1496  ;;  %v3784_v43 = vld [vmem:[#allocation46_spill] sm:$0xff]  ;;  %v3785_v23 = vld [vmem:[#allocation47_spill] sm:$0xff] }
  0xe5   : > { %v1330_v44 = vmul.f32 %v1323_v55, %v1309_v12  ;;  %v1331_v20 = vmul.f32 %v1323_v55, %v1310_v7  ;;  %v1332_v42 = vmul.f32 %v1323_v55, %v1311_v4  ;;  %v1442_v6 = vmul.f32 %v3775_v18, %v1313_v9  ;;  %v3780_v9 = vld [vmem:[#allocation30_spill] sm:$0xff] }
  0xe6   : > { %2196 = vst.msk [vmem:[%s3470_s24 + $0x2] ss:$8 sm:$0xf] %vm3453_vm0, %v1045_v41  ;;  %v1204_v52 = vrot.slane %v1196_v58, %v3769_v47  ;;  %v1211_v33 = vrot.slane %v1197_v35, %v3769_v47  ;;  %v1333_v49 = vmul.f32 %v1323_v55, %v1312_v1  ;;  %v1443_v2 = vmul.f32 %v3776_v17, %v1314_v31  ;;  %v3787_v35 = vld [vmem:[#allocation25_spill] sm:$0xff] }
  0xe7   : > { %v1338_v34 = vadd.f32 %v1334_v32, %v1330_v44  ;;  %v1345_v48 = vadd.f32 %v1335_v10, %v1331_v20  ;;  %v1352_v60 = vadd.f32 %v1336_v5, %v1332_v42  ;;  %v1444_v50 = vmul.f32 %v3777_v57, %v1315_v62  ;;  %v3783_v32 = vld [vmem:[#allocation45_spill] sm:$0xff]  ;;  %v3788_v42 = vld [vmem:[#allocation26_spill] sm:$0xff] }
  0xe8   : > { %v1212_v11 = vcombine.low %v1204_v52, %v1211_v33  ;;  %v1359_v0 = vadd.f32 %v1337_v63, %v1333_v49  ;;  %v1445_v59 = vmul.f32 %v3778_v38, %v1316_v16  ;;  %v1487_v25 = vadd.f32 %v3779_v22, %v1442_v6  ;;  %v3786_v63 = vld [vmem:[#allocation48_spill] sm:$0xff]  ;;  %v3789_v6 = vld [vmem:[#allocation27_spill] sm:$0xff] }
  0xe9   : > { %v1339_v36 = vrot.slane %v1338_v34, 4  ;;  %v1346_v56 = vrot.slane %v1345_v48, 4  ;;  %v1353_v45 = vrot.slane %v1352_v60, 4  ;;  %v1488_v15 = vadd.f32 %v3780_v9, %v1443_v2  ;;  %v3790_v33 = vld [vmem:[#allocation64_spill] sm:$0xff]  ;;  %v3792_v9 = vld [vmem:[#allocation50_spill] sm:$0xff] }
  0xea   : > { %v1219_v31 = vrot.slane %v1212_v11, %v3769_v47  ;;  %v1360_v53 = vrot.slane %v1359_v0, 4  ;;  %v1489_v51 = vadd.f32 %v3781_v8, %v1444_v50  ;;  %v1490_v37 = vadd.f32 %v3782_v21, %v1445_v59 }
  0xeb   : > { %v1340_v27 = vadd.f32 %v1339_v36, %v1338_v34  ;;  %v1347_v13 = vadd.f32 %v1346_v56, %v1345_v48  ;;  %v1354_v24 = vadd.f32 %v1353_v45, %v1352_v60  ;;  %v1508_v62 = vmul.f32 %v1502_v54, %v1487_v25  ;;  %v3791_v56 = vld [vmem:[#allocation49_spill] sm:$0xff] }
  0xec   : > { %2201 = vst.msk [vmem:[%s3470_s24 + $0x3] ss:$8 sm:$0xf] %vm3453_vm0, %v1219_v31  ;;  %v1361_v29 = vadd.f32 %v1360_v53, %v1359_v0  ;;  %v1509_v16 = vmul.f32 %v1502_v54, %v1488_v15  ;;  %v1510_v40 = vmul.f32 %v1502_v54, %v1489_v51  ;;  %v1511_v3 = vmul.f32 %v1502_v54, %v1490_v37 }
  0xed   : > { %v1341_v28 = vrot.slane %v1340_v27, 2  ;;  %v1348_v46 = vrot.slane %v1347_v13, 2  ;;  %v1355_v61 = vrot.slane %v1354_v24, 2  ;;  %v1438_v10 = vmul.f32 %v3783_v32, %v1309_v12  ;;  %v1676_v32 = vpop.permute.xlu1 %1675 }
  0xee   : > { %v1362_v5 = vrot.slane %v1361_v29, 2  ;;  %v1439_v19 = vmul.f32 %v3784_v43, %v1310_v7  ;;  %v1440_v55 = vmul.f32 %v3785_v23, %v1311_v4  ;;  %v1441_v14 = vmul.f32 %v3786_v63, %v1312_v1  ;;  %v3797_v43 = vld [vmem:[#allocation8_spill] sm:$0xff] }
  0xef   : > { %v1342_v30 = vadd.f32 %v1341_v28, %v1340_v27  ;;  %v1349_v41 = vadd.f32 %v1348_v46, %v1347_v13  ;;  %v1356_v58 = vadd.f32 %v1355_v61, %v1354_v24  ;;  %v1483_v44 = vadd.f32 %v3787_v35, %v1438_v10  ;;  %v3795_v10 = vld [vmem:[#allocation6_spill] sm:$0xff] }
  0xf0   : > { %v1363_v20 = vadd.f32 %v1362_v5, %v1361_v29  ;;  %v1484_v18 = vadd.f32 %v3788_v42, %v1439_v19  ;;  %v1485_v52 = vadd.f32 %v3789_v6, %v1440_v55  ;;  %v1486_v12 = vadd.f32 %v3790_v33, %v1441_v14  ;;  %v3793_v29 = vld [vmem:[#allocation51_spill] sm:$0xff] }
  0xf1   : > { %v1343_v49 = vrot.slane %v1342_v30, 1  ;;  %v1350_v17 = vrot.slane %v1349_v41, 1  ;;  %v1357_v2 = vrot.slane %v1356_v58, 1  ;;  %v1504_v7 = vmul.f32 %v1497_v26, %v1483_v44  ;;  %v3796_v5 = vld [vmem:[#allocation7_spill] sm:$0xff] }
  0xf2   : > { %v1364_v34 = vrot.slane %v1363_v20, 1  ;;  %v1505_v4 = vmul.f32 %v1497_v26, %v1484_v18  ;;  %v1506_v48 = vmul.f32 %v1497_v26, %v1485_v52  ;;  %v1507_v1 = vmul.f32 %v1497_v26, %v1486_v12 }
  0xf3   : > { %v1344_v60 = vadd.f32 %v1343_v49, %v1342_v30  ;;  %v1351_v57 = vadd.f32 %v1350_v17, %v1349_v41  ;;  %v1358_v50 = vadd.f32 %v1357_v2, %v1356_v58  ;;  %v1512_v11 = vadd.f32 %v1508_v62, %v1504_v7  ;;  %v3794_v62 = vld [vmem:[#allocation52_spill] sm:$0xff]  ;;  %v3799_v2 = vld [vmem:[#allocation53_spill] sm:$0xff] }
  0xf4   : > { %v1365_v0 = vadd.f32 %v1364_v34, %v1363_v20  ;;  %v1519_v54 = vadd.f32 %v1509_v16, %v1505_v4  ;;  %v1526_v38 = vadd.f32 %v1510_v40, %v1506_v48  ;;  %v1533_v59 = vadd.f32 %v1511_v3, %v1507_v1  ;;  %v1671_v1 = vpop.permute.xlu0 %1670 }
  0xf5   : > { %v1370_v22 = vcombine.low %v1344_v60, %v1351_v57  ;;  %v1513_v36 = vrot.slane %v1512_v11, 4  ;;  %v1616_v45 = vmul.f32 %v3791_v56, %v1487_v25  ;;  %v1617_v31 = vmul.f32 %v3792_v9, %v1488_v15  ;;  %v3800_v60 = vld [vmem:[#allocation54_spill] sm:$0xff] }
  0xf6   : > { %v1371_v53 = vcombine.low %v1358_v50, %v1365_v0  ;;  %v1520_v8 = vrot.slane %v1519_v54, 4  ;;  %v1527_v21 = vrot.slane %v1526_v38, 4  ;;  %v1534_v27 = vrot.slane %v1533_v59, 4 }
  0xf7   : > { %v1378_v13 = vrot.slane %v1370_v22, %v3769_v47  ;;  %v1514_v24 = vadd.f32 %v1513_v36, %v1512_v11  ;;  %v1618_v28 = vmul.f32 %v3793_v29, %v1489_v51  ;;  %v1619_v46 = vmul.f32 %v3794_v62, %v1490_v37  ;;  %v3798_v37 = vld [vmem:[#allocation9_spill] sm:$0xff]  ;;  %v3801_v11 = vld [vmem:[#allocation55_spill] sm:$0xff] }
  0xf8   : > { %v1385_v16 = vrot.slane %v1371_v53, %v3769_v47  ;;  %v1521_v40 = vadd.f32 %v1520_v8, %v1519_v54  ;;  %v1528_v3 = vadd.f32 %v1527_v21, %v1526_v38  ;;  %v1535_v61 = vadd.f32 %v1534_v27, %v1533_v59  ;;  %v3802_v54 = vld [vmem:[#allocation56_spill] sm:$0xff]  ;;  %v3803_v59 = vld [vmem:[#allocation65_spill] sm:$0xff] }
  0xf9   : > { %v1515_v25 = vrot.slane %v1514_v24, 2  ;;  %v1661_v15 = vadd.f32 %v3795_v10, %v1616_v45  ;;  %v1662_v26 = vadd.f32 %v3796_v5, %v1617_v31  ;;  %v1663_v19 = vadd.f32 %v3797_v43, %v1618_v28  ;;  %v3805_v31 = vld [vmem:[#allocation67_spill] sm:$0xff]  ;;  %v3806_v8 = vld [vmem:[#allocation68_spill] sm:$0xff]  ;;  %v3810_v10 = vld [vmem:[#allocation62_spill] sm:$0xff] }
  0xfa   : > { %v1386_v23 = vcombine.low %v1378_v13, %v1385_v16  ;;  %v1522_v55 = vrot.slane %v1521_v40, 2  ;;  %v1529_v63 = vrot.slane %v1528_v3, 2  ;;  %v1536_v51 = vrot.slane %v1535_v61, 2  ;;  %v3807_v13 = vld [vmem:[#allocation57_spill] sm:$0xff] }
  0xfb   : > { %v1516_v14 = vadd.f32 %v1515_v25, %v1514_v24  ;;  %v1664_v30 = vadd.f32 %v3798_v37, %v1619_v46  ;;  %v1682_v41 = vmul.f32 %v1676_v32, %v1661_v15  ;;  %v1683_v58 = vmul.f32 %v1676_v32, %v1662_v26  ;;  %v3812_v37 = vld [vmem:[#allocation33_spill] sm:$0xff] }
  0xfc   : > { %v1393_v35 = vrot.slane %v1386_v23, %v3769_v47  ;;  %v1523_v20 = vadd.f32 %v1522_v55, %v1521_v40  ;;  %v1530_v42 = vadd.f32 %v1529_v63, %v1528_v3  ;;  %v1537_v6 = vadd.f32 %v1536_v51, %v1535_v61  ;;  %v3809_v40 = vld [vmem:[#allocation61_spill] sm:$0xff]  ;;  %v1850_v55 = vpop.permute.xlu1 %1849  ;;  %v3811_v63 = vld [vmem:[#allocation32_spill] sm:$0xff] }
  0xfd   : > { %v1517_v33 = vrot.slane %v1516_v14, 1  ;;  %v1684_v49 = vmul.f32 %v1676_v32, %v1663_v19  ;;  %v1685_v17 = vmul.f32 %v1676_v32, %v1664_v30  ;;  %v1612_v7 = vmul.f32 %v3799_v2, %v1483_v44  ;;  %v3804_v44 = vld [vmem:[#allocation66_spill] sm:$0xff] }
  0xfe   : > { %2206 = vst.msk [vmem:[%s3470_s24 + $0x4] ss:$8 sm:$0xf] %vm3453_vm0, %v1393_v35  ;;  %v1524_v34 = vrot.slane %v1523_v20, 1  ;;  %v1531_v4 = vrot.slane %v1530_v42, 1  ;;  %v1538_v48 = vrot.slane %v1537_v6, 1  ;;  %v1613_v57 = vmul.f32 %v3800_v60, %v1484_v18 }
  0xff   : > { %v1518_v50 = vadd.f32 %v1517_v33, %v1516_v14  ;;  %v1614_v0 = vmul.f32 %v3801_v11, %v1485_v52  ;;  %v1615_v38 = vmul.f32 %v3802_v54, %v1486_v12  ;;  %v1657_v22 = vadd.f32 %v3803_v59, %v1612_v7  ;;  %v3808_v52 = vld [vmem:[#allocation60_spill] sm:$0xff]  ;;  %v3813_v35 = vld [vmem:[#allocation34_spill] sm:$0xff] }
 0x100   : > { %v1525_v36 = vadd.f32 %v1524_v34, %v1523_v20  ;;  %v1532_v56 = vadd.f32 %v1531_v4, %v1530_v42  ;;  %v1539_v45 = vadd.f32 %v1538_v48, %v1537_v6  ;;  %v1658_v9 = vadd.f32 %v3804_v44, %v1613_v57  ;;  %v3814_v33 = vld [vmem:[#allocation10_spill] sm:$0xff]  ;;  %v3815_v57 = vld [vmem:[#allocation21_spill] sm:$0xff] }
 0x101   : > { %v1659_v53 = vadd.f32 %v3805_v31, %v1614_v0  ;;  %v1660_v21 = vadd.f32 %v3806_v8, %v1615_v38  ;;  %v1678_v27 = vmul.f32 %v1671_v1, %v1657_v22  ;;  %v1790_v24 = vmul.f32 %v3807_v13, %v1661_v15  ;;  %v3816_v11 = vld [vmem:[#allocation22_spill] sm:$0xff]  ;;  %v3818_v31 = vld [vmem:[#allocation63_spill] sm:$0xff] }
 0x102   : > { %v1544_v18 = vcombine.low %v1518_v50, %v1525_v36  ;;  %v1545_v29 = vcombine.low %v1532_v56, %v1539_v45  ;;  %v1679_v28 = vmul.f32 %v1671_v1, %v1658_v9  ;;  %v1791_v62 = vmul.f32 %v3808_v52, %v1662_v26  ;;  %v1845_v36 = vpop.permute.xlu0 %1844  ;;  %v3817_v56 = vld [vmem:[#allocation23_spill] sm:$0xff] }
 0x103   : > { %v1680_v12 = vmul.f32 %v1671_v1, %v1659_v53  ;;  %v1681_v46 = vmul.f32 %v1671_v1, %v1660_v21  ;;  %v1686_v16 = vadd.f32 %v1682_v41, %v1678_v27  ;;  %v1792_v3 = vmul.f32 %v3809_v40, %v1663_v19  ;;  %v3819_v27 = vld [vmem:[#allocation11_spill] sm:$0xff] }
 0x104   : > { %v1552_v61 = vrot.slane %v1544_v18, %v3769_v47  ;;  %v1559_v32 = vrot.slane %v1545_v29, %v3769_v47  ;;  %v1693_v25 = vadd.f32 %v1683_v58, %v1679_v28  ;;  %v1793_v5 = vmul.f32 %v3810_v10, %v1664_v30 }
 0x105   : > { %v1687_v43 = vrot.slane %v1686_v16, 4  ;;  %v1700_v23 = vadd.f32 %v1684_v49, %v1680_v12  ;;  %v1707_v15 = vadd.f32 %v1685_v17, %v1681_v46  ;;  %v1835_v51 = vadd.f32 %v3811_v63, %v1790_v24  ;;  %v3820_v24 = vld [vmem:[#allocation12_spill] sm:$0xff] }
 0x106   : > { %v1560_v14 = vcombine.low %v1552_v61, %v1559_v32  ;;  %v1694_v26 = vrot.slane %v1693_v25, 4  ;;  %v1836_v41 = vadd.f32 %v3812_v37, %v1791_v62  ;;  %v1837_v19 = vadd.f32 %v3813_v35, %v1792_v3  ;;  %v3821_v62 = vld [vmem:[#allocation13_spill] sm:$0xff] }
 0x107   : > { %v1688_v20 = vadd.f32 %v1687_v43, %v1686_v16  ;;  %v1701_v42 = vrot.slane %v1700_v23, 4  ;;  %v1708_v6 = vrot.slane %v1707_v15, 4  ;;  %v1838_v58 = vadd.f32 %v3814_v33, %v1793_v5  ;;  %v3823_v43 = vld [vmem:[#allocation39_spill] sm:$0xff] }
 0x108   : > { %v1567_v30 = vrot.slane %v1560_v14, %v3769_v47  ;;  %v1695_v2 = vadd.f32 %v1694_v26, %v1693_v25  ;;  %v1856_v49 = vmul.f32 %v1850_v55, %v1835_v51  ;;  %v1857_v17 = vmul.f32 %v1850_v55, %v1836_v41 }
 0x109   : > { %v1689_v7 = vrot.slane %v1688_v20, 2  ;;  %v1702_v34 = vadd.f32 %v1701_v42, %v1700_v23  ;;  %v1709_v4 = vadd.f32 %v1708_v6, %v1707_v15  ;;  %v1858_v48 = vmul.f32 %v1850_v55, %v1837_v19 }
 0x10a   : > { %2211 = vst.msk [vmem:[%s3470_s24 + $0x5] ss:$8 sm:$0xf] %vm3453_vm0, %v1567_v30  ;;  %v1696_v1 = vrot.slane %v1695_v2, 2  ;;  %v1859_v60 = vmul.f32 %v1850_v55, %v1838_v58  ;;  %v1786_v50 = vmul.f32 %v3815_v57, %v1657_v22  ;;  %v1787_v0 = vmul.f32 %v3816_v11, %v1658_v9  ;;  %v3822_v9 = vld [vmem:[#allocation69_spill] sm:$0xff] }
 0x10b   : > { %v1690_v54 = vadd.f32 %v1689_v7, %v1688_v20  ;;  %v1703_v38 = vrot.slane %v1702_v34, 2  ;;  %v1710_v59 = vrot.slane %v1709_v4, 2  ;;  %v1788_v45 = vmul.f32 %v3817_v56, %v1659_v53 }
 0x10c   : > { %v1697_v44 = vadd.f32 %v1696_v1, %v1695_v2  ;;  %v1789_v8 = vmul.f32 %v3818_v31, %v1660_v21  ;;  %v1831_v13 = vadd.f32 %v3819_v27, %v1786_v50  ;;  %v1832_v18 = vadd.f32 %v3820_v24, %v1787_v0  ;;  %v3824_v0 = vld [vmem:[#allocation14_spill] sm:$0xff]  ;;  %v3826_v31 = vld [vmem:[#allocation16_spill] sm:$0xff] }
 0x10d   : > { %v1691_v29 = vrot.slane %v1690_v54, 1  ;;  %v1704_v28 = vadd.f32 %v1703_v38, %v1702_v34  ;;  %v1711_v52 = vadd.f32 %v1710_v59, %v1709_v4  ;;  %v1833_v22 = vadd.f32 %v3821_v62, %v1788_v45  ;;  %v3825_v59 = vld [vmem:[#allocation15_spill] sm:$0xff] }
 0x10e   : > { %v1698_v12 = vrot.slane %v1697_v44, 1  ;;  %v1834_v46 = vadd.f32 %v3822_v9, %v1789_v8  ;;  %v1852_v16 = vmul.f32 %v1845_v36, %v1831_v13  ;;  %v1853_v40 = vmul.f32 %v1845_v36, %v1832_v18 }
 0x10f   : > { %v1692_v3 = vadd.f32 %v1691_v29, %v1690_v54  ;;  %v1705_v61 = vrot.slane %v1704_v28, 1  ;;  %v1712_v53 = vrot.slane %v1711_v52, 1  ;;  %v1854_v32 = vmul.f32 %v1845_v36, %v1833_v22 }
 0x110   : > { %v1699_v25 = vadd.f32 %v1698_v12, %v1697_v44  ;;  %v1855_v21 = vmul.f32 %v1845_v36, %v1834_v46  ;;  %v1860_v10 = vadd.f32 %v1856_v49, %v1852_v16  ;;  %v1867_v5 = vadd.f32 %v1857_v17, %v1853_v40  ;;  %v2418_v40 = vld [vmem:[%s2616_s23] sm:$0xff] }
 0x111   : > { %2408 = vpow2.f32 %v3823_v43  ;;  %v1706_v23 = vadd.f32 %v1705_v61, %v1704_v28  ;;  %v1713_v15 = vadd.f32 %v1712_v53, %v1711_v52  ;;  %v1874_v55 = vadd.f32 %v1858_v48, %v1854_v32  ;;  %v2419_v61 = vld [vmem:[%s2616_s23 + $0x8] sm:$0xff]  ;;  %v2420_v32 = vld [vmem:[%s2616_s23 + $0x10] sm:$0xff] }
 0x112   : > { %v1718_v63 = vcombine.low %v1692_v3, %v1699_v25  ;;  %v1861_v51 = vrot.slane %v1860_v10, 4  ;;  %v1868_v14 = vrot.slane %v1867_v5, 4  ;;  %v1881_v26 = vadd.f32 %v1859_v60, %v1855_v21  ;;  %v2421_v21 = vld [vmem:[%s2616_s23 + $0x18] sm:$0xff] }
 0x113   : > { %v1719_v37 = vcombine.low %v1706_v23, %v1713_v15  ;;  %v1875_v41 = vrot.slane %v1874_v55, 4  ;;  %v1970_v54 = vadd.f32 1.0, %v3824_v0  ;;  %v1971_v36 = vadd.f32 1.0, %v3825_v59  ;;  %v3827_v23 = vld [vmem:[#allocation2_spill] sm:$0xff] }
 0x114   : > { %v1726_v35 = vrot.slane %v1718_v63, %v3769_v47  ;;  %v1862_v19 = vadd.f32 %v1861_v51, %v1860_v10  ;;  %v1869_v20 = vadd.f32 %v1868_v14, %v1867_v5  ;;  %v1882_v42 = vrot.slane %v1881_v26, 4  ;;  %v3829_v51 = vld [vmem:[#allocation4_spill] sm:$0xff] }
 0x115   : > { %v1733_v6 = vrot.slane %v1719_v37, %v3769_v47  ;;  %v1876_v33 = vadd.f32 %v1875_v41, %v1874_v55  ;;  %v1972_v8 = vadd.f32 1.0, %v3826_v31  ;;  %2410 = vrcp.f32 %v1970_v54  ;;  %v3828_v55 = vld [vmem:[#allocation3_spill] sm:$0xff] }
 0x116   : > { %v1863_v58 = vrot.slane %v1862_v19, 2  ;;  %v1870_v30 = vrot.slane %v1869_v20, 2  ;;  %v1883_v2 = vadd.f32 %v1882_v42, %v1881_v26  ;;  %2412 = vrcp.f32 %v1971_v36  ;;  %v3830_v26 = vld [vmem:[#allocation5_spill] sm:$0xff] }
 0x117   : > { %v1734_v49 = vcombine.low %v1726_v35, %v1733_v6  ;;  %v1877_v17 = vrot.slane %v1876_v33, 2  ;;  %2414 = vrcp.f32 %v1972_v8 }
 0x118   : > { %v1864_v7 = vadd.f32 %v1863_v58, %v1862_v19  ;;  %v1871_v34 = vadd.f32 %v1870_v30, %v1869_v20  ;;  %v1884_v4 = vrot.slane %v1883_v2, 2 }
 0x119   : > { %v1741_v48 = vrot.slane %v1734_v49, %v3769_v47  ;;  %v1878_v1 = vadd.f32 %v1877_v17, %v1876_v33 }
 0x11a   : > { %v1865_v60 = vrot.slane %v1864_v7, 1  ;;  %v1872_v57 = vrot.slane %v1871_v34, 1  ;;  %v1885_v50 = vadd.f32 %v1884_v4, %v1883_v2 }
 0x11b   : > { %v2409_v11 = vpop.eup %2408  ;;  %2216 = vst.msk [vmem:[%s3470_s24 + $0x6] ss:$8 sm:$0xf] %vm3453_vm0, %v1741_v48  ;;  %v1879_v38 = vrot.slane %v1878_v1, 1 }
 0x11c   : > { %v1866_v56 = vadd.f32 %v1865_v60, %v1864_v7  ;;  %v1873_v45 = vadd.f32 %v1872_v57, %v1871_v34  ;;  %v1886_v44 = vrot.slane %v1885_v50, 1  ;;  %v1973_v13 = vadd.f32 1.0, %v2409_v11 }
 0x11d   : > { %v1880_v27 = vadd.f32 %v1879_v38, %v1878_v1 }
 0x11e   : > { %v1887_v24 = vadd.f32 %v1886_v44, %v1885_v50  ;;  %v1892_v18 = vcombine.low %v1866_v56, %v1873_v45  ;;  %2416 = vrcp.f32 %v1973_v13 }
 0x11f   : > { %v2411_v12 = vpop.eup %2410 }
 0x120   : > { %v1893_v29 = vcombine.low %v1880_v27, %v1887_v24  ;;  %v1900_v28 = vrot.slane %v1892_v18, %v3769_v47  ;;  %v2413_v9 = vpop.eup %2412  ;;  %v1982_v3 = vmul.f32 %v2418_v40, %v2411_v12 }
 0x121   : > { %v2415_v46 = vpop.eup %2414  ;;  %v1983_v53 = vmul.f32 %v2419_v61, %v2413_v9 }
 0x122   : > { %v1907_v52 = vrot.slane %v1893_v29, %v3769_v47  ;;  %v1984_v25 = vmul.f32 %v2420_v32, %v2415_v46 }
 0x124   : > { %v1908_v62 = vcombine.low %v1900_v28, %v1907_v52 }
 0x126   : > { %v1915_v22 = vrot.slane %v1908_v62, %v3769_v47 }
 0x128   : > { %2221 = vst.msk [vmem:[%s3470_s24 + $0x7] ss:$8 sm:$0xf] %vm3453_vm0, %v1915_v22  ;;  %v2417_v16 = vpop.eup %2416 }
 0x129   : > { %v1985_v47 = vmul.f32 %v2421_v21, %v2417_v16 }
 0x12f   : > { %v1920_v39 = vld [vmem:[%s3470_s24] sm:$0xff]  ;;  %v1921_v10 = vld [vmem:[%s3470_s24 + $0x8] sm:$0xff]  ;;  %v1922_v5 = vld [vmem:[%s3470_s24 + $0x10] sm:$0xff] }
 0x130   : > { %v1923_v43 = vld [vmem:[%s3470_s24 + $0x18] sm:$0xff]  ;;  %v1950_v15 = vadd.f32 %v3827_v23, %v1920_v39  ;;  %v1951_v63 = vadd.f32 %v3828_v55, %v1921_v10  ;;  %v1952_v14 = vadd.f32 %v3829_v51, %v1922_v5 }
 0x131   : > { %v1953_v37 = vadd.f32 %v3830_v26, %v1923_v43 }
 0x132   : > { %v1986_v41 = vmul.f32 %v1982_v3, %v1950_v15  ;;  %v1987_v35 = vmul.f32 %v1983_v53, %v1951_v63  ;;  %v1988_v19 = vmul.f32 %v1984_v25, %v1952_v14 }
 0x133   : > { %v1989_v20 = vmul.f32 %v1985_v47, %v1953_v37 }
 0x134   : > { %1990 = vst [vmem:[%s3470_s24] sm:$0xff] %v1986_v41  ;;  %1991 = vst [vmem:[%s3470_s24 + $0x8] sm:$0xff] %v1987_v35 }
 0x135   : > { %1992 = vst [vmem:[%s3470_s24 + $0x10] sm:$0xff] %v1988_v19  ;;  %1993 = vst [vmem:[%s3470_s24 + $0x18] sm:$0xff] %v1989_v20 }
 0x136 PF: > { %s17_s26 = sadd.s32 1, %s2444_s26   ;;  %s3831_s24 = smov %s2440_s25 }
 0x137   : > { %p14_p5 = scmp.ge.s32.totalorder %s17_s26, 4   ;;  %s3832_s25 = smov %s3834_s27 }
 0x139   :  { %16 = sbr.rel (!%p14_p5) target bundleno = 2 (0x2), region = 117 }

</bundles_post_ra>
